<compile_context>
chip_gen: v7x
topology: tpu7x:2x2x1
jax: 0.10.0
libtpu: 0.0.40
codegen_flags: <defaults>
</compile_context>

<pallas_src>
import functools

import jax
import jax.numpy as jnp
from jax.experimental import pallas as pl
from jax.experimental.pallas import tpu as pltpu


COMPUTE_DTYPE = jnp.bfloat16          # storage / MXU-input dtype (accum stays f32)
_VMEM_LIMIT = 32 * 1024 * 1024        # explicit scoped-VMEM budget (fits v5e/v6e/v7x)


def _compiler_params(semantics):
    return pltpu.CompilerParams(dimension_semantics=semantics,
                                vmem_limit_bytes=_VMEM_LIMIT)


# ----------------------------- Pallas kernels ------------------------------

def _s2d_conv_kernel(z_ref, w_ref, b_ref, *rest, ow, cin_eff, cout,
                     fuse_leaky, emit_stats, slope):
    """Stride-2 conv as a 2x2 stride-1 conv on space-to-depth input.

    z_ref : (1, OH+1, (OW+1)*cin_eff)  padded + space-to-depth, lane-flattened
    w_ref : (4, OW*cin_eff, OW*cout)   block-diagonal per-tap weights (bf16)
    b_ref : (1, OW*cout)               per-(ox, channel) bias (f32)
    out   : (1, OH, OW*cout)           conv output [+ BN sum / sum-of-squares]
    """
    if emit_stats:
        o_ref, sum_ref, sq_ref = rest
    else:
        (o_ref,) = rest
    oh = o_ref.shape[1]

    z = z_ref[0].astype(jnp.float32)                   # whole per-sample block
    acc = jnp.zeros((oh, ow * cout), jnp.float32)
    for t in range(4):                                 # 4 taps of the 2x2 conv
        u, v = t // 2, t % 2
        xs = z[u:u + oh, v * cin_eff:(v + ow) * cin_eff].astype(COMPUTE_DTYPE)
        acc = acc + jnp.dot(xs, w_ref[t], preferred_element_type=jnp.float32)
    acc = acc + b_ref[...]

    if emit_stats:                                     # fused BN batch statistics
        @pl.when(pl.program_id(0) == 0)
        def _():
            sum_ref[...] = jnp.zeros_like(sum_ref)
            sq_ref[...] = jnp.zeros_like(sq_ref)
        sum_ref[...] += jnp.sum(acc, axis=0, keepdims=True)
        sq_ref[...] += jnp.sum(acc * acc, axis=0, keepdims=True)

    if fuse_leaky:
        acc = jnp.where(acc >= 0, acc, slope * acc)
    o_ref[...] = acc[None].astype(o_ref.dtype)


def _pad_conv_kernel(x_ref, scale_ref, shift_ref, w_ref, b_ref, *rest,
                     cin, iw, cout, apply_in_act, fuse_leaky, emit_stats, slope):
    """Stride-1 k=4 conv with in-kernel zero padding and fused input BN+LeakyReLU.

    x_ref     : (1, IH, IW*cin)        raw (pre-BN-affine) previous conv output
    scale_ref : (1, IW*cin)            per-channel BN scale, tiled along W (f32)
    shift_ref : (1, IW*cin)            per-channel BN shift, tiled along W (f32)
    w_ref     : (16, OW*cin, OW*cout)  block-diagonal per-tap weights (bf16)
    b_ref     : (1, OW*cout)
    out       : (1, OH, OW*cout)       [+ BN sum / sum-of-squares]
    scratch   : (IH+2, (IW+2)*cin) f32 zero-padded activated-input canvas
    """
    if emit_stats:
        o_ref, sum_ref, sq_ref, xpad_ref = rest
    else:
        o_ref, xpad_ref = rest
    ih = x_ref.shape[1]
    oh = o_ref.shape[1]
    ow = iw - 1

    x = x_ref[0].astype(jnp.float32)
    if apply_in_act:                                   # BN affine + LeakyReLU of input
        x = x * scale_ref[...] + shift_ref[...]
        x = jnp.where(x >= 0, x, slope * x)

    # Zero padding happens *after* the activation (conv pads the feature map).
    xpad_ref[...] = jnp.zeros_like(xpad_ref)
    xpad_ref[1:ih + 1, cin:(iw + 1) * cin] = x
    xp = xpad_ref[...]

    acc = jnp.zeros((oh, ow * cout), jnp.float32)
    for di in range(4):
        for dj in range(4):
            xs = xp[di:di + oh, dj * cin:(dj + ow) * cin].astype(COMPUTE_DTYPE)
            acc = acc + jnp.dot(xs, w_ref[di * 4 + dj],
                                preferred_element_type=jnp.float32)
    acc = acc + b_ref[...]

    if emit_stats:
        @pl.when(pl.program_id(0) == 0)
        def _():
            sum_ref[...] = jnp.zeros_like(sum_ref)
            sq_ref[...] = jnp.zeros_like(sq_ref)
        sum_ref[...] += jnp.sum(acc, axis=0, keepdims=True)
        sq_ref[...] += jnp.sum(acc * acc, axis=0, keepdims=True)

    if fuse_leaky:
        acc = jnp.where(acc >= 0, acc, slope * acc)
    o_ref[...] = acc[None].astype(o_ref.dtype)


def _bn_act_kernel(y_ref, scale_ref, shift_ref, o_ref, *, slope):
    """Lane-dense per-channel affine (train-mode BN) + LeakyReLU on (1, H, W*C)."""
    y = y_ref[0].astype(jnp.float32) * scale_ref[...] + shift_ref[...]
    o_ref[...] = jnp.where(y >= 0, y, slope * y)[None].astype(o_ref.dtype)


# ----------------------------- pallas_call wrappers -------------------------

def _s2d_conv(z_flat, wbig, bbig, *, ow, cin_eff, cout, fuse_leaky, emit_stats,
              out_dtype, slope):
    n, zh, zwc = z_flat.shape
    oh = zh - 1
    nw = ow * cout
    kern = functools.partial(_s2d_conv_kernel, ow=ow, cin_eff=cin_eff, cout=cout,
                             fuse_leaky=fuse_leaky, emit_stats=emit_stats, slope=slope)
    out_shape = [jax.ShapeDtypeStruct((n, oh, nw), out_dtype)]
    out_specs = [pl.BlockSpec((1, oh, nw), lambda i: (i, 0, 0))]
    if emit_stats:
        out_shape += [jax.ShapeDtypeStruct((1, nw), jnp.float32)] * 2
        out_specs += [pl.BlockSpec((1, nw), lambda i: (0, 0)),
                      pl.BlockSpec((1, nw), lambda i: (0, 0))]
    return pl.pallas_call(
        kern,
        out_shape=tuple(out_shape),
        grid_spec=pltpu.PrefetchScalarGridSpec(
            num_scalar_prefetch=0,
            grid=(n,),
            in_specs=[
                pl.BlockSpec((1, zh, zwc), lambda i: (i, 0, 0)),
                pl.BlockSpec(wbig.shape, lambda i: (0, 0, 0)),
                pl.BlockSpec((1, nw), lambda i: (0, 0)),
            ],
            out_specs=tuple(out_specs),
        ),
        # BN stats accumulate across the batch grid axis -> must be "arbitrary".
        compiler_params=_compiler_params(
            ("arbitrary",) if emit_stats else ("parallel",)),
    )(z_flat, wbig, bbig)


def _pad_conv(x_flat, scale_flat, shift_flat, wbig, bbig, *, cin, iw, cout,
              apply_in_act, fuse_leaky, emit_stats, out_dtype, slope):
    n, ih, iwc = x_flat.shape
    oh, ow = ih - 1, iw - 1
    nw = ow * cout
    kern = functools.partial(_pad_conv_kernel, cin=cin, iw=iw, cout=cout,
                             apply_in_act=apply_in_act, fuse_leaky=fuse_leaky,
                             emit_stats=emit_stats, slope=slope)
    out_shape = [jax.ShapeDtypeStruct((n, oh, nw), out_dtype)]
    out_specs = [pl.BlockSpec((1, oh, nw), lambda i: (i, 0, 0))]
    if emit_stats:
        out_shape += [jax.ShapeDtypeStruct((1, nw), jnp.float32)] * 2
        out_specs += [pl.BlockSpec((1, nw), lambda i: (0, 0)),
                      pl.BlockSpec((1, nw), lambda i: (0, 0))]
    return pl.pallas_call(
        kern,
        out_shape=tuple(out_shape),
        grid_spec=pltpu.PrefetchScalarGridSpec(
            num_scalar_prefetch=0,
            grid=(n,),
            in_specs=[
                pl.BlockSpec((1, ih, iwc), lambda i: (i, 0, 0)),
                pl.BlockSpec((1, iwc), lambda i: (0, 0)),
                pl.BlockSpec((1, iwc), lambda i: (0, 0)),
                pl.BlockSpec(wbig.shape, lambda i: (0, 0, 0)),
                pl.BlockSpec((1, nw), lambda i: (0, 0)),
            ],
            out_specs=tuple(out_specs),
            scratch_shapes=[pltpu.VMEM((ih + 2, (iw + 2) * cin), jnp.float32)],
        ),
        compiler_params=_compiler_params(
            ("arbitrary",) if emit_stats else ("parallel",)),
    )(x_flat, scale_flat, shift_flat, wbig, bbig)


def _bn_act(y_flat, scale_flat, shift_flat, *, slope):
    n, h, wc = y_flat.shape
    return pl.pallas_call(
        functools.partial(_bn_act_kernel, slope=slope),
        out_shape=jax.ShapeDtypeStruct((n, h, wc), y_flat.dtype),
        grid_spec=pltpu.PrefetchScalarGridSpec(
            num_scalar_prefetch=0,
            grid=(n,),
            in_specs=[
                pl.BlockSpec((1, h, wc), lambda i: (i, 0, 0)),
                pl.BlockSpec((1, wc), lambda i: (0, 0)),
                pl.BlockSpec((1, wc), lambda i: (0, 0)),
            ],
            out_specs=pl.BlockSpec((1, h, wc), lambda i: (i, 0, 0)),
        ),
        compiler_params=_compiler_params(("parallel",)),
    )(y_flat, scale_flat, shift_flat)


# ----------------------------- layout / weight glue --------------------------

def _space_to_depth_pad(x_nhwc):
    """pad=1 then 2x2 space-to-depth: (N,H,W,C) -> (N,(H+2)//2,(W+2)//2,4C)."""
    n, h, w, c = x_nhwc.shape
    assert h % 2 == 0 and w % 2 == 0, "stride-2 layers expect even spatial dims"
    xp = jnp.pad(x_nhwc, ((0, 0), (1, 1), (1, 1), (0, 0)))
    hp, wp = h + 2, w + 2
    z = xp.reshape(n, hp // 2, 2, wp // 2, 2, c)
    z = jnp.transpose(z, (0, 1, 3, 2, 4, 5))          # (n, u, v, a, b, c)
    return z.reshape(n, hp // 2, wp // 2, 4 * c)


def _block_diag_taps(wtaps, ow):
    """(T, K, Cout) per-tap weights -> (T, ow*K, ow*Cout) block-diagonal."""
    t, k, cout = wtaps.shape
    eye = jnp.eye(ow, dtype=wtaps.dtype)
    wbig = jnp.einsum('ij,tkc->tikjc', eye, wtaps)
    return wbig.reshape(t, ow * k, ow * cout)


def _s2_tap_weights(w):
    """(Cout,Cin,4,4) -> (4, 4*Cin, Cout) taps of the equivalent 2x2 conv on the
    space-to-depth input (tap t = u*2+v, rows ordered (a*2+b)*Cin + c)."""
    cout, cin = w.shape[0], w.shape[1]
    wt = jnp.transpose(w, (2, 3, 1, 0))               # (di, dj, cin, cout)
    wr = wt.reshape(2, 2, 2, 2, cin, cout)            # (u, a, v, b, cin, cout)
    wr = jnp.transpose(wr, (0, 2, 1, 3, 4, 5))        # (u, v, a, b, cin, cout)
    return wr.reshape(4, 4 * cin, cout)


def _s1_tap_weights(w, cout_pad):
    """(Cout,Cin,4,4) -> (16, Cin, Cout_pad) taps (t = di*4 + dj)."""
    cout, cin = w.shape[0], w.shape[1]
    wt = jnp.transpose(w, (2, 3, 1, 0)).reshape(16, cin, cout)
    if cout_pad > cout:
        wt = jnp.pad(wt, ((0, 0), (0, 0), (0, cout_pad - cout)))
    return wt


# --------------------------- model construction -----------------------------

def init_params(key, input_nc=3, ndf=8, n_layers=3, kernel_size=4):
    """Mirrors NLayerDiscriminator.__init__ (BatchNorm norm_layer -> use_bias=False)."""
    cfg = [dict(cin=input_nc, cout=ndf, stride=2, bn=False, act=True)]
    nf_mult = 1
    for n in range(1, n_layers):
        prev, nf_mult = nf_mult, min(2 ** n, 8)
        cfg.append(dict(cin=ndf * prev, cout=ndf * nf_mult, stride=2, bn=True, act=True))
    prev, nf_mult = nf_mult, min(2 ** n_layers, 8)
    cfg.append(dict(cin=ndf * prev, cout=ndf * nf_mult, stride=1, bn=True, act=True))
    cfg.append(dict(cin=ndf * nf_mult, cout=1, stride=1, bn=False, act=False))

    params = []
    for layer in cfg:
        key, wk, bk = jax.random.split(key, 3)
        cin, cout = layer["cin"], layer["cout"]
        fan_in = cin * kernel_size * kernel_size
        w = jax.random.normal(wk, (cout, cin, kernel_size, kernel_size),
                              jnp.float32) / jnp.sqrt(float(fan_in))
        if layer["bn"]:
            b = jnp.zeros((cout,), jnp.float32)      # conv bias disabled before BN
            gamma = jnp.ones((cout,), jnp.float32)   # PyTorch BN affine defaults
            beta = jnp.zeros((cout,), jnp.float32)
        else:
            b = 0.01 * jax.random.normal(bk, (cout,), jnp.float32)
            gamma = beta = None
        params.append(dict(**layer, w=w, b=b, gamma=gamma, beta=beta))
    return params


def nlayer_discriminator(x_nchw, params, *, slope=0.2, eps=1e-5):
    n = x_nchw.shape[0]
    x = jnp.transpose(x_nchw, (0, 2, 3, 1))                 # NCHW -> NHWC
    cur_h, cur_w, cur_c = x.shape[1], x.shape[2], x.shape[3]
    act = x.reshape(n, cur_h, cur_w * cur_c)                # lane-flattened NHWC
    pending = None                                          # unapplied BN (scale, shift)

    for li, p in enumerate(params):
        cout, stride = p["cout"], p["stride"]
        is_last = li == len(params) - 1
        out_dtype = jnp.float32 if is_last else COMPUTE_DTYPE

        if stride == 2:
            if pending is not None:
                # Zero padding must follow BN affine + LeakyReLU, so the affine
                # cannot ride inside this conv; apply it lane-dense first.
                sc, sh = pending
                pending = None
                act = _bn_act(act,
                              jnp.tile(sc, cur_w).reshape(1, cur_w * cur_c),
                              jnp.tile(sh, cur_w).reshape(1, cur_w * cur_c),
                              slope=slope)
            x4 = act.reshape(n, cur_h, cur_w, cur_c).astype(COMPUTE_DTYPE)
            z = _space_to_depth_pad(x4)
            zh, zw = z.shape[1], z.shape[2]
            oh, ow = zh - 1, zw - 1
            z_flat = z.reshape(n, zh, zw * 4 * cur_c)
            wbig = _block_diag_taps(_s2_tap_weights(p["w"]), ow).astype(COMPUTE_DTYPE)
            bbig = jnp.tile(p["b"], ow).reshape(1, ow * cout).astype(jnp.float32)
            outs = _s2d_conv(z_flat, wbig, bbig, ow=ow, cin_eff=4 * cur_c, cout=cout,
                             fuse_leaky=(p["act"] and not p["bn"]),
                             emit_stats=p["bn"], out_dtype=out_dtype, slope=slope)
            cout_store = cout
        else:
            # stride-1: BN affine + LeakyReLU of the input is fused into the conv.
            cout_store = 128 if (is_last and cout < 128) else cout   # lane-dense last layer
            if pending is not None:
                sc, sh = pending
                pending = None
                apply_in = True
            else:
                sc = jnp.ones((cur_c,), jnp.float32)
                sh = jnp.zeros((cur_c,), jnp.float32)
                apply_in = False
            scale_flat = jnp.tile(sc, cur_w).reshape(1, cur_w * cur_c)
            shift_flat = jnp.tile(sh, cur_w).reshape(1, cur_w * cur_c)
            oh, ow = cur_h - 1, cur_w - 1
            wbig = _block_diag_taps(_s1_tap_weights(p["w"], cout_store),
                                    ow).astype(COMPUTE_DTYPE)
            bpad = p["b"] if cout_store == cout else jnp.pad(p["b"], (0, cout_store - cout))
            bbig = jnp.tile(bpad, ow).reshape(1, ow * cout_store).astype(jnp.float32)
            outs = _pad_conv(act.astype(COMPUTE_DTYPE), scale_flat, shift_flat, wbig, bbig,
                             cin=cur_c, iw=cur_w, cout=cout_store, apply_in_act=apply_in,
                             fuse_leaky=(p["act"] and not p["bn"]),
                             emit_stats=p["bn"], out_dtype=out_dtype, slope=slope)

        if p["bn"]:
            # Fold the fused per-(ox, channel) sums into per-channel BN scale/shift.
            y, ssum, ssq = outs
            m = n * oh * ow
            csum = ssum.reshape(ow, cout_store)[:, :cout].sum(axis=0)
            csq = ssq.reshape(ow, cout_store)[:, :cout].sum(axis=0)
            mean = csum / m
            var = jnp.maximum(csq / m - mean * mean, 0.0)   # biased var (train mode), clamped
            scale = p["gamma"] / jnp.sqrt(var + eps)
            shift = p["beta"] - mean * scale
            pending = (scale, shift)                        # applied by the consumer
        else:
            y = outs[0]

        act = y
        cur_h, cur_w, cur_c = oh, ow, cout_store

    # Final layer has no BN in this architecture, so `pending` is always None here.
    yf = act.reshape(n, cur_h, cur_w, cur_c)[..., :params[-1]["cout"]]
    return jnp.transpose(yf, (0, 3, 1, 2)).astype(jnp.float32)   # NHWC -> NCHW


# ---------------------------------- main -------------------------------------

if __name__ == "__main__":
    key = jax.random.PRNGKey(0)
    key, xkey = jax.random.split(key)

    # Small but structurally faithful config: input_nc=3, ndf=8, n_layers=3.
    params = init_params(key, input_nc=3, ndf=8, n_layers=3)
    x = jax.random.normal(xkey, (2, 3, 32, 32), jnp.float32)   # NCHW, like PyTorch

    fwd = jax.jit(lambda inp: nlayer_discriminator(inp, params))
    out = fwd(x)
    jax.block_until_ready(out)

    # 32 -> 16 -> 8 -> 4 -> 3 -> 2 spatially, 1 output channel (PatchGAN map).
    assert out.shape == (2, 1, 2, 2), out.shape
    assert out.dtype == jnp.float32
    print("KERNEL_OK")
</pallas_src>

<mosaic_0001>
module attributes {stable_mosaic.version = 11 : i64} {
  func.func @_s2d_conv_kernel(%arg0: i32, %arg1: memref<1x17x204xbf16, #tpu.memory_space<vmem>>, %arg2: memref<4x192x128xbf16, #tpu.memory_space<vmem>>, %arg3: memref<1x128xf32, #tpu.memory_space<vmem>>, %arg4: memref<1x16x128xbf16, #tpu.memory_space<vmem>>) attributes {dimension_semantics = [#tpu.dimension_semantics<parallel>], iteration_bounds = array<i64: 2>, scalar_prefetch = 0 : i64, scratch_operands = 0 : i64, tpu.core_type = #tpu.core_type<tc>, window_params = [{transform_indices = @transform_0, window_bounds = array<i64: 1, 17, 204>}, {pipeline_mode = #tpu.pipeline_mode<synchronous>, transform_indices = @transform_1, window_bounds = array<i64: 4, 192, 128>}, {pipeline_mode = #tpu.pipeline_mode<synchronous>, transform_indices = @transform_2, window_bounds = array<i64: 1, 128>}, {transform_indices = @transform_3, window_bounds = array<i64: 1, 16, 128>}]} {
    %c0 = arith.constant 0 : index
    %c0_0 = arith.constant 0 : index
    %c0_1 = arith.constant 0 : index
    %0 = vector.load %arg1[%c0, %c0_0, %c0_1] : memref<1x17x204xbf16, #tpu.memory_space<vmem>>, vector<1x17x204xbf16>
    %1 = vector.shape_cast %0 : vector<1x17x204xbf16> to vector<17x204xbf16>
    %2 = arith.extf %1 : vector<17x204xbf16> to vector<17x204xf32>
    %cst = arith.constant 0.000000e+00 : f32
    %3 = vector.broadcast %cst : f32 to vector<16x128xf32>
    %4 = vector.extract_strided_slice %2 {offsets = [0, 0], sizes = [16, 192], strides = [1, 1]} : vector<17x204xf32> to vector<16x192xf32>
    %5 = arith.truncf %4 : vector<16x192xf32> to vector<16x192xbf16>
    %c0_2 = arith.constant 0 : index
    %c0_3 = arith.constant 0 : index
    %c0_4 = arith.constant 0 : index
    %6 = vector.load %arg2[%c0_2, %c0_3, %c0_4] : memref<4x192x128xbf16, #tpu.memory_space<vmem>>, vector<1x192x128xbf16>
    %7 = vector.shape_cast %6 : vector<1x192x128xbf16> to vector<192x128xbf16>
    %cst_5 = arith.constant dense<0.000000e+00> : vector<16x128xf32>
    %8 = tpu.matmul %5, %7, %cst_5 {dimension_numbers = #tpu.dot_dimension_numbers<[1], [0], [0], [1], [0, 0, 1, 1], [], []>} : vector<16x192xbf16>, vector<192x128xbf16>, vector<16x128xf32> -> vector<16x128xf32>
    %9 = arith.addf %3, %8 : vector<16x128xf32>
    %10 = vector.extract_strided_slice %2 {offsets = [0, 12], sizes = [16, 192], strides = [1, 1]} : vector<17x204xf32> to vector<16x192xf32>
    %11 = arith.truncf %10 : vector<16x192xf32> to vector<16x192xbf16>
    %c1 = arith.constant 1 : index
    %c0_6 = arith.constant 0 : index
    %c0_7 = arith.constant 0 : index
    %12 = vector.load %arg2[%c1, %c0_6, %c0_7] : memref<4x192x128xbf16, #tpu.memory_space<vmem>>, vector<1x192x128xbf16>
    %13 = vector.shape_cast %12 : vector<1x192x128xbf16> to vector<192x128xbf16>
    %cst_8 = arith.constant dense<0.000000e+00> : vector<16x128xf32>
    %14 = tpu.matmul %11, %13, %cst_8 {dimension_numbers = #tpu.dot_dimension_numbers<[1], [0], [0], [1], [0, 0, 1, 1], [], []>} : vector<16x192xbf16>, vector<192x128xbf16>, vector<16x128xf32> -> vector<16x128xf32>
    %15 = arith.addf %9, %14 : vector<16x128xf32>
    %16 = vector.extract_strided_slice %2 {offsets = [1, 0], sizes = [16, 192], strides = [1, 1]} : vector<17x204xf32> to vector<16x192xf32>
    %17 = arith.truncf %16 : vector<16x192xf32> to vector<16x192xbf16>
    %c2 = arith.constant 2 : index
    %c0_9 = arith.constant 0 : index
    %c0_10 = arith.constant 0 : index
    %18 = vector.load %arg2[%c2, %c0_9, %c0_10] : memref<4x192x128xbf16, #tpu.memory_space<vmem>>, vector<1x192x128xbf16>
    %19 = vector.shape_cast %18 : vector<1x192x128xbf16> to vector<192x128xbf16>
    %cst_11 = arith.constant dense<0.000000e+00> : vector<16x128xf32>
    %20 = tpu.matmul %17, %19, %cst_11 {dimension_numbers = #tpu.dot_dimension_numbers<[1], [0], [0], [1], [0, 0, 1, 1], [], []>} : vector<16x192xbf16>, vector<192x128xbf16>, vector<16x128xf32> -> vector<16x128xf32>
    %21 = arith.addf %15, %20 : vector<16x128xf32>
    %22 = vector.extract_strided_slice %2 {offsets = [1, 12], sizes = [16, 192], strides = [1, 1]} : vector<17x204xf32> to vector<16x192xf32>
    %23 = arith.truncf %22 : vector<16x192xf32> to vector<16x192xbf16>
    %c3 = arith.constant 3 : index
    %c0_12 = arith.constant 0 : index
    %c0_13 = arith.constant 0 : index
    %24 = vector.load %arg2[%c3, %c0_12, %c0_13] : memref<4x192x128xbf16, #tpu.memory_space<vmem>>, vector<1x192x128xbf16>
    %25 = vector.shape_cast %24 : vector<1x192x128xbf16> to vector<192x128xbf16>
    %cst_14 = arith.constant dense<0.000000e+00> : vector<16x128xf32>
    %26 = tpu.matmul %23, %25, %cst_14 {dimension_numbers = #tpu.dot_dimension_numbers<[1], [0], [0], [1], [0, 0, 1, 1], [], []>} : vector<16x192xbf16>, vector<192x128xbf16>, vector<16x128xf32> -> vector<16x128xf32>
    %27 = arith.addf %21, %26 : vector<16x128xf32>
    %c0_15 = arith.constant 0 : index
    %c0_16 = arith.constant 0 : index
    %28 = vector.load %arg3[%c0_15, %c0_16] : memref<1x128xf32, #tpu.memory_space<vmem>>, vector<1x128xf32>
    %29 = vector.broadcast %28 : vector<1x128xf32> to vector<16x128xf32>
    %30 = arith.addf %27, %29 : vector<16x128xf32>
    %cst_17 = arith.constant 0.000000e+00 : f32
    %31 = vector.broadcast %cst_17 : f32 to vector<16x128xf32>
    %32 = arith.cmpf oge, %30, %31 : vector<16x128xf32>
    %cst_18 = arith.constant 2.000000e-01 : f32
    %33 = vector.broadcast %cst_18 : f32 to vector<16x128xf32>
    %34 = arith.mulf %33, %30 : vector<16x128xf32>
    %35 = arith.select %32, %30, %34 : vector<16x128xi1>, vector<16x128xf32>
    %36 = vector.shape_cast %35 : vector<16x128xf32> to vector<1x16x128xf32>
    %37 = arith.truncf %36 : vector<1x16x128xf32> to vector<1x16x128xbf16>
    %c0_19 = arith.constant 0 : index
    %c0_20 = arith.constant 0 : index
    %c0_21 = arith.constant 0 : index
    %38 = vector.load %arg4[%c0_19, %c0_20, %c0_21] : memref<1x16x128xbf16, #tpu.memory_space<vmem>>, vector<1x16x128xbf16>
    tpu.vector_store %arg4[%c0_19, %c0_20, %c0_21], %37 {strides = array<i32>} : memref<1x16x128xbf16, #tpu.memory_space<vmem>>, vector<1x16x128xbf16>,
    return
  }
  func.func @transform_0(%arg0: i32) -> (i32, i32, i32) {
    %c0_i32 = arith.constant 0 : i32
    %c0_i32_0 = arith.constant 0 : i32
    %c0_i32_1 = arith.constant 0 : i32
    return %arg0, %c0_i32, %c0_i32_0 : i32, i32, i32
  }
  func.func @transform_1(%arg0: i32) -> (i32, i32, i32) {
    %c0_i32 = arith.constant 0 : i32
    %c0_i32_0 = arith.constant 0 : i32
    %c0_i32_1 = arith.constant 0 : i32
    %c0_i32_2 = arith.constant 0 : i32
    return %c0_i32, %c0_i32_0, %c0_i32_1 : i32, i32, i32
  }
  func.func @transform_2(%arg0: i32) -> (i32, i32) {
    %c0_i32 = arith.constant 0 : i32
    %c0_i32_0 = arith.constant 0 : i32
    %c0_i32_1 = arith.constant 0 : i32
    return %c0_i32, %c0_i32_0 : i32, i32
  }
  func.func @transform_3(%arg0: i32) -> (i32, i32, i32) {
    %c0_i32 = arith.constant 0 : i32
    %c0_i32_0 = arith.constant 0 : i32
    %c0_i32_1 = arith.constant 0 : i32
    return %arg0, %c0_i32, %c0_i32_0 : i32, i32, i32
  }
}

module attributes {stable_mosaic.version = 11 : i64} {
  func.func @_s2d_conv_kernel(%arg0: i32, %arg1: memref<1x9x288xbf16, #tpu.memory_space<vmem>>, %arg2: memref<4x256x128xbf16, #tpu.memory_space<vmem>>, %arg3: memref<1x128xf32, #tpu.memory_space<vmem>>, %arg4: memref<1x8x128xbf16, #tpu.memory_space<vmem>>, %arg5: memref<1x128xf32, #tpu.memory_space<vmem>>, %arg6: memref<1x128xf32, #tpu.memory_space<vmem>>) attributes {dimension_semantics = [#tpu.dimension_semantics<arbitrary>], iteration_bounds = array<i64: 2>, scalar_prefetch = 0 : i64, scratch_operands = 0 : i64, tpu.core_type = #tpu.core_type<tc>, window_params = [{transform_indices = @transform_0, window_bounds = array<i64: 1, 9, 288>}, {pipeline_mode = #tpu.pipeline_mode<synchronous>, transform_indices = @transform_1, window_bounds = array<i64: 4, 256, 128>}, {pipeline_mode = #tpu.pipeline_mode<synchronous>, transform_indices = @transform_2, window_bounds = array<i64: 1, 128>}, {transform_indices = @transform_3, window_bounds = array<i64: 1, 8, 128>}, {pipeline_mode = #tpu.pipeline_mode<synchronous>, transform_indices = @transform_4, window_bounds = array<i64: 1, 128>}, {pipeline_mode = #tpu.pipeline_mode<synchronous>, transform_indices = @transform_5, window_bounds = array<i64: 1, 128>}]} {
    %c0 = arith.constant 0 : index
    %c0_0 = arith.constant 0 : index
    %c0_1 = arith.constant 0 : index
    %0 = vector.load %arg1[%c0, %c0_0, %c0_1] : memref<1x9x288xbf16, #tpu.memory_space<vmem>>, vector<1x9x288xbf16>
    %1 = vector.shape_cast %0 : vector<1x9x288xbf16> to vector<9x288xbf16>
    %2 = arith.extf %1 : vector<9x288xbf16> to vector<9x288xf32>
    %cst = arith.constant 0.000000e+00 : f32
    %3 = vector.broadcast %cst : f32 to vector<8x128xf32>
    %4 = vector.extract_strided_slice %2 {offsets = [0, 0], sizes = [8, 256], strides = [1, 1]} : vector<9x288xf32> to vector<8x256xf32>
    %5 = arith.truncf %4 : vector<8x256xf32> to vector<8x256xbf16>
    %c0_2 = arith.constant 0 : index
    %c0_3 = arith.constant 0 : index
    %c0_4 = arith.constant 0 : index
    %6 = vector.load %arg2[%c0_2, %c0_3, %c0_4] : memref<4x256x128xbf16, #tpu.memory_space<vmem>>, vector<1x256x128xbf16>
    %7 = vector.shape_cast %6 : vector<1x256x128xbf16> to vector<256x128xbf16>
    %cst_5 = arith.constant dense<0.000000e+00> : vector<8x128xf32>
    %8 = tpu.matmul %5, %7, %cst_5 {dimension_numbers = #tpu.dot_dimension_numbers<[1], [0], [0], [1], [0, 0, 1, 1], [], []>} : vector<8x256xbf16>, vector<256x128xbf16>, vector<8x128xf32> -> vector<8x128xf32>
    %9 = arith.addf %3, %8 : vector<8x128xf32>
    %10 = vector.extract_strided_slice %2 {offsets = [0, 32], sizes = [8, 256], strides = [1, 1]} : vector<9x288xf32> to vector<8x256xf32>
    %11 = arith.truncf %10 : vector<8x256xf32> to vector<8x256xbf16>
    %c1 = arith.constant 1 : index
    %c0_6 = arith.constant 0 : index
    %c0_7 = arith.constant 0 : index
    %12 = vector.load %arg2[%c1, %c0_6, %c0_7] : memref<4x256x128xbf16, #tpu.memory_space<vmem>>, vector<1x256x128xbf16>
    %13 = vector.shape_cast %12 : vector<1x256x128xbf16> to vector<256x128xbf16>
    %cst_8 = arith.constant dense<0.000000e+00> : vector<8x128xf32>
    %14 = tpu.matmul %11, %13, %cst_8 {dimension_numbers = #tpu.dot_dimension_numbers<[1], [0], [0], [1], [0, 0, 1, 1], [], []>} : vector<8x256xbf16>, vector<256x128xbf16>, vector<8x128xf32> -> vector<8x128xf32>
    %15 = arith.addf %9, %14 : vector<8x128xf32>
    %16 = vector.extract_strided_slice %2 {offsets = [1, 0], sizes = [8, 256], strides = [1, 1]} : vector<9x288xf32> to vector<8x256xf32>
    %17 = arith.truncf %16 : vector<8x256xf32> to vector<8x256xbf16>
    %c2 = arith.constant 2 : index
    %c0_9 = arith.constant 0 : index
    %c0_10 = arith.constant 0 : index
    %18 = vector.load %arg2[%c2, %c0_9, %c0_10] : memref<4x256x128xbf16, #tpu.memory_space<vmem>>, vector<1x256x128xbf16>
    %19 = vector.shape_cast %18 : vector<1x256x128xbf16> to vector<256x128xbf16>
    %cst_11 = arith.constant dense<0.000000e+00> : vector<8x128xf32>
    %20 = tpu.matmul %17, %19, %cst_11 {dimension_numbers = #tpu.dot_dimension_numbers<[1], [0], [0], [1], [0, 0, 1, 1], [], []>} : vector<8x256xbf16>, vector<256x128xbf16>, vector<8x128xf32> -> vector<8x128xf32>
    %21 = arith.addf %15, %20 : vector<8x128xf32>
    %22 = vector.extract_strided_slice %2 {offsets = [1, 32], sizes = [8, 256], strides = [1, 1]} : vector<9x288xf32> to vector<8x256xf32>
    %23 = arith.truncf %22 : vector<8x256xf32> to vector<8x256xbf16>
    %c3 = arith.constant 3 : index
    %c0_12 = arith.constant 0 : index
    %c0_13 = arith.constant 0 : index
    %24 = vector.load %arg2[%c3, %c0_12, %c0_13] : memref<4x256x128xbf16, #tpu.memory_space<vmem>>, vector<1x256x128xbf16>
    %25 = vector.shape_cast %24 : vector<1x256x128xbf16> to vector<256x128xbf16>
    %cst_14 = arith.constant dense<0.000000e+00> : vector<8x128xf32>
    %26 = tpu.matmul %23, %25, %cst_14 {dimension_numbers = #tpu.dot_dimension_numbers<[1], [0], [0], [1], [0, 0, 1, 1], [], []>} : vector<8x256xbf16>, vector<256x128xbf16>, vector<8x128xf32> -> vector<8x128xf32>
    %27 = arith.addf %21, %26 : vector<8x128xf32>
    %c0_15 = arith.constant 0 : index
    %c0_16 = arith.constant 0 : index
    %28 = vector.load %arg3[%c0_15, %c0_16] : memref<1x128xf32, #tpu.memory_space<vmem>>, vector<1x128xf32>
    %29 = vector.broadcast %28 : vector<1x128xf32> to vector<8x128xf32>
    %30 = arith.addf %27, %29 : vector<8x128xf32>
    %c0_i32 = arith.constant 0 : i32
    %31 = arith.cmpi eq, %arg0, %c0_i32 : i32
    %32 = arith.extui %31 : i1 to i32
    %c0_i32_17 = arith.constant 0 : i32
    %33 = arith.cmpi ne, %32, %c0_i32_17 : i32
    scf.if %33 {
      %cst_31 = arith.constant 0.000000e+00 : f32
      %48 = vector.broadcast %cst_31 : f32 to vector<1x128xf32>
      %c0_32 = arith.constant 0 : index
      %c0_33 = arith.constant 0 : index
      %49 = vector.load %arg5[%c0_32, %c0_33] : memref<1x128xf32, #tpu.memory_space<vmem>>, vector<1x128xf32>
      tpu.vector_store %arg5[%c0_32, %c0_33], %48 {strides = array<i32>} : memref<1x128xf32, #tpu.memory_space<vmem>>, vector<1x128xf32>,
      %cst_34 = arith.constant 0.000000e+00 : f32
      %50 = vector.broadcast %cst_34 : f32 to vector<1x128xf32>
      %c0_35 = arith.constant 0 : index
      %c0_36 = arith.constant 0 : index
      %51 = vector.load %arg6[%c0_35, %c0_36] : memref<1x128xf32, #tpu.memory_space<vmem>>, vector<1x128xf32>
      tpu.vector_store %arg6[%c0_35, %c0_36], %50 {strides = array<i32>} : memref<1x128xf32, #tpu.memory_space<vmem>>, vector<1x128xf32>,
    } else {
    }
    %c0_18 = arith.constant 0 : index
    %c0_19 = arith.constant 0 : index
    %34 = vector.load %arg5[%c0_18, %c0_19] : memref<1x128xf32, #tpu.memory_space<vmem>>, vector<1x128xf32>
    %cst_20 = arith.constant dense<0.000000e+00> : vector<128xf32>
    %35 = vector.multi_reduction <add>, %30, %cst_20 [0] : vector<8x128xf32> to vector<128xf32>
    %36 = vector.shape_cast %35 : vector<128xf32> to vector<1x128xf32>
    %37 = arith.addf %34, %36 : vector<1x128xf32>
    %c0_21 = arith.constant 0 : index
    %c0_22 = arith.constant 0 : index
    %38 = vector.load %arg5[%c0_21, %c0_22] : memref<1x128xf32, #tpu.memory_space<vmem>>, vector<1x128xf32>
    tpu.vector_store %arg5[%c0_21, %c0_22], %37 {strides = array<i32>} : memref<1x128xf32, #tpu.memory_space<vmem>>, vector<1x128xf32>,
    %c0_23 = arith.constant 0 : index
    %c0_24 = arith.constant 0 : index
    %39 = vector.load %arg6[%c0_23, %c0_24] : memref<1x128xf32, #tpu.memory_space<vmem>>, vector<1x128xf32>
    %40 = arith.mulf %30, %30 : vector<8x128xf32>
    %cst_25 = arith.constant dense<0.000000e+00> : vector<128xf32>
    %41 = vector.multi_reduction <add>, %40, %cst_25 [0] : vector<8x128xf32> to vector<128xf32>
    %42 = vector.shape_cast %41 : vector<128xf32> to vector<1x128xf32>
    %43 = arith.addf %39, %42 : vector<1x128xf32>
    %c0_26 = arith.constant 0 : index
    %c0_27 = arith.constant 0 : index
    %44 = vector.load %arg6[%c0_26, %c0_27] : memref<1x128xf32, #tpu.memory_space<vmem>>, vector<1x128xf32>
    tpu.vector_store %arg6[%c0_26, %c0_27], %43 {strides = array<i32>} : memref<1x128xf32, #tpu.memory_space<vmem>>, vector<1x128xf32>,
    %45 = vector.shape_cast %30 : vector<8x128xf32> to vector<1x8x128xf32>
    %46 = arith.truncf %45 : vector<1x8x128xf32> to vector<1x8x128xbf16>
    %c0_28 = arith.constant 0 : index
    %c0_29 = arith.constant 0 : index
    %c0_30 = arith.constant 0 : index
    %47 = vector.load %arg4[%c0_28, %c0_29, %c0_30] : memref<1x8x128xbf16, #tpu.memory_space<vmem>>, vector<1x8x128xbf16>
    tpu.vector_store %arg4[%c0_28, %c0_29, %c0_30], %46 {strides = array<i32>} : memref<1x8x128xbf16, #tpu.memory_space<vmem>>, vector<1x8x128xbf16>,
    return
  }
  func.func @transform_0(%arg0: i32) -> (i32, i32, i32) {
    %c0_i32 = arith.constant 0 : i32
    %c0_i32_0 = arith.constant 0 : i32
    %c0_i32_1 = arith.constant 0 : i32
    return %arg0, %c0_i32, %c0_i32_0 : i32, i32, i32
  }
  func.func @transform_1(%arg0: i32) -> (i32, i32, i32) {
    %c0_i32 = arith.constant 0 : i32
    %c0_i32_0 = arith.constant 0 : i32
    %c0_i32_1 = arith.constant 0 : i32
    %c0_i32_2 = arith.constant 0 : i32
    return %c0_i32, %c0_i32_0, %c0_i32_1 : i32, i32, i32
  }
  func.func @transform_2(%arg0: i32) -> (i32, i32) {
    %c0_i32 = arith.constant 0 : i32
    %c0_i32_0 = arith.constant 0 : i32
    %c0_i32_1 = arith.constant 0 : i32
    return %c0_i32, %c0_i32_0 : i32, i32
  }
  func.func @transform_3(%arg0: i32) -> (i32, i32, i32) {
    %c0_i32 = arith.constant 0 : i32
    %c0_i32_0 = arith.constant 0 : i32
    %c0_i32_1 = arith.constant 0 : i32
    return %arg0, %c0_i32, %c0_i32_0 : i32, i32, i32
  }
  func.func @transform_4(%arg0: i32) -> (i32, i32) {
    %c0_i32 = arith.constant 0 : i32
    %c0_i32_0 = arith.constant 0 : i32
    %c0_i32_1 = arith.constant 0 : i32
    return %c0_i32, %c0_i32_0 : i32, i32
  }
  func.func @transform_5(%arg0: i32) -> (i32, i32) {
    %c0_i32 = arith.constant 0 : i32
    %c0_i32_0 = arith.constant 0 : i32
    %c0_i32_1 = arith.constant 0 : i32
    return %c0_i32, %c0_i32_0 : i32, i32
  }
}

module attributes {stable_mosaic.version = 11 : i64} {
  func.func @_bn_act_kernel(%arg0: i32, %arg1: memref<1x8x128xbf16, #tpu.memory_space<vmem>>, %arg2: memref<1x128xf32, #tpu.memory_space<vmem>>, %arg3: memref<1x128xf32, #tpu.memory_space<vmem>>, %arg4: memref<1x8x128xbf16, #tpu.memory_space<vmem>>) attributes {dimension_semantics = [#tpu.dimension_semantics<parallel>], iteration_bounds = array<i64: 2>, scalar_prefetch = 0 : i64, scratch_operands = 0 : i64, tpu.core_type = #tpu.core_type<tc>, window_params = [{transform_indices = @transform_0, window_bounds = array<i64: 1, 8, 128>}, {pipeline_mode = #tpu.pipeline_mode<synchronous>, transform_indices = @transform_1, window_bounds = array<i64: 1, 128>}, {pipeline_mode = #tpu.pipeline_mode<synchronous>, transform_indices = @transform_2, window_bounds = array<i64: 1, 128>}, {transform_indices = @transform_3, window_bounds = array<i64: 1, 8, 128>}]} {
    %c0 = arith.constant 0 : index
    %c0_0 = arith.constant 0 : index
    %c0_1 = arith.constant 0 : index
    %0 = vector.load %arg1[%c0, %c0_0, %c0_1] : memref<1x8x128xbf16, #tpu.memory_space<vmem>>, vector<1x8x128xbf16>
    %1 = vector.shape_cast %0 : vector<1x8x128xbf16> to vector<8x128xbf16>
    %2 = arith.extf %1 : vector<8x128xbf16> to vector<8x128xf32>
    %c0_2 = arith.constant 0 : index
    %c0_3 = arith.constant 0 : index
    %3 = vector.load %arg2[%c0_2, %c0_3] : memref<1x128xf32, #tpu.memory_space<vmem>>, vector<1x128xf32>
    %4 = vector.broadcast %3 : vector<1x128xf32> to vector<8x128xf32>
    %5 = arith.mulf %2, %4 : vector<8x128xf32>
    %c0_4 = arith.constant 0 : index
    %c0_5 = arith.constant 0 : index
    %6 = vector.load %arg3[%c0_4, %c0_5] : memref<1x128xf32, #tpu.memory_space<vmem>>, vector<1x128xf32>
    %7 = vector.broadcast %6 : vector<1x128xf32> to vector<8x128xf32>
    %8 = arith.addf %5, %7 : vector<8x128xf32>
    %cst = arith.constant 0.000000e+00 : f32
    %9 = vector.broadcast %cst : f32 to vector<8x128xf32>
    %10 = arith.cmpf oge, %8, %9 : vector<8x128xf32>
    %cst_6 = arith.constant 2.000000e-01 : f32
    %11 = vector.broadcast %cst_6 : f32 to vector<8x128xf32>
    %12 = arith.mulf %11, %8 : vector<8x128xf32>
    %13 = arith.select %10, %8, %12 : vector<8x128xi1>, vector<8x128xf32>
    %14 = vector.shape_cast %13 : vector<8x128xf32> to vector<1x8x128xf32>
    %15 = arith.truncf %14 : vector<1x8x128xf32> to vector<1x8x128xbf16>
    %c0_7 = arith.constant 0 : index
    %c0_8 = arith.constant 0 : index
    %c0_9 = arith.constant 0 : index
    %16 = vector.load %arg4[%c0_7, %c0_8, %c0_9] : memref<1x8x128xbf16, #tpu.memory_space<vmem>>, vector<1x8x128xbf16>
    tpu.vector_store %arg4[%c0_7, %c0_8, %c0_9], %15 {strides = array<i32>} : memref<1x8x128xbf16, #tpu.memory_space<vmem>>, vector<1x8x128xbf16>,
    return
  }
  func.func @transform_0(%arg0: i32) -> (i32, i32, i32) {
    %c0_i32 = arith.constant 0 : i32
    %c0_i32_0 = arith.constant 0 : i32
    %c0_i32_1 = arith.constant 0 : i32
    return %arg0, %c0_i32, %c0_i32_0 : i32, i32, i32
  }
  func.func @transform_1(%arg0: i32) -> (i32, i32) {
    %c0_i32 = arith.constant 0 : i32
    %c0_i32_0 = arith.constant 0 : i32
    %c0_i32_1 = arith.constant 0 : i32
    return %c0_i32, %c0_i32_0 : i32, i32
  }
  func.func @transform_2(%arg0: i32) -> (i32, i32) {
    %c0_i32 = arith.constant 0 : i32
    %c0_i32_0 = arith.constant 0 : i32
    %c0_i32_1 = arith.constant 0 : i32
    return %c0_i32, %c0_i32_0 : i32, i32
  }
  func.func @transform_3(%arg0: i32) -> (i32, i32, i32) {
    %c0_i32 = arith.constant 0 : i32
    %c0_i32_0 = arith.constant 0 : i32
    %c0_i32_1 = arith.constant 0 : i32
    return %arg0, %c0_i32, %c0_i32_0 : i32, i32, i32
  }
}

module attributes {stable_mosaic.version = 11 : i64} {
  func.func @_s2d_conv_kernel(%arg0: i32, %arg1: memref<1x5x320xbf16, #tpu.memory_space<vmem>>, %arg2: memref<4x256x128xbf16, #tpu.memory_space<vmem>>, %arg3: memref<1x128xf32, #tpu.memory_space<vmem>>, %arg4: memref<1x4x128xbf16, #tpu.memory_space<vmem>>, %arg5: memref<1x128xf32, #tpu.memory_space<vmem>>, %arg6: memref<1x128xf32, #tpu.memory_space<vmem>>) attributes {dimension_semantics = [#tpu.dimension_semantics<arbitrary>], iteration_bounds = array<i64: 2>, scalar_prefetch = 0 : i64, scratch_operands = 0 : i64, tpu.core_type = #tpu.core_type<tc>, window_params = [{transform_indices = @transform_0, window_bounds = array<i64: 1, 5, 320>}, {pipeline_mode = #tpu.pipeline_mode<synchronous>, transform_indices = @transform_1, window_bounds = array<i64: 4, 256, 128>}, {pipeline_mode = #tpu.pipeline_mode<synchronous>, transform_indices = @transform_2, window_bounds = array<i64: 1, 128>}, {transform_indices = @transform_3, window_bounds = array<i64: 1, 4, 128>}, {pipeline_mode = #tpu.pipeline_mode<synchronous>, transform_indices = @transform_4, window_bounds = array<i64: 1, 128>}, {pipeline_mode = #tpu.pipeline_mode<synchronous>, transform_indices = @transform_5, window_bounds = array<i64: 1, 128>}]} {
    %c0 = arith.constant 0 : index
    %c0_0 = arith.constant 0 : index
    %c0_1 = arith.constant 0 : index
    %0 = vector.load %arg1[%c0, %c0_0, %c0_1] : memref<1x5x320xbf16, #tpu.memory_space<vmem>>, vector<1x5x320xbf16>
    %1 = vector.shape_cast %0 : vector<1x5x320xbf16> to vector<5x320xbf16>
    %2 = arith.extf %1 : vector<5x320xbf16> to vector<5x320xf32>
    %cst = arith.constant 0.000000e+00 : f32
    %3 = vector.broadcast %cst : f32 to vector<4x128xf32>
    %4 = vector.extract_strided_slice %2 {offsets = [0, 0], sizes = [4, 256], strides = [1, 1]} : vector<5x320xf32> to vector<4x256xf32>
    %5 = arith.truncf %4 : vector<4x256xf32> to vector<4x256xbf16>
    %c0_2 = arith.constant 0 : index
    %c0_3 = arith.constant 0 : index
    %c0_4 = arith.constant 0 : index
    %6 = vector.load %arg2[%c0_2, %c0_3, %c0_4] : memref<4x256x128xbf16, #tpu.memory_space<vmem>>, vector<1x256x128xbf16>
    %7 = vector.shape_cast %6 : vector<1x256x128xbf16> to vector<256x128xbf16>
    %cst_5 = arith.constant dense<0.000000e+00> : vector<4x128xf32>
    %8 = tpu.matmul %5, %7, %cst_5 {dimension_numbers = #tpu.dot_dimension_numbers<[1], [0], [0], [1], [0, 0, 1, 1], [], []>} : vector<4x256xbf16>, vector<256x128xbf16>, vector<4x128xf32> -> vector<4x128xf32>
    %9 = arith.addf %3, %8 : vector<4x128xf32>
    %10 = vector.extract_strided_slice %2 {offsets = [0, 64], sizes = [4, 256], strides = [1, 1]} : vector<5x320xf32> to vector<4x256xf32>
    %11 = arith.truncf %10 : vector<4x256xf32> to vector<4x256xbf16>
    %c1 = arith.constant 1 : index
    %c0_6 = arith.constant 0 : index
    %c0_7 = arith.constant 0 : index
    %12 = vector.load %arg2[%c1, %c0_6, %c0_7] : memref<4x256x128xbf16, #tpu.memory_space<vmem>>, vector<1x256x128xbf16>
    %13 = vector.shape_cast %12 : vector<1x256x128xbf16> to vector<256x128xbf16>
    %cst_8 = arith.constant dense<0.000000e+00> : vector<4x128xf32>
    %14 = tpu.matmul %11, %13, %cst_8 {dimension_numbers = #tpu.dot_dimension_numbers<[1], [0], [0], [1], [0, 0, 1, 1], [], []>} : vector<4x256xbf16>, vector<256x128xbf16>, vector<4x128xf32> -> vector<4x128xf32>
    %15 = arith.addf %9, %14 : vector<4x128xf32>
    %16 = vector.extract_strided_slice %2 {offsets = [1, 0], sizes = [4, 256], strides = [1, 1]} : vector<5x320xf32> to vector<4x256xf32>
    %17 = arith.truncf %16 : vector<4x256xf32> to vector<4x256xbf16>
    %c2 = arith.constant 2 : index
    %c0_9 = arith.constant 0 : index
    %c0_10 = arith.constant 0 : index
    %18 = vector.load %arg2[%c2, %c0_9, %c0_10] : memref<4x256x128xbf16, #tpu.memory_space<vmem>>, vector<1x256x128xbf16>
    %19 = vector.shape_cast %18 : vector<1x256x128xbf16> to vector<256x128xbf16>
    %cst_11 = arith.constant dense<0.000000e+00> : vector<4x128xf32>
    %20 = tpu.matmul %17, %19, %cst_11 {dimension_numbers = #tpu.dot_dimension_numbers<[1], [0], [0], [1], [0, 0, 1, 1], [], []>} : vector<4x256xbf16>, vector<256x128xbf16>, vector<4x128xf32> -> vector<4x128xf32>
    %21 = arith.addf %15, %20 : vector<4x128xf32>
    %22 = vector.extract_strided_slice %2 {offsets = [1, 64], sizes = [4, 256], strides = [1, 1]} : vector<5x320xf32> to vector<4x256xf32>
    %23 = arith.truncf %22 : vector<4x256xf32> to vector<4x256xbf16>
    %c3 = arith.constant 3 : index
    %c0_12 = arith.constant 0 : index
    %c0_13 = arith.constant 0 : index
    %24 = vector.load %arg2[%c3, %c0_12, %c0_13] : memref<4x256x128xbf16, #tpu.memory_space<vmem>>, vector<1x256x128xbf16>
    %25 = vector.shape_cast %24 : vector<1x256x128xbf16> to vector<256x128xbf16>
    %cst_14 = arith.constant dense<0.000000e+00> : vector<4x128xf32>
    %26 = tpu.matmul %23, %25, %cst_14 {dimension_numbers = #tpu.dot_dimension_numbers<[1], [0], [0], [1], [0, 0, 1, 1], [], []>} : vector<4x256xbf16>, vector<256x128xbf16>, vector<4x128xf32> -> vector<4x128xf32>
    %27 = arith.addf %21, %26 : vector<4x128xf32>
    %c0_15 = arith.constant 0 : index
    %c0_16 = arith.constant 0 : index
    %28 = vector.load %arg3[%c0_15, %c0_16] : memref<1x128xf32, #tpu.memory_space<vmem>>, vector<1x128xf32>
    %29 = vector.broadcast %28 : vector<1x128xf32> to vector<4x128xf32>
    %30 = arith.addf %27, %29 : vector<4x128xf32>
    %c0_i32 = arith.constant 0 : i32
    %31 = arith.cmpi eq, %arg0, %c0_i32 : i32
    %32 = arith.extui %31 : i1 to i32
    %c0_i32_17 = arith.constant 0 : i32
    %33 = arith.cmpi ne, %32, %c0_i32_17 : i32
    scf.if %33 {
      %cst_31 = arith.constant 0.000000e+00 : f32
      %48 = vector.broadcast %cst_31 : f32 to vector<1x128xf32>
      %c0_32 = arith.constant 0 : index
      %c0_33 = arith.constant 0 : index
      %49 = vector.load %arg5[%c0_32, %c0_33] : memref<1x128xf32, #tpu.memory_space<vmem>>, vector<1x128xf32>
      tpu.vector_store %arg5[%c0_32, %c0_33], %48 {strides = array<i32>} : memref<1x128xf32, #tpu.memory_space<vmem>>, vector<1x128xf32>,
      %cst_34 = arith.constant 0.000000e+00 : f32
      %50 = vector.broadcast %cst_34 : f32 to vector<1x128xf32>
      %c0_35 = arith.constant 0 : index
      %c0_36 = arith.constant 0 : index
      %51 = vector.load %arg6[%c0_35, %c0_36] : memref<1x128xf32, #tpu.memory_space<vmem>>, vector<1x128xf32>
      tpu.vector_store %arg6[%c0_35, %c0_36], %50 {strides = array<i32>} : memref<1x128xf32, #tpu.memory_space<vmem>>, vector<1x128xf32>,
    } else {
    }
    %c0_18 = arith.constant 0 : index
    %c0_19 = arith.constant 0 : index
    %34 = vector.load %arg5[%c0_18, %c0_19] : memref<1x128xf32, #tpu.memory_space<vmem>>, vector<1x128xf32>
    %cst_20 = arith.constant dense<0.000000e+00> : vector<128xf32>
    %35 = vector.multi_reduction <add>, %30, %cst_20 [0] : vector<4x128xf32> to vector<128xf32>
    %36 = vector.shape_cast %35 : vector<128xf32> to vector<1x128xf32>
    %37 = arith.addf %34, %36 : vector<1x128xf32>
    %c0_21 = arith.constant 0 : index
    %c0_22 = arith.constant 0 : index
    %38 = vector.load %arg5[%c0_21, %c0_22] : memref<1x128xf32, #tpu.memory_space<vmem>>, vector<1x128xf32>
    tpu.vector_store %arg5[%c0_21, %c0_22], %37 {strides = array<i32>} : memref<1x128xf32, #tpu.memory_space<vmem>>, vector<1x128xf32>,
    %c0_23 = arith.constant 0 : index
    %c0_24 = arith.constant 0 : index
    %39 = vector.load %arg6[%c0_23, %c0_24] : memref<1x128xf32, #tpu.memory_space<vmem>>, vector<1x128xf32>
    %40 = arith.mulf %30, %30 : vector<4x128xf32>
    %cst_25 = arith.constant dense<0.000000e+00> : vector<128xf32>
    %41 = vector.multi_reduction <add>, %40, %cst_25 [0] : vector<4x128xf32> to vector<128xf32>
    %42 = vector.shape_cast %41 : vector<128xf32> to vector<1x128xf32>
    %43 = arith.addf %39, %42 : vector<1x128xf32>
    %c0_26 = arith.constant 0 : index
    %c0_27 = arith.constant 0 : index
    %44 = vector.load %arg6[%c0_26, %c0_27] : memref<1x128xf32, #tpu.memory_space<vmem>>, vector<1x128xf32>
    tpu.vector_store %arg6[%c0_26, %c0_27], %43 {strides = array<i32>} : memref<1x128xf32, #tpu.memory_space<vmem>>, vector<1x128xf32>,
    %45 = vector.shape_cast %30 : vector<4x128xf32> to vector<1x4x128xf32>
    %46 = arith.truncf %45 : vector<1x4x128xf32> to vector<1x4x128xbf16>
    %c0_28 = arith.constant 0 : index
    %c0_29 = arith.constant 0 : index
    %c0_30 = arith.constant 0 : index
    %47 = vector.load %arg4[%c0_28, %c0_29, %c0_30] : memref<1x4x128xbf16, #tpu.memory_space<vmem>>, vector<1x4x128xbf16>
    tpu.vector_store %arg4[%c0_28, %c0_29, %c0_30], %46 {strides = array<i32>} : memref<1x4x128xbf16, #tpu.memory_space<vmem>>, vector<1x4x128xbf16>,
    return
  }
  func.func @transform_0(%arg0: i32) -> (i32, i32, i32) {
    %c0_i32 = arith.constant 0 : i32
    %c0_i32_0 = arith.constant 0 : i32
    %c0_i32_1 = arith.constant 0 : i32
    return %arg0, %c0_i32, %c0_i32_0 : i32, i32, i32
  }
  func.func @transform_1(%arg0: i32) -> (i32, i32, i32) {
    %c0_i32 = arith.constant 0 : i32
    %c0_i32_0 = arith.constant 0 : i32
    %c0_i32_1 = arith.constant 0 : i32
    %c0_i32_2 = arith.constant 0 : i32
    return %c0_i32, %c0_i32_0, %c0_i32_1 : i32, i32, i32
  }
  func.func @transform_2(%arg0: i32) -> (i32, i32) {
    %c0_i32 = arith.constant 0 : i32
    %c0_i32_0 = arith.constant 0 : i32
    %c0_i32_1 = arith.constant 0 : i32
    return %c0_i32, %c0_i32_0 : i32, i32
  }
  func.func @transform_3(%arg0: i32) -> (i32, i32, i32) {
    %c0_i32 = arith.constant 0 : i32
    %c0_i32_0 = arith.constant 0 : i32
    %c0_i32_1 = arith.constant 0 : i32
    return %arg0, %c0_i32, %c0_i32_0 : i32, i32, i32
  }
  func.func @transform_4(%arg0: i32) -> (i32, i32) {
    %c0_i32 = arith.constant 0 : i32
    %c0_i32_0 = arith.constant 0 : i32
    %c0_i32_1 = arith.constant 0 : i32
    return %c0_i32, %c0_i32_0 : i32, i32
  }
  func.func @transform_5(%arg0: i32) -> (i32, i32) {
    %c0_i32 = arith.constant 0 : i32
    %c0_i32_0 = arith.constant 0 : i32
    %c0_i32_1 = arith.constant 0 : i32
    return %c0_i32, %c0_i32_0 : i32, i32
  }
}

module attributes {stable_mosaic.version = 11 : i64} {
  func.func @_pad_conv_kernel(%arg0: i32, %arg1: memref<1x4x128xbf16, #tpu.memory_space<vmem>>, %arg2: memref<1x128xf32, #tpu.memory_space<vmem>>, %arg3: memref<1x128xf32, #tpu.memory_space<vmem>>, %arg4: memref<16x96x192xbf16, #tpu.memory_space<vmem>>, %arg5: memref<1x192xf32, #tpu.memory_space<vmem>>, %arg6: memref<1x3x192xbf16, #tpu.memory_space<vmem>>, %arg7: memref<1x192xf32, #tpu.memory_space<vmem>>, %arg8: memref<1x192xf32, #tpu.memory_space<vmem>>, %arg9: memref<6x192xf32, #tpu.memory_space<vmem>>) attributes {dimension_semantics = [#tpu.dimension_semantics<arbitrary>], iteration_bounds = array<i64: 2>, scalar_prefetch = 0 : i64, scratch_operands = 1 : i64, tpu.core_type = #tpu.core_type<tc>, window_params = [{transform_indices = @transform_0, window_bounds = array<i64: 1, 4, 128>}, {pipeline_mode = #tpu.pipeline_mode<synchronous>, transform_indices = @transform_1, window_bounds = array<i64: 1, 128>}, {pipeline_mode = #tpu.pipeline_mode<synchronous>, transform_indices = @transform_2, window_bounds = array<i64: 1, 128>}, {pipeline_mode = #tpu.pipeline_mode<synchronous>, transform_indices = @transform_3, window_bounds = array<i64: 16, 96, 192>}, {pipeline_mode = #tpu.pipeline_mode<synchronous>, transform_indices = @transform_4, window_bounds = array<i64: 1, 192>}, {transform_indices = @transform_5, window_bounds = array<i64: 1, 3, 192>}, {pipeline_mode = #tpu.pipeline_mode<synchronous>, transform_indices = @transform_6, window_bounds = array<i64: 1, 192>}, {pipeline_mode = #tpu.pipeline_mode<synchronous>, transform_indices = @transform_7, window_bounds = array<i64: 1, 192>}]} {
    %c0 = arith.constant 0 : index
    %c0_0 = arith.constant 0 : index
    %c0_1 = arith.constant 0 : index
    %0 = vector.load %arg1[%c0, %c0_0, %c0_1] : memref<1x4x128xbf16, #tpu.memory_space<vmem>>, vector<1x4x128xbf16>
    %1 = vector.shape_cast %0 : vector<1x4x128xbf16> to vector<4x128xbf16>
    %2 = arith.extf %1 : vector<4x128xbf16> to vector<4x128xf32>
    %c0_2 = arith.constant 0 : index
    %c0_3 = arith.constant 0 : index
    %3 = vector.load %arg2[%c0_2, %c0_3] : memref<1x128xf32, #tpu.memory_space<vmem>>, vector<1x128xf32>
    %4 = vector.broadcast %3 : vector<1x128xf32> to vector<4x128xf32>
    %5 = arith.mulf %2, %4 : vector<4x128xf32>
    %c0_4 = arith.constant 0 : index
    %c0_5 = arith.constant 0 : index
    %6 = vector.load %arg3[%c0_4, %c0_5] : memref<1x128xf32, #tpu.memory_space<vmem>>, vector<1x128xf32>
    %7 = vector.broadcast %6 : vector<1x128xf32> to vector<4x128xf32>
    %8 = arith.addf %5, %7 : vector<4x128xf32>
    %cst = arith.constant 0.000000e+00 : f32
    %9 = vector.broadcast %cst : f32 to vector<4x128xf32>
    %10 = arith.cmpf oge, %8, %9 : vector<4x128xf32>
    %cst_6 = arith.constant 2.000000e-01 : f32
    %11 = vector.broadcast %cst_6 : f32 to vector<4x128xf32>
    %12 = arith.mulf %11, %8 : vector<4x128xf32>
    %13 = arith.select %10, %8, %12 : vector<4x128xi1>, vector<4x128xf32>
    %cst_7 = arith.constant 0.000000e+00 : f32
    %14 = vector.broadcast %cst_7 : f32 to vector<6x192xf32>
    %c0_8 = arith.constant 0 : index
    %c0_9 = arith.constant 0 : index
    %15 = vector.load %arg9[%c0_8, %c0_9] : memref<6x192xf32, #tpu.memory_space<vmem>>, vector<6x192xf32>
    tpu.vector_store %arg9[%c0_8, %c0_9], %14 {strides = array<i32>} : memref<6x192xf32, #tpu.memory_space<vmem>>, vector<6x192xf32>,
    %c1 = arith.constant 1 : index
    %c32 = arith.constant 32 : index
    %16 = vector.load %arg9[%c1, %c32] : memref<6x192xf32, #tpu.memory_space<vmem>>, vector<4x128xf32>
    tpu.vector_store %arg9[%c1, %c32], %13 {strides = array<i32>} : memref<6x192xf32, #tpu.memory_space<vmem>>, vector<4x128xf32>,
    %c0_10 = arith.constant 0 : index
    %c0_11 = arith.constant 0 : index
    %17 = vector.load %arg9[%c0_10, %c0_11] : memref<6x192xf32, #tpu.memory_space<vmem>>, vector<6x192xf32>
    %cst_12 = arith.constant 0.000000e+00 : f32
    %18 = vector.broadcast %cst_12 : f32 to vector<3x192xf32>
    %19 = vector.extract_strided_slice %17 {offsets = [0, 0], sizes = [3, 96], strides = [1, 1]} : vector<6x192xf32> to vector<3x96xf32>
    %20 = arith.truncf %19 : vector<3x96xf32> to vector<3x96xbf16>
    %c0_13 = arith.constant 0 : index
    %c0_14 = arith.constant 0 : index
    %c0_15 = arith.constant 0 : index
    %21 = vector.load %arg4[%c0_13, %c0_14, %c0_15] : memref<16x96x192xbf16, #tpu.memory_space<vmem>>, vector<1x96x192xbf16>
    %22 = vector.shape_cast %21 : vector<1x96x192xbf16> to vector<96x192xbf16>
    %cst_16 = arith.constant dense<0.000000e+00> : vector<3x192xf32>
    %23 = tpu.matmul %20, %22, %cst_16 {dimension_numbers = #tpu.dot_dimension_numbers<[1], [0], [0], [1], [0, 0, 1, 1], [], []>} : vector<3x96xbf16>, vector<96x192xbf16>, vector<3x192xf32> -> vector<3x192xf32>
    %24 = arith.addf %18, %23 : vector<3x192xf32>
    %25 = vector.extract_strided_slice %17 {offsets = [0, 32], sizes = [3, 96], strides = [1, 1]} : vector<6x192xf32> to vector<3x96xf32>
    %26 = arith.truncf %25 : vector<3x96xf32> to vector<3x96xbf16>
    %c1_17 = arith.constant 1 : index
    %c0_18 = arith.constant 0 : index
    %c0_19 = arith.constant 0 : index
    %27 = vector.load %arg4[%c1_17, %c0_18, %c0_19] : memref<16x96x192xbf16, #tpu.memory_space<vmem>>, vector<1x96x192xbf16>
    %28 = vector.shape_cast %27 : vector<1x96x192xbf16> to vector<96x192xbf16>
    %cst_20 = arith.constant dense<0.000000e+00> : vector<3x192xf32>
    %29 = tpu.matmul %26, %28, %cst_20 {dimension_numbers = #tpu.dot_dimension_numbers<[1], [0], [0], [1], [0, 0, 1, 1], [], []>} : vector<3x96xbf16>, vector<96x192xbf16>, vector<3x192xf32> -> vector<3x192xf32>
    %30 = arith.addf %24, %29 : vector<3x192xf32>
    %31 = vector.extract_strided_slice %17 {offsets = [0, 64], sizes = [3, 96], strides = [1, 1]} : vector<6x192xf32> to vector<3x96xf32>
    %32 = arith.truncf %31 : vector<3x96xf32> to vector<3x96xbf16>
    %c2 = arith.constant 2 : index
    %c0_21 = arith.constant 0 : index
    %c0_22 = arith.constant 0 : index
    %33 = vector.load %arg4[%c2, %c0_21, %c0_22] : memref<16x96x192xbf16, #tpu.memory_space<vmem>>, vector<1x96x192xbf16>
    %34 = vector.shape_cast %33 : vector<1x96x192xbf16> to vector<96x192xbf16>
    %cst_23 = arith.constant dense<0.000000e+00> : vector<3x192xf32>
    %35 = tpu.matmul %32, %34, %cst_23 {dimension_numbers = #tpu.dot_dimension_numbers<[1], [0], [0], [1], [0, 0, 1, 1], [], []>} : vector<3x96xbf16>, vector<96x192xbf16>, vector<3x192xf32> -> vector<3x192xf32>
    %36 = arith.addf %30, %35 : vector<3x192xf32>
    %37 = vector.extract_strided_slice %17 {offsets = [0, 96], sizes = [3, 96], strides = [1, 1]} : vector<6x192xf32> to vector<3x96xf32>
    %38 = arith.truncf %37 : vector<3x96xf32> to vector<3x96xbf16>
    %c3 = arith.constant 3 : index
    %c0_24 = arith.constant 0 : index
    %c0_25 = arith.constant 0 : index
    %39 = vector.load %arg4[%c3, %c0_24, %c0_25] : memref<16x96x192xbf16, #tpu.memory_space<vmem>>, vector<1x96x192xbf16>
    %40 = vector.shape_cast %39 : vector<1x96x192xbf16> to vector<96x192xbf16>
    %cst_26 = arith.constant dense<0.000000e+00> : vector<3x192xf32>
    %41 = tpu.matmul %38, %40, %cst_26 {dimension_numbers = #tpu.dot_dimension_numbers<[1], [0], [0], [1], [0, 0, 1, 1], [], []>} : vector<3x96xbf16>, vector<96x192xbf16>, vector<3x192xf32> -> vector<3x192xf32>
    %42 = arith.addf %36, %41 : vector<3x192xf32>
    %43 = vector.extract_strided_slice %17 {offsets = [1, 0], sizes = [3, 96], strides = [1, 1]} : vector<6x192xf32> to vector<3x96xf32>
    %44 = arith.truncf %43 : vector<3x96xf32> to vector<3x96xbf16>
    %c4 = arith.constant 4 : index
    %c0_27 = arith.constant 0 : index
    %c0_28 = arith.constant 0 : index
    %45 = vector.load %arg4[%c4, %c0_27, %c0_28] : memref<16x96x192xbf16, #tpu.memory_space<vmem>>, vector<1x96x192xbf16>
    %46 = vector.shape_cast %45 : vector<1x96x192xbf16> to vector<96x192xbf16>
    %cst_29 = arith.constant dense<0.000000e+00> : vector<3x192xf32>
    %47 = tpu.matmul %44, %46, %cst_29 {dimension_numbers = #tpu.dot_dimension_numbers<[1], [0], [0], [1], [0, 0, 1, 1], [], []>} : vector<3x96xbf16>, vector<96x192xbf16>, vector<3x192xf32> -> vector<3x192xf32>
    %48 = arith.addf %42, %47 : vector<3x192xf32>
    %49 = vector.extract_strided_slice %17 {offsets = [1, 32], sizes = [3, 96], strides = [1, 1]} : vector<6x192xf32> to vector<3x96xf32>
    %50 = arith.truncf %49 : vector<3x96xf32> to vector<3x96xbf16>
    %c5 = arith.constant 5 : index
    %c0_30 = arith.constant 0 : index
    %c0_31 = arith.constant 0 : index
    %51 = vector.load %arg4[%c5, %c0_30, %c0_31] : memref<16x96x192xbf16, #tpu.memory_space<vmem>>, vector<1x96x192xbf16>
    %52 = vector.shape_cast %51 : vector<1x96x192xbf16> to vector<96x192xbf16>
    %cst_32 = arith.constant dense<0.000000e+00> : vector<3x192xf32>
    %53 = tpu.matmul %50, %52, %cst_32 {dimension_numbers = #tpu.dot_dimension_numbers<[1], [0], [0], [1], [0, 0, 1, 1], [], []>} : vector<3x96xbf16>, vector<96x192xbf16>, vector<3x192xf32> -> vector<3x192xf32>
    %54 = arith.addf %48, %53 : vector<3x192xf32>
    %55 = vector.extract_strided_slice %17 {offsets = [1, 64], sizes = [3, 96], strides = [1, 1]} : vector<6x192xf32> to vector<3x96xf32>
    %56 = arith.truncf %55 : vector<3x96xf32> to vector<3x96xbf16>
    %c6 = arith.constant 6 : index
    %c0_33 = arith.constant 0 : index
    %c0_34 = arith.constant 0 : index
    %57 = vector.load %arg4[%c6, %c0_33, %c0_34] : memref<16x96x192xbf16, #tpu.memory_space<vmem>>, vector<1x96x192xbf16>
    %58 = vector.shape_cast %57 : vector<1x96x192xbf16> to vector<96x192xbf16>
    %cst_35 = arith.constant dense<0.000000e+00> : vector<3x192xf32>
    %59 = tpu.matmul %56, %58, %cst_35 {dimension_numbers = #tpu.dot_dimension_numbers<[1], [0], [0], [1], [0, 0, 1, 1], [], []>} : vector<3x96xbf16>, vector<96x192xbf16>, vector<3x192xf32> -> vector<3x192xf32>
    %60 = arith.addf %54, %59 : vector<3x192xf32>
    %61 = vector.extract_strided_slice %17 {offsets = [1, 96], sizes = [3, 96], strides = [1, 1]} : vector<6x192xf32> to vector<3x96xf32>
    %62 = arith.truncf %61 : vector<3x96xf32> to vector<3x96xbf16>
    %c7 = arith.constant 7 : index
    %c0_36 = arith.constant 0 : index
    %c0_37 = arith.constant 0 : index
    %63 = vector.load %arg4[%c7, %c0_36, %c0_37] : memref<16x96x192xbf16, #tpu.memory_space<vmem>>, vector<1x96x192xbf16>
    %64 = vector.shape_cast %63 : vector<1x96x192xbf16> to vector<96x192xbf16>
    %cst_38 = arith.constant dense<0.000000e+00> : vector<3x192xf32>
    %65 = tpu.matmul %62, %64, %cst_38 {dimension_numbers = #tpu.dot_dimension_numbers<[1], [0], [0], [1], [0, 0, 1, 1], [], []>} : vector<3x96xbf16>, vector<96x192xbf16>, vector<3x192xf32> -> vector<3x192xf32>
    %66 = arith.addf %60, %65 : vector<3x192xf32>
    %67 = vector.extract_strided_slice %17 {offsets = [2, 0], sizes = [3, 96], strides = [1, 1]} : vector<6x192xf32> to vector<3x96xf32>
    %68 = arith.truncf %67 : vector<3x96xf32> to vector<3x96xbf16>
    %c8 = arith.constant 8 : index
    %c0_39 = arith.constant 0 : index
    %c0_40 = arith.constant 0 : index
    %69 = vector.load %arg4[%c8, %c0_39, %c0_40] : memref<16x96x192xbf16, #tpu.memory_space<vmem>>, vector<1x96x192xbf16>
    %70 = vector.shape_cast %69 : vector<1x96x192xbf16> to vector<96x192xbf16>
    %cst_41 = arith.constant dense<0.000000e+00> : vector<3x192xf32>
    %71 = tpu.matmul %68, %70, %cst_41 {dimension_numbers = #tpu.dot_dimension_numbers<[1], [0], [0], [1], [0, 0, 1, 1], [], []>} : vector<3x96xbf16>, vector<96x192xbf16>, vector<3x192xf32> -> vector<3x192xf32>
    %72 = arith.addf %66, %71 : vector<3x192xf32>
    %73 = vector.extract_strided_slice %17 {offsets = [2, 32], sizes = [3, 96], strides = [1, 1]} : vector<6x192xf32> to vector<3x96xf32>
    %74 = arith.truncf %73 : vector<3x96xf32> to vector<3x96xbf16>
    %c9 = arith.constant 9 : index
    %c0_42 = arith.constant 0 : index
    %c0_43 = arith.constant 0 : index
    %75 = vector.load %arg4[%c9, %c0_42, %c0_43] : memref<16x96x192xbf16, #tpu.memory_space<vmem>>, vector<1x96x192xbf16>
    %76 = vector.shape_cast %75 : vector<1x96x192xbf16> to vector<96x192xbf16>
    %cst_44 = arith.constant dense<0.000000e+00> : vector<3x192xf32>
    %77 = tpu.matmul %74, %76, %cst_44 {dimension_numbers = #tpu.dot_dimension_numbers<[1], [0], [0], [1], [0, 0, 1, 1], [], []>} : vector<3x96xbf16>, vector<96x192xbf16>, vector<3x192xf32> -> vector<3x192xf32>
    %78 = arith.addf %72, %77 : vector<3x192xf32>
    %79 = vector.extract_strided_slice %17 {offsets = [2, 64], sizes = [3, 96], strides = [1, 1]} : vector<6x192xf32> to vector<3x96xf32>
    %80 = arith.truncf %79 : vector<3x96xf32> to vector<3x96xbf16>
    %c10 = arith.constant 10 : index
    %c0_45 = arith.constant 0 : index
    %c0_46 = arith.constant 0 : index
    %81 = vector.load %arg4[%c10, %c0_45, %c0_46] : memref<16x96x192xbf16, #tpu.memory_space<vmem>>, vector<1x96x192xbf16>
    %82 = vector.shape_cast %81 : vector<1x96x192xbf16> to vector<96x192xbf16>
    %cst_47 = arith.constant dense<0.000000e+00> : vector<3x192xf32>
    %83 = tpu.matmul %80, %82, %cst_47 {dimension_numbers = #tpu.dot_dimension_numbers<[1], [0], [0], [1], [0, 0, 1, 1], [], []>} : vector<3x96xbf16>, vector<96x192xbf16>, vector<3x192xf32> -> vector<3x192xf32>
    %84 = arith.addf %78, %83 : vector<3x192xf32>
    %85 = vector.extract_strided_slice %17 {offsets = [2, 96], sizes = [3, 96], strides = [1, 1]} : vector<6x192xf32> to vector<3x96xf32>
    %86 = arith.truncf %85 : vector<3x96xf32> to vector<3x96xbf16>
    %c11 = arith.constant 11 : index
    %c0_48 = arith.constant 0 : index
    %c0_49 = arith.constant 0 : index
    %87 = vector.load %arg4[%c11, %c0_48, %c0_49] : memref<16x96x192xbf16, #tpu.memory_space<vmem>>, vector<1x96x192xbf16>
    %88 = vector.shape_cast %87 : vector<1x96x192xbf16> to vector<96x192xbf16>
    %cst_50 = arith.constant dense<0.000000e+00> : vector<3x192xf32>
    %89 = tpu.matmul %86, %88, %cst_50 {dimension_numbers = #tpu.dot_dimension_numbers<[1], [0], [0], [1], [0, 0, 1, 1], [], []>} : vector<3x96xbf16>, vector<96x192xbf16>, vector<3x192xf32> -> vector<3x192xf32>
    %90 = arith.addf %84, %89 : vector<3x192xf32>
    %91 = vector.extract_strided_slice %17 {offsets = [3, 0], sizes = [3, 96], strides = [1, 1]} : vector<6x192xf32> to vector<3x96xf32>
    %92 = arith.truncf %91 : vector<3x96xf32> to vector<3x96xbf16>
    %c12 = arith.constant 12 : index
    %c0_51 = arith.constant 0 : index
    %c0_52 = arith.constant 0 : index
    %93 = vector.load %arg4[%c12, %c0_51, %c0_52] : memref<16x96x192xbf16, #tpu.memory_space<vmem>>, vector<1x96x192xbf16>
    %94 = vector.shape_cast %93 : vector<1x96x192xbf16> to vector<96x192xbf16>
    %cst_53 = arith.constant dense<0.000000e+00> : vector<3x192xf32>
    %95 = tpu.matmul %92, %94, %cst_53 {dimension_numbers = #tpu.dot_dimension_numbers<[1], [0], [0], [1], [0, 0, 1, 1], [], []>} : vector<3x96xbf16>, vector<96x192xbf16>, vector<3x192xf32> -> vector<3x192xf32>
    %96 = arith.addf %90, %95 : vector<3x192xf32>
    %97 = vector.extract_strided_slice %17 {offsets = [3, 32], sizes = [3, 96], strides = [1, 1]} : vector<6x192xf32> to vector<3x96xf32>
    %98 = arith.truncf %97 : vector<3x96xf32> to vector<3x96xbf16>
    %c13 = arith.constant 13 : index
    %c0_54 = arith.constant 0 : index
    %c0_55 = arith.constant 0 : index
    %99 = vector.load %arg4[%c13, %c0_54, %c0_55] : memref<16x96x192xbf16, #tpu.memory_space<vmem>>, vector<1x96x192xbf16>
    %100 = vector.shape_cast %99 : vector<1x96x192xbf16> to vector<96x192xbf16>
    %cst_56 = arith.constant dense<0.000000e+00> : vector<3x192xf32>
    %101 = tpu.matmul %98, %100, %cst_56 {dimension_numbers = #tpu.dot_dimension_numbers<[1], [0], [0], [1], [0, 0, 1, 1], [], []>} : vector<3x96xbf16>, vector<96x192xbf16>, vector<3x192xf32> -> vector<3x192xf32>
    %102 = arith.addf %96, %101 : vector<3x192xf32>
    %103 = vector.extract_strided_slice %17 {offsets = [3, 64], sizes = [3, 96], strides = [1, 1]} : vector<6x192xf32> to vector<3x96xf32>
    %104 = arith.truncf %103 : vector<3x96xf32> to vector<3x96xbf16>
    %c14 = arith.constant 14 : index
    %c0_57 = arith.constant 0 : index
    %c0_58 = arith.constant 0 : index
    %105 = vector.load %arg4[%c14, %c0_57, %c0_58] : memref<16x96x192xbf16, #tpu.memory_space<vmem>>, vector<1x96x192xbf16>
    %106 = vector.shape_cast %105 : vector<1x96x192xbf16> to vector<96x192xbf16>
    %cst_59 = arith.constant dense<0.000000e+00> : vector<3x192xf32>
    %107 = tpu.matmul %104, %106, %cst_59 {dimension_numbers = #tpu.dot_dimension_numbers<[1], [0], [0], [1], [0, 0, 1, 1], [], []>} : vector<3x96xbf16>, vector<96x192xbf16>, vector<3x192xf32> -> vector<3x192xf32>
    %108 = arith.addf %102, %107 : vector<3x192xf32>
    %109 = vector.extract_strided_slice %17 {offsets = [3, 96], sizes = [3, 96], strides = [1, 1]} : vector<6x192xf32> to vector<3x96xf32>
    %110 = arith.truncf %109 : vector<3x96xf32> to vector<3x96xbf16>
    %c15 = arith.constant 15 : index
    %c0_60 = arith.constant 0 : index
    %c0_61 = arith.constant 0 : index
    %111 = vector.load %arg4[%c15, %c0_60, %c0_61] : memref<16x96x192xbf16, #tpu.memory_space<vmem>>, vector<1x96x192xbf16>
    %112 = vector.shape_cast %111 : vector<1x96x192xbf16> to vector<96x192xbf16>
    %cst_62 = arith.constant dense<0.000000e+00> : vector<3x192xf32>
    %113 = tpu.matmul %110, %112, %cst_62 {dimension_numbers = #tpu.dot_dimension_numbers<[1], [0], [0], [1], [0, 0, 1, 1], [], []>} : vector<3x96xbf16>, vector<96x192xbf16>, vector<3x192xf32> -> vector<3x192xf32>
    %114 = arith.addf %108, %113 : vector<3x192xf32>
    %c0_63 = arith.constant 0 : index
    %c0_64 = arith.constant 0 : index
    %115 = vector.load %arg5[%c0_63, %c0_64] : memref<1x192xf32, #tpu.memory_space<vmem>>, vector<1x192xf32>
    %116 = vector.broadcast %115 : vector<1x192xf32> to vector<3x192xf32>
    %117 = arith.addf %114, %116 : vector<3x192xf32>
    %c0_i32 = arith.constant 0 : i32
    %118 = arith.cmpi eq, %arg0, %c0_i32 : i32
    %119 = arith.extui %118 : i1 to i32
    %c0_i32_65 = arith.constant 0 : i32
    %120 = arith.cmpi ne, %119, %c0_i32_65 : i32
    scf.if %120 {
      %cst_79 = arith.constant 0.000000e+00 : f32
      %135 = vector.broadcast %cst_79 : f32 to vector<1x192xf32>
      %c0_80 = arith.constant 0 : index
      %c0_81 = arith.constant 0 : index
      %136 = vector.load %arg7[%c0_80, %c0_81] : memref<1x192xf32, #tpu.memory_space<vmem>>, vector<1x192xf32>
      tpu.vector_store %arg7[%c0_80, %c0_81], %135 {strides = array<i32>} : memref<1x192xf32, #tpu.memory_space<vmem>>, vector<1x192xf32>,
      %cst_82 = arith.constant 0.000000e+00 : f32
      %137 = vector.broadcast %cst_82 : f32 to vector<1x192xf32>
      %c0_83 = arith.constant 0 : index
      %c0_84 = arith.constant 0 : index
      %138 = vector.load %arg8[%c0_83, %c0_84] : memref<1x192xf32, #tpu.memory_space<vmem>>, vector<1x192xf32>
      tpu.vector_store %arg8[%c0_83, %c0_84], %137 {strides = array<i32>} : memref<1x192xf32, #tpu.memory_space<vmem>>, vector<1x192xf32>,
    } else {
    }
    %c0_66 = arith.constant 0 : index
    %c0_67 = arith.constant 0 : index
    %121 = vector.load %arg7[%c0_66, %c0_67] : memref<1x192xf32, #tpu.memory_space<vmem>>, vector<1x192xf32>
    %cst_68 = arith.constant dense<0.000000e+00> : vector<192xf32>
    %122 = vector.multi_reduction <add>, %117, %cst_68 [0] : vector<3x192xf32> to vector<192xf32>
    %123 = vector.shape_cast %122 : vector<192xf32> to vector<1x192xf32>
    %124 = arith.addf %121, %123 : vector<1x192xf32>
    %c0_69 = arith.constant 0 : index
    %c0_70 = arith.constant 0 : index
    %125 = vector.load %arg7[%c0_69, %c0_70] : memref<1x192xf32, #tpu.memory_space<vmem>>, vector<1x192xf32>
    tpu.vector_store %arg7[%c0_69, %c0_70], %124 {strides = array<i32>} : memref<1x192xf32, #tpu.memory_space<vmem>>, vector<1x192xf32>,
    %c0_71 = arith.constant 0 : index
    %c0_72 = arith.constant 0 : index
    %126 = vector.load %arg8[%c0_71, %c0_72] : memref<1x192xf32, #tpu.memory_space<vmem>>, vector<1x192xf32>
    %127 = arith.mulf %117, %117 : vector<3x192xf32>
    %cst_73 = arith.constant dense<0.000000e+00> : vector<192xf32>
    %128 = vector.multi_reduction <add>, %127, %cst_73 [0] : vector<3x192xf32> to vector<192xf32>
    %129 = vector.shape_cast %128 : vector<192xf32> to vector<1x192xf32>
    %130 = arith.addf %126, %129 : vector<1x192xf32>
    %c0_74 = arith.constant 0 : index
    %c0_75 = arith.constant 0 : index
    %131 = vector.load %arg8[%c0_74, %c0_75] : memref<1x192xf32, #tpu.memory_space<vmem>>, vector<1x192xf32>
    tpu.vector_store %arg8[%c0_74, %c0_75], %130 {strides = array<i32>} : memref<1x192xf32, #tpu.memory_space<vmem>>, vector<1x192xf32>,
    %132 = vector.shape_cast %117 : vector<3x192xf32> to vector<1x3x192xf32>
    %133 = arith.truncf %132 : vector<1x3x192xf32> to vector<1x3x192xbf16>
    %c0_76 = arith.constant 0 : index
    %c0_77 = arith.constant 0 : index
    %c0_78 = arith.constant 0 : index
    %134 = vector.load %arg6[%c0_76, %c0_77, %c0_78] : memref<1x3x192xbf16, #tpu.memory_space<vmem>>, vector<1x3x192xbf16>
    tpu.vector_store %arg6[%c0_76, %c0_77, %c0_78], %133 {strides = array<i32>} : memref<1x3x192xbf16, #tpu.memory_space<vmem>>, vector<1x3x192xbf16>,
    return
  }
  func.func @transform_0(%arg0: i32) -> (i32, i32, i32) {
    %c0_i32 = arith.constant 0 : i32
    %c0_i32_0 = arith.constant 0 : i32
    %c0_i32_1 = arith.constant 0 : i32
    return %arg0, %c0_i32, %c0_i32_0 : i32, i32, i32
  }
  func.func @transform_1(%arg0: i32) -> (i32, i32) {
    %c0_i32 = arith.constant 0 : i32
    %c0_i32_0 = arith.constant 0 : i32
    %c0_i32_1 = arith.constant 0 : i32
    return %c0_i32, %c0_i32_0 : i32, i32
  }
  func.func @transform_2(%arg0: i32) -> (i32, i32) {
    %c0_i32 = arith.constant 0 : i32
    %c0_i32_0 = arith.constant 0 : i32
    %c0_i32_1 = arith.constant 0 : i32
    return %c0_i32, %c0_i32_0 : i32, i32
  }
  func.func @transform_3(%arg0: i32) -> (i32, i32, i32) {
    %c0_i32 = arith.constant 0 : i32
    %c0_i32_0 = arith.constant 0 : i32
    %c0_i32_1 = arith.constant 0 : i32
    %c0_i32_2 = arith.constant 0 : i32
    return %c0_i32, %c0_i32_0, %c0_i32_1 : i32, i32, i32
  }
  func.func @transform_4(%arg0: i32) -> (i32, i32) {
    %c0_i32 = arith.constant 0 : i32
    %c0_i32_0 = arith.constant 0 : i32
    %c0_i32_1 = arith.constant 0 : i32
    return %c0_i32, %c0_i32_0 : i32, i32
  }
  func.func @transform_5(%arg0: i32) -> (i32, i32, i32) {
    %c0_i32 = arith.constant 0 : i32
    %c0_i32_0 = arith.constant 0 : i32
    %c0_i32_1 = arith.constant 0 : i32
    return %arg0, %c0_i32, %c0_i32_0 : i32, i32, i32
  }
  func.func @transform_6(%arg0: i32) -> (i32, i32) {
    %c0_i32 = arith.constant 0 : i32
    %c0_i32_0 = arith.constant 0 : i32
    %c0_i32_1 = arith.constant 0 : i32
    return %c0_i32, %c0_i32_0 : i32, i32
  }
  func.func @transform_7(%arg0: i32) -> (i32, i32) {
    %c0_i32 = arith.constant 0 : i32
    %c0_i32_0 = arith.constant 0 : i32
    %c0_i32_1 = arith.constant 0 : i32
    return %c0_i32, %c0_i32_0 : i32, i32
  }
}

module attributes {stable_mosaic.version = 11 : i64} {
  func.func @_pad_conv_kernel(%arg0: i32, %arg1: memref<1x3x192xbf16, #tpu.memory_space<vmem>>, %arg2: memref<1x192xf32, #tpu.memory_space<vmem>>, %arg3: memref<1x192xf32, #tpu.memory_space<vmem>>, %arg4: memref<16x128x256xbf16, #tpu.memory_space<vmem>>, %arg5: memref<1x256xf32, #tpu.memory_space<vmem>>, %arg6: memref<1x2x256xf32, #tpu.memory_space<vmem>>, %arg7: memref<5x320xf32, #tpu.memory_space<vmem>>) attributes {dimension_semantics = [#tpu.dimension_semantics<parallel>], iteration_bounds = array<i64: 2>, scalar_prefetch = 0 : i64, scratch_operands = 1 : i64, tpu.core_type = #tpu.core_type<tc>, window_params = [{transform_indices = @transform_0, window_bounds = array<i64: 1, 3, 192>}, {pipeline_mode = #tpu.pipeline_mode<synchronous>, transform_indices = @transform_1, window_bounds = array<i64: 1, 192>}, {pipeline_mode = #tpu.pipeline_mode<synchronous>, transform_indices = @transform_2, window_bounds = array<i64: 1, 192>}, {pipeline_mode = #tpu.pipeline_mode<synchronous>, transform_indices = @transform_3, window_bounds = array<i64: 16, 128, 256>}, {pipeline_mode = #tpu.pipeline_mode<synchronous>, transform_indices = @transform_4, window_bounds = array<i64: 1, 256>}, {transform_indices = @transform_5, window_bounds = array<i64: 1, 2, 256>}]} {
    %c0 = arith.constant 0 : index
    %c0_0 = arith.constant 0 : index
    %c0_1 = arith.constant 0 : index
    %0 = vector.load %arg1[%c0, %c0_0, %c0_1] : memref<1x3x192xbf16, #tpu.memory_space<vmem>>, vector<1x3x192xbf16>
    %1 = vector.shape_cast %0 : vector<1x3x192xbf16> to vector<3x192xbf16>
    %2 = arith.extf %1 : vector<3x192xbf16> to vector<3x192xf32>
    %c0_2 = arith.constant 0 : index
    %c0_3 = arith.constant 0 : index
    %3 = vector.load %arg2[%c0_2, %c0_3] : memref<1x192xf32, #tpu.memory_space<vmem>>, vector<1x192xf32>
    %4 = vector.broadcast %3 : vector<1x192xf32> to vector<3x192xf32>
    %5 = arith.mulf %2, %4 : vector<3x192xf32>
    %c0_4 = arith.constant 0 : index
    %c0_5 = arith.constant 0 : index
    %6 = vector.load %arg3[%c0_4, %c0_5] : memref<1x192xf32, #tpu.memory_space<vmem>>, vector<1x192xf32>
    %7 = vector.broadcast %6 : vector<1x192xf32> to vector<3x192xf32>
    %8 = arith.addf %5, %7 : vector<3x192xf32>
    %cst = arith.constant 0.000000e+00 : f32
    %9 = vector.broadcast %cst : f32 to vector<3x192xf32>
    %10 = arith.cmpf oge, %8, %9 : vector<3x192xf32>
    %cst_6 = arith.constant 2.000000e-01 : f32
    %11 = vector.broadcast %cst_6 : f32 to vector<3x192xf32>
    %12 = arith.mulf %11, %8 : vector<3x192xf32>
    %13 = arith.select %10, %8, %12 : vector<3x192xi1>, vector<3x192xf32>
    %cst_7 = arith.constant 0.000000e+00 : f32
    %14 = vector.broadcast %cst_7 : f32 to vector<5x320xf32>
    %c0_8 = arith.constant 0 : index
    %c0_9 = arith.constant 0 : index
    %15 = vector.load %arg7[%c0_8, %c0_9] : memref<5x320xf32, #tpu.memory_space<vmem>>, vector<5x320xf32>
    tpu.vector_store %arg7[%c0_8, %c0_9], %14 {strides = array<i32>} : memref<5x320xf32, #tpu.memory_space<vmem>>, vector<5x320xf32>,
    %c1 = arith.constant 1 : index
    %c64 = arith.constant 64 : index
    %16 = vector.load %arg7[%c1, %c64] : memref<5x320xf32, #tpu.memory_space<vmem>>, vector<3x192xf32>
    tpu.vector_store %arg7[%c1, %c64], %13 {strides = array<i32>} : memref<5x320xf32, #tpu.memory_space<vmem>>, vector<3x192xf32>,
    %c0_10 = arith.constant 0 : index
    %c0_11 = arith.constant 0 : index
    %17 = vector.load %arg7[%c0_10, %c0_11] : memref<5x320xf32, #tpu.memory_space<vmem>>, vector<5x320xf32>
    %cst_12 = arith.constant 0.000000e+00 : f32
    %18 = vector.broadcast %cst_12 : f32 to vector<2x256xf32>
    %19 = vector.extract_strided_slice %17 {offsets = [0, 0], sizes = [2, 128], strides = [1, 1]} : vector<5x320xf32> to vector<2x128xf32>
    %20 = arith.truncf %19 : vector<2x128xf32> to vector<2x128xbf16>
    %c0_13 = arith.constant 0 : index
    %c0_14 = arith.constant 0 : index
    %c0_15 = arith.constant 0 : index
    %21 = vector.load %arg4[%c0_13, %c0_14, %c0_15] : memref<16x128x256xbf16, #tpu.memory_space<vmem>>, vector<1x128x256xbf16>
    %22 = vector.shape_cast %21 : vector<1x128x256xbf16> to vector<128x256xbf16>
    %cst_16 = arith.constant dense<0.000000e+00> : vector<2x256xf32>
    %23 = tpu.matmul %20, %22, %cst_16 {dimension_numbers = #tpu.dot_dimension_numbers<[1], [0], [0], [1], [0, 0, 1, 1], [], []>} : vector<2x128xbf16>, vector<128x256xbf16>, vector<2x256xf32> -> vector<2x256xf32>
    %24 = arith.addf %18, %23 : vector<2x256xf32>
    %25 = vector.extract_strided_slice %17 {offsets = [0, 64], sizes = [2, 128], strides = [1, 1]} : vector<5x320xf32> to vector<2x128xf32>
    %26 = arith.truncf %25 : vector<2x128xf32> to vector<2x128xbf16>
    %c1_17 = arith.constant 1 : index
    %c0_18 = arith.constant 0 : index
    %c0_19 = arith.constant 0 : index
    %27 = vector.load %arg4[%c1_17, %c0_18, %c0_19] : memref<16x128x256xbf16, #tpu.memory_space<vmem>>, vector<1x128x256xbf16>
    %28 = vector.shape_cast %27 : vector<1x128x256xbf16> to vector<128x256xbf16>
    %cst_20 = arith.constant dense<0.000000e+00> : vector<2x256xf32>
    %29 = tpu.matmul %26, %28, %cst_20 {dimension_numbers = #tpu.dot_dimension_numbers<[1], [0], [0], [1], [0, 0, 1, 1], [], []>} : vector<2x128xbf16>, vector<128x256xbf16>, vector<2x256xf32> -> vector<2x256xf32>
    %30 = arith.addf %24, %29 : vector<2x256xf32>
    %31 = vector.extract_strided_slice %17 {offsets = [0, 128], sizes = [2, 128], strides = [1, 1]} : vector<5x320xf32> to vector<2x128xf32>
    %32 = arith.truncf %31 : vector<2x128xf32> to vector<2x128xbf16>
    %c2 = arith.constant 2 : index
    %c0_21 = arith.constant 0 : index
    %c0_22 = arith.constant 0 : index
    %33 = vector.load %arg4[%c2, %c0_21, %c0_22] : memref<16x128x256xbf16, #tpu.memory_space<vmem>>, vector<1x128x256xbf16>
    %34 = vector.shape_cast %33 : vector<1x128x256xbf16> to vector<128x256xbf16>
    %cst_23 = arith.constant dense<0.000000e+00> : vector<2x256xf32>
    %35 = tpu.matmul %32, %34, %cst_23 {dimension_numbers = #tpu.dot_dimension_numbers<[1], [0], [0], [1], [0, 0, 1, 1], [], []>} : vector<2x128xbf16>, vector<128x256xbf16>, vector<2x256xf32> -> vector<2x256xf32>
    %36 = arith.addf %30, %35 : vector<2x256xf32>
    %37 = vector.extract_strided_slice %17 {offsets = [0, 192], sizes = [2, 128], strides = [1, 1]} : vector<5x320xf32> to vector<2x128xf32>
    %38 = arith.truncf %37 : vector<2x128xf32> to vector<2x128xbf16>
    %c3 = arith.constant 3 : index
    %c0_24 = arith.constant 0 : index
    %c0_25 = arith.constant 0 : index
    %39 = vector.load %arg4[%c3, %c0_24, %c0_25] : memref<16x128x256xbf16, #tpu.memory_space<vmem>>, vector<1x128x256xbf16>
    %40 = vector.shape_cast %39 : vector<1x128x256xbf16> to vector<128x256xbf16>
    %cst_26 = arith.constant dense<0.000000e+00> : vector<2x256xf32>
    %41 = tpu.matmul %38, %40, %cst_26 {dimension_numbers = #tpu.dot_dimension_numbers<[1], [0], [0], [1], [0, 0, 1, 1], [], []>} : vector<2x128xbf16>, vector<128x256xbf16>, vector<2x256xf32> -> vector<2x256xf32>
    %42 = arith.addf %36, %41 : vector<2x256xf32>
    %43 = vector.extract_strided_slice %17 {offsets = [1, 0], sizes = [2, 128], strides = [1, 1]} : vector<5x320xf32> to vector<2x128xf32>
    %44 = arith.truncf %43 : vector<2x128xf32> to vector<2x128xbf16>
    %c4 = arith.constant 4 : index
    %c0_27 = arith.constant 0 : index
    %c0_28 = arith.constant 0 : index
    %45 = vector.load %arg4[%c4, %c0_27, %c0_28] : memref<16x128x256xbf16, #tpu.memory_space<vmem>>, vector<1x128x256xbf16>
    %46 = vector.shape_cast %45 : vector<1x128x256xbf16> to vector<128x256xbf16>
    %cst_29 = arith.constant dense<0.000000e+00> : vector<2x256xf32>
    %47 = tpu.matmul %44, %46, %cst_29 {dimension_numbers = #tpu.dot_dimension_numbers<[1], [0], [0], [1], [0, 0, 1, 1], [], []>} : vector<2x128xbf16>, vector<128x256xbf16>, vector<2x256xf32> -> vector<2x256xf32>
    %48 = arith.addf %42, %47 : vector<2x256xf32>
    %49 = vector.extract_strided_slice %17 {offsets = [1, 64], sizes = [2, 128], strides = [1, 1]} : vector<5x320xf32> to vector<2x128xf32>
    %50 = arith.truncf %49 : vector<2x128xf32> to vector<2x128xbf16>
    %c5 = arith.constant 5 : index
    %c0_30 = arith.constant 0 : index
    %c0_31 = arith.constant 0 : index
    %51 = vector.load %arg4[%c5, %c0_30, %c0_31] : memref<16x128x256xbf16, #tpu.memory_space<vmem>>, vector<1x128x256xbf16>
    %52 = vector.shape_cast %51 : vector<1x128x256xbf16> to vector<128x256xbf16>
    %cst_32 = arith.constant dense<0.000000e+00> : vector<2x256xf32>
    %53 = tpu.matmul %50, %52, %cst_32 {dimension_numbers = #tpu.dot_dimension_numbers<[1], [0], [0], [1], [0, 0, 1, 1], [], []>} : vector<2x128xbf16>, vector<128x256xbf16>, vector<2x256xf32> -> vector<2x256xf32>
    %54 = arith.addf %48, %53 : vector<2x256xf32>
    %55 = vector.extract_strided_slice %17 {offsets = [1, 128], sizes = [2, 128], strides = [1, 1]} : vector<5x320xf32> to vector<2x128xf32>
    %56 = arith.truncf %55 : vector<2x128xf32> to vector<2x128xbf16>
    %c6 = arith.constant 6 : index
    %c0_33 = arith.constant 0 : index
    %c0_34 = arith.constant 0 : index
    %57 = vector.load %arg4[%c6, %c0_33, %c0_34] : memref<16x128x256xbf16, #tpu.memory_space<vmem>>, vector<1x128x256xbf16>
    %58 = vector.shape_cast %57 : vector<1x128x256xbf16> to vector<128x256xbf16>
    %cst_35 = arith.constant dense<0.000000e+00> : vector<2x256xf32>
    %59 = tpu.matmul %56, %58, %cst_35 {dimension_numbers = #tpu.dot_dimension_numbers<[1], [0], [0], [1], [0, 0, 1, 1], [], []>} : vector<2x128xbf16>, vector<128x256xbf16>, vector<2x256xf32> -> vector<2x256xf32>
    %60 = arith.addf %54, %59 : vector<2x256xf32>
    %61 = vector.extract_strided_slice %17 {offsets = [1, 192], sizes = [2, 128], strides = [1, 1]} : vector<5x320xf32> to vector<2x128xf32>
    %62 = arith.truncf %61 : vector<2x128xf32> to vector<2x128xbf16>
    %c7 = arith.constant 7 : index
    %c0_36 = arith.constant 0 : index
    %c0_37 = arith.constant 0 : index
    %63 = vector.load %arg4[%c7, %c0_36, %c0_37] : memref<16x128x256xbf16, #tpu.memory_space<vmem>>, vector<1x128x256xbf16>
    %64 = vector.shape_cast %63 : vector<1x128x256xbf16> to vector<128x256xbf16>
    %cst_38 = arith.constant dense<0.000000e+00> : vector<2x256xf32>
    %65 = tpu.matmul %62, %64, %cst_38 {dimension_numbers = #tpu.dot_dimension_numbers<[1], [0], [0], [1], [0, 0, 1, 1], [], []>} : vector<2x128xbf16>, vector<128x256xbf16>, vector<2x256xf32> -> vector<2x256xf32>
    %66 = arith.addf %60, %65 : vector<2x256xf32>
    %67 = vector.extract_strided_slice %17 {offsets = [2, 0], sizes = [2, 128], strides = [1, 1]} : vector<5x320xf32> to vector<2x128xf32>
    %68 = arith.truncf %67 : vector<2x128xf32> to vector<2x128xbf16>
    %c8 = arith.constant 8 : index
    %c0_39 = arith.constant 0 : index
    %c0_40 = arith.constant 0 : index
    %69 = vector.load %arg4[%c8, %c0_39, %c0_40] : memref<16x128x256xbf16, #tpu.memory_space<vmem>>, vector<1x128x256xbf16>
    %70 = vector.shape_cast %69 : vector<1x128x256xbf16> to vector<128x256xbf16>
    %cst_41 = arith.constant dense<0.000000e+00> : vector<2x256xf32>
    %71 = tpu.matmul %68, %70, %cst_41 {dimension_numbers = #tpu.dot_dimension_numbers<[1], [0], [0], [1], [0, 0, 1, 1], [], []>} : vector<2x128xbf16>, vector<128x256xbf16>, vector<2x256xf32> -> vector<2x256xf32>
    %72 = arith.addf %66, %71 : vector<2x256xf32>
    %73 = vector.extract_strided_slice %17 {offsets = [2, 64], sizes = [2, 128], strides = [1, 1]} : vector<5x320xf32> to vector<2x128xf32>
    %74 = arith.truncf %73 : vector<2x128xf32> to vector<2x128xbf16>
    %c9 = arith.constant 9 : index
    %c0_42 = arith.constant 0 : index
    %c0_43 = arith.constant 0 : index
    %75 = vector.load %arg4[%c9, %c0_42, %c0_43] : memref<16x128x256xbf16, #tpu.memory_space<vmem>>, vector<1x128x256xbf16>
    %76 = vector.shape_cast %75 : vector<1x128x256xbf16> to vector<128x256xbf16>
    %cst_44 = arith.constant dense<0.000000e+00> : vector<2x256xf32>
    %77 = tpu.matmul %74, %76, %cst_44 {dimension_numbers = #tpu.dot_dimension_numbers<[1], [0], [0], [1], [0, 0, 1, 1], [], []>} : vector<2x128xbf16>, vector<128x256xbf16>, vector<2x256xf32> -> vector<2x256xf32>
    %78 = arith.addf %72, %77 : vector<2x256xf32>
    %79 = vector.extract_strided_slice %17 {offsets = [2, 128], sizes = [2, 128], strides = [1, 1]} : vector<5x320xf32> to vector<2x128xf32>
    %80 = arith.truncf %79 : vector<2x128xf32> to vector<2x128xbf16>
    %c10 = arith.constant 10 : index
    %c0_45 = arith.constant 0 : index
    %c0_46 = arith.constant 0 : index
    %81 = vector.load %arg4[%c10, %c0_45, %c0_46] : memref<16x128x256xbf16, #tpu.memory_space<vmem>>, vector<1x128x256xbf16>
    %82 = vector.shape_cast %81 : vector<1x128x256xbf16> to vector<128x256xbf16>
    %cst_47 = arith.constant dense<0.000000e+00> : vector<2x256xf32>
    %83 = tpu.matmul %80, %82, %cst_47 {dimension_numbers = #tpu.dot_dimension_numbers<[1], [0], [0], [1], [0, 0, 1, 1], [], []>} : vector<2x128xbf16>, vector<128x256xbf16>, vector<2x256xf32> -> vector<2x256xf32>
    %84 = arith.addf %78, %83 : vector<2x256xf32>
    %85 = vector.extract_strided_slice %17 {offsets = [2, 192], sizes = [2, 128], strides = [1, 1]} : vector<5x320xf32> to vector<2x128xf32>
    %86 = arith.truncf %85 : vector<2x128xf32> to vector<2x128xbf16>
    %c11 = arith.constant 11 : index
    %c0_48 = arith.constant 0 : index
    %c0_49 = arith.constant 0 : index
    %87 = vector.load %arg4[%c11, %c0_48, %c0_49] : memref<16x128x256xbf16, #tpu.memory_space<vmem>>, vector<1x128x256xbf16>
    %88 = vector.shape_cast %87 : vector<1x128x256xbf16> to vector<128x256xbf16>
    %cst_50 = arith.constant dense<0.000000e+00> : vector<2x256xf32>
    %89 = tpu.matmul %86, %88, %cst_50 {dimension_numbers = #tpu.dot_dimension_numbers<[1], [0], [0], [1], [0, 0, 1, 1], [], []>} : vector<2x128xbf16>, vector<128x256xbf16>, vector<2x256xf32> -> vector<2x256xf32>
    %90 = arith.addf %84, %89 : vector<2x256xf32>
    %91 = vector.extract_strided_slice %17 {offsets = [3, 0], sizes = [2, 128], strides = [1, 1]} : vector<5x320xf32> to vector<2x128xf32>
    %92 = arith.truncf %91 : vector<2x128xf32> to vector<2x128xbf16>
    %c12 = arith.constant 12 : index
    %c0_51 = arith.constant 0 : index
    %c0_52 = arith.constant 0 : index
    %93 = vector.load %arg4[%c12, %c0_51, %c0_52] : memref<16x128x256xbf16, #tpu.memory_space<vmem>>, vector<1x128x256xbf16>
    %94 = vector.shape_cast %93 : vector<1x128x256xbf16> to vector<128x256xbf16>
    %cst_53 = arith.constant dense<0.000000e+00> : vector<2x256xf32>
    %95 = tpu.matmul %92, %94, %cst_53 {dimension_numbers = #tpu.dot_dimension_numbers<[1], [0], [0], [1], [0, 0, 1, 1], [], []>} : vector<2x128xbf16>, vector<128x256xbf16>, vector<2x256xf32> -> vector<2x256xf32>
    %96 = arith.addf %90, %95 : vector<2x256xf32>
    %97 = vector.extract_strided_slice %17 {offsets = [3, 64], sizes = [2, 128], strides = [1, 1]} : vector<5x320xf32> to vector<2x128xf32>
    %98 = arith.truncf %97 : vector<2x128xf32> to vector<2x128xbf16>
    %c13 = arith.constant 13 : index
    %c0_54 = arith.constant 0 : index
    %c0_55 = arith.constant 0 : index
    %99 = vector.load %arg4[%c13, %c0_54, %c0_55] : memref<16x128x256xbf16, #tpu.memory_space<vmem>>, vector<1x128x256xbf16>
    %100 = vector.shape_cast %99 : vector<1x128x256xbf16> to vector<128x256xbf16>
    %cst_56 = arith.constant dense<0.000000e+00> : vector<2x256xf32>
    %101 = tpu.matmul %98, %100, %cst_56 {dimension_numbers = #tpu.dot_dimension_numbers<[1], [0], [0], [1], [0, 0, 1, 1], [], []>} : vector<2x128xbf16>, vector<128x256xbf16>, vector<2x256xf32> -> vector<2x256xf32>
    %102 = arith.addf %96, %101 : vector<2x256xf32>
    %103 = vector.extract_strided_slice %17 {offsets = [3, 128], sizes = [2, 128], strides = [1, 1]} : vector<5x320xf32> to vector<2x128xf32>
    %104 = arith.truncf %103 : vector<2x128xf32> to vector<2x128xbf16>
    %c14 = arith.constant 14 : index
    %c0_57 = arith.constant 0 : index
    %c0_58 = arith.constant 0 : index
    %105 = vector.load %arg4[%c14, %c0_57, %c0_58] : memref<16x128x256xbf16, #tpu.memory_space<vmem>>, vector<1x128x256xbf16>
    %106 = vector.shape_cast %105 : vector<1x128x256xbf16> to vector<128x256xbf16>
    %cst_59 = arith.constant dense<0.000000e+00> : vector<2x256xf32>
    %107 = tpu.matmul %104, %106, %cst_59 {dimension_numbers = #tpu.dot_dimension_numbers<[1], [0], [0], [1], [0, 0, 1, 1], [], []>} : vector<2x128xbf16>, vector<128x256xbf16>, vector<2x256xf32> -> vector<2x256xf32>
    %108 = arith.addf %102, %107 : vector<2x256xf32>
    %109 = vector.extract_strided_slice %17 {offsets = [3, 192], sizes = [2, 128], strides = [1, 1]} : vector<5x320xf32> to vector<2x128xf32>
    %110 = arith.truncf %109 : vector<2x128xf32> to vector<2x128xbf16>
    %c15 = arith.constant 15 : index
    %c0_60 = arith.constant 0 : index
    %c0_61 = arith.constant 0 : index
    %111 = vector.load %arg4[%c15, %c0_60, %c0_61] : memref<16x128x256xbf16, #tpu.memory_space<vmem>>, vector<1x128x256xbf16>
    %112 = vector.shape_cast %111 : vector<1x128x256xbf16> to vector<128x256xbf16>
    %cst_62 = arith.constant dense<0.000000e+00> : vector<2x256xf32>
    %113 = tpu.matmul %110, %112, %cst_62 {dimension_numbers = #tpu.dot_dimension_numbers<[1], [0], [0], [1], [0, 0, 1, 1], [], []>} : vector<2x128xbf16>, vector<128x256xbf16>, vector<2x256xf32> -> vector<2x256xf32>
    %114 = arith.addf %108, %113 : vector<2x256xf32>
    %c0_63 = arith.constant 0 : index
    %c0_64 = arith.constant 0 : index
    %115 = vector.load %arg5[%c0_63, %c0_64] : memref<1x256xf32, #tpu.memory_space<vmem>>, vector<1x256xf32>
    %116 = vector.broadcast %115 : vector<1x256xf32> to vector<2x256xf32>
    %117 = arith.addf %114, %116 : vector<2x256xf32>
    %118 = vector.shape_cast %117 : vector<2x256xf32> to vector<1x2x256xf32>
    %c0_65 = arith.constant 0 : index
    %c0_66 = arith.constant 0 : index
    %c0_67 = arith.constant 0 : index
    %119 = vector.load %arg6[%c0_65, %c0_66, %c0_67] : memref<1x2x256xf32, #tpu.memory_space<vmem>>, vector<1x2x256xf32>
    tpu.vector_store %arg6[%c0_65, %c0_66, %c0_67], %118 {strides = array<i32>} : memref<1x2x256xf32, #tpu.memory_space<vmem>>, vector<1x2x256xf32>,
    return
  }
  func.func @transform_0(%arg0: i32) -> (i32, i32, i32) {
    %c0_i32 = arith.constant 0 : i32
    %c0_i32_0 = arith.constant 0 : i32
    %c0_i32_1 = arith.constant 0 : i32
    return %arg0, %c0_i32, %c0_i32_0 : i32, i32, i32
  }
  func.func @transform_1(%arg0: i32) -> (i32, i32) {
    %c0_i32 = arith.constant 0 : i32
    %c0_i32_0 = arith.constant 0 : i32
    %c0_i32_1 = arith.constant 0 : i32
    return %c0_i32, %c0_i32_0 : i32, i32
  }
  func.func @transform_2(%arg0: i32) -> (i32, i32) {
    %c0_i32 = arith.constant 0 : i32
    %c0_i32_0 = arith.constant 0 : i32
    %c0_i32_1 = arith.constant 0 : i32
    return %c0_i32, %c0_i32_0 : i32, i32
  }
  func.func @transform_3(%arg0: i32) -> (i32, i32, i32) {
    %c0_i32 = arith.constant 0 : i32
    %c0_i32_0 = arith.constant 0 : i32
    %c0_i32_1 = arith.constant 0 : i32
    %c0_i32_2 = arith.constant 0 : i32
    return %c0_i32, %c0_i32_0, %c0_i32_1 : i32, i32, i32
  }
  func.func @transform_4(%arg0: i32) -> (i32, i32) {
    %c0_i32 = arith.constant 0 : i32
    %c0_i32_0 = arith.constant 0 : i32
    %c0_i32_1 = arith.constant 0 : i32
    return %c0_i32, %c0_i32_0 : i32, i32
  }
  func.func @transform_5(%arg0: i32) -> (i32, i32, i32) {
    %c0_i32 = arith.constant 0 : i32
    %c0_i32_0 = arith.constant 0 : i32
    %c0_i32_1 = arith.constant 0 : i32
    return %arg0, %c0_i32, %c0_i32_0 : i32, i32, i32
  }
}

</mosaic_0001>

<bundles_post_ra>
// kernel: tile.43
= control target key start
LH: loop header
LB: loop body
LE: loop exit
PB: predicated region body
PF: predicated region fallthrough
CT: control target
= control target key end

     0   :  { %s28_s0 = inlined_call_operand.vmem [shape: f32[8], index: 0, kind: input, shape index: {}]   ;;  %s29_s1 = inlined_call_operand.vmem [shape: f32[16,8], index: 1, kind: output, shape index: {}]  }
   0x1   :  { %v4_v0 = vld [vmem:[%s28_s0] ss:$0 sm:$0xff] }
   0x2   :  { %5 = vst [vmem:[%s29_s1] sm:$0xff] %v4_v0  ;;  %8 = vst [vmem:[%s29_s1 + $0x8] sm:$0xff] %v4_v0 }

// kernel: tile.44
= control target key start
LH: loop header
LB: loop body
LE: loop exit
PB: predicated region body
PF: predicated region fallthrough
CT: control target
= control target key end

     0   :  { %s131_s10 = smov 120   ;;  %s132_s11 = smov 104   ;;  %vm3_vm0 = vcmask 64512   ;;  %vm9_vm1 = vcmask 1048512   ;;  %vm15_vm2 = vcmask 982912   ;;  %vm21_vm3 = vcmask 917312   ;;  %s207_s0 = inlined_call_operand.vmem [shape: f32[16,8], index: 0, kind: input, shape index: {}]   ;;  %s208_s1 = inlined_call_operand.vmem [shape: f32[1,128], index: 1, kind: output, shape index: {}]  }
   0x1   :  { %v101_v0 = vld [vmem:[%s207_s0 + $0xf] sm:$0x1]   ;;  %v103_v1 = vld [vmem:[%s207_s0 + $0xd] sm:$0x1]   ;;  %v102_v2 = vld [vmem:[%s207_s0 + $0xe] sm:$0x1]  }
   0x2   :  { %7 = vrot.lane.b32.xlu0 %v101_v0, %s131_s10  ;;  %19 = vrot.lane.b32.xlu1 %v103_v1, %s132_s11  ;;  %v104_v3 = vld [vmem:[%s207_s0 + $0xc] sm:$0x1]   ;;  %s133_s16 = smov 112   ;;  %s134_s17 = smov 96   ;;  %v105_v4 = vld [vmem:[%s207_s0 + $0xb] sm:$0x1]  }
   0x3   :  { %v106_v5 = vld [vmem:[%s207_s0 + $0xa] sm:$0x1]   ;;  %v2_v6 = vld [vmem:[%s207_s0] sm:$0x1]   ;;  %s135_s24 = smov 88   ;;  %s136_s25 = smov 80  }
   0x4   :  { %4 = vst.msk [vmem:[#allocation0] sm:$0x1] %vm3_vm0, %v2_v6   ;;  %v107_v7 = vld [vmem:[%s207_s0 + $0x9] sm:$0x1]   ;;  %v108_v8 = vld [vmem:[%s207_s0 + $0x8] sm:$0x1]  }
   0x5   :  { %s137_s30 = smov 72   ;;  %s138_s2 = smov 64   ;;  %v109_v9 = vld [vmem:[%s207_s0 + $0x7] sm:$0x1]   ;;  %v110_v10 = vld [vmem:[%s207_s0 + $0x6] sm:$0x1]  }
   0x6   :  { %13 = vrot.lane.b32.xlu0 %v102_v2, %s133_s16  ;;  %25 = vrot.lane.b32.xlu1 %v104_v3, %s134_s17  ;;  %s139_s7 = smov 56   ;;  %s140_s8 = smov 48   ;;  %v111_v11 = vld [vmem:[%s207_s0 + $0x5] sm:$0x1]   ;;  %v112_v12 = vld [vmem:[%s207_s0 + $0x4] sm:$0x1]  }
   0x7   :  { %s141_s13 = smov 40   ;;  %s142_s14 = smov 32   ;;  %v113_v13 = vld [vmem:[%s207_s0 + $0x3] sm:$0x1]   ;;  %v114_v14 = vld [vmem:[%s207_s0 + $0x2] sm:$0x1]  }
   0x8   :  { %s143_s19 = smov 24   ;;  %s144_s20 = smov 16   ;;  %v115_v15 = vld [vmem:[%s207_s0 + $0x1] sm:$0x1]   ;;  %vm27_vm4 = vcmask 851712   ;;  %vm33_vm5 = vcmask 786112  }
   0x9   :  { %s145_s0 = smov 8   ;;  %vm39_vm6 = vcmask 720512   ;;  %vm45_vm7 = vcmask 654912   ;;  %vm51_vm8 = vcmask 589312   ;;  %vm57_vm9 = vcmask 523712  }
   0xa   :  { %31 = vrot.lane.b32.xlu0 %v105_v4, %s135_s24  ;;  %37 = vrot.lane.b32.xlu1 %v106_v5, %s136_s25  ;;  %vm63_vm10 = vcmask 458112   ;;  %vm69_vm11 = vcmask 392512   ;;  %vm75_vm12 = vcmask 326912   ;;  %vm81_vm13 = vcmask 261312  }
   0xb   :  { %vm87_vm14 = vcmask 195712   ;;  %vm93_vm15 = vcmask 130112  }
   0xe   :  { %43 = vrot.lane.b32.xlu0 %v107_v7, %s137_s30  ;;  %49 = vrot.lane.b32.xlu1 %v108_v8, %s138_s2 }
  0x12   :  { %55 = vrot.lane.b32.xlu0 %v109_v9, %s139_s7  ;;  %61 = vrot.lane.b32.xlu1 %v110_v10, %s140_s8 }
  0x16   :  { %67 = vrot.lane.b32.xlu0 %v111_v11, %s141_s13  ;;  %73 = vrot.lane.b32.xlu1 %v112_v12, %s142_s14 }
  0x1a   :  { %79 = vrot.lane.b32.xlu0 %v113_v13, %s143_s19  ;;  %85 = vrot.lane.b32.xlu1 %v114_v14, %s144_s20 }
  0x1e   :  { %91 = vrot.lane.b32.xlu0 %v115_v15, %s145_s0 }
  0x74   :  { %v8_v16 = vpop.permute.xlu0 %7   ;;  %v20_v17 = vpop.permute.xlu1 %19  }
  0x75   :  { %10 = vst.msk [vmem:[#allocation0] sm:$0x1] %vm9_vm1, %v8_v16  }
  0x78   :  { %v14_v18 = vpop.permute.xlu0 %13   ;;  %v26_v19 = vpop.permute.xlu1 %25  }
  0x79   :  { %16 = vst.msk [vmem:[#allocation0] sm:$0x1] %vm15_vm2, %v14_v18  }
  0x7a   :  { %22 = vst.msk [vmem:[#allocation0] sm:$0x1] %vm21_vm3, %v20_v17  }
  0x7b   :  { %28 = vst.msk [vmem:[#allocation0] sm:$0x1] %vm27_vm4, %v26_v19  }
  0x7c   :  { %v32_v20 = vpop.permute.xlu0 %31   ;;  %v38_v21 = vpop.permute.xlu1 %37  }
  0x7d   :  { %34 = vst.msk [vmem:[#allocation0] sm:$0x1] %vm33_vm5, %v32_v20  }
  0x7e   :  { %40 = vst.msk [vmem:[#allocation0] sm:$0x1] %vm39_vm6, %v38_v21  }
  0x80   :  { %v44_v22 = vpop.permute.xlu0 %43   ;;  %v50_v23 = vpop.permute.xlu1 %49  }
  0x81   :  { %46 = vst.msk [vmem:[#allocation0] sm:$0x1] %vm45_vm7, %v44_v22  }
  0x82   :  { %52 = vst.msk [vmem:[#allocation0] sm:$0x1] %vm51_vm8, %v50_v23  }
  0x84   :  { %v56_v24 = vpop.permute.xlu0 %55   ;;  %v62_v25 = vpop.permute.xlu1 %61  }
  0x85   :  { %58 = vst.msk [vmem:[#allocation0] sm:$0x1] %vm57_vm9, %v56_v24  }
  0x86   :  { %64 = vst.msk [vmem:[#allocation0] sm:$0x1] %vm63_vm10, %v62_v25  }
  0x88   :  { %v68_v26 = vpop.permute.xlu0 %67   ;;  %v74_v27 = vpop.permute.xlu1 %73  }
  0x89   :  { %70 = vst.msk [vmem:[#allocation0] sm:$0x1] %vm69_vm11, %v68_v26  }
  0x8a   :  { %76 = vst.msk [vmem:[#allocation0] sm:$0x1] %vm75_vm12, %v74_v27  }
  0x8c   :  { %v80_v28 = vpop.permute.xlu0 %79   ;;  %v86_v29 = vpop.permute.xlu1 %85  }
  0x8d   :  { %82 = vst.msk [vmem:[#allocation0] sm:$0x1] %vm81_vm13, %v80_v28  }
  0x8e   :  { %88 = vst.msk [vmem:[#allocation0] sm:$0x1] %vm87_vm14, %v86_v29  }
  0x90   :  { %v92_v30 = vpop.permute.xlu0 %91  }
  0x91   :  { %94 = vst.msk [vmem:[#allocation0] sm:$0x1] %vm93_vm15, %v92_v30  }
  0x98   :  { %v98_v31 = vld [vmem:[#allocation0] sm:$0x1] }
  0x99   :  { %100 = vst [vmem:[%s208_s1] sm:$0x1] %v98_v31 }

// kernel: _lambda_.6
= control target key start
LH: loop header
LB: loop body
LE: loop exit
PB: predicated region body
PF: predicated region fallthrough
CT: control target
= control target key end

     0   :  { %s1116_s12 = smov 0   ;;  %s1356_s0 = inlined_call_operand.vmem [shape: bf16[2,17,204], index: 0, kind: input, shape index: {}]   ;;  %s1357_s1 = inlined_call_operand.vmem [shape: bf16[4,192,128], index: 1, kind: input, shape index: {}]   ;;  %s1358_s2 = inlined_call_operand.vmem [shape: f32[1,128], index: 2, kind: input, shape index: {}]   ;;  %s1359_s3 = inlined_call_operand.vmem [shape: bf16[2,16,128], index: 3, kind: output, shape index: {}]  }
   0x1 LB: > { %s873_s13 = sadd.s32 4294967295, %s1092_s12   ;;  %p877_p0 = scmp.ge.s32.totalorder %s1092_s12, 1  ;;  %s1092_s12 = sphi %s1116_s12, %s13_s12  }
   0x2   : > { %p137_p1 = scmp.lt.s32.totalorder %s1092_s12, 3 }
   0x4   : > { %p138_p2 = pnand %p877_p0, %p137_p1 }
   0x5   : > { %p161_p3 = scmp.lt.s32.totalorder (!%p138_p2), %s873_s13, 1  ;;  %v1038_v0 = vld [vmem:[%s1357_s1] sm:$0xff] (!%p138_p2)   ;;  %v1094_v1 = vmov (!%p138_p2), 0   ;;  %v1039_v2 = vld [vmem:[%s1357_s1 + $0x8] sm:$0xff] (!%p138_p2)   ;;  %vm501_vm0 = vsmask.f32 (!%p138_p2), 7424 }
   0x6   : > { %141 = sbr.rel (%p138_p2) target bundleno = 412 (0x19c), region = 32  ;;  %433 = vmatprep.subr.bf16.mxu1 (!%p138_p2), %v1094_v1  ;;  %317 = vmatprep.subr.bf16.mxu0 (!%p138_p2), %v1094_v1  ;;  %v1040_v3 = vld [vmem:[%s1357_s1 + $0x60] sm:$0xff] (!%p138_p2)   ;;  %v1042_v4 = vld [vmem:[%s1357_s1 + $0x68] sm:$0xff] (!%p138_p2)   ;;  %v1041_v5 = vld [vmem:[%s1357_s1 + $0x10] sm:$0xff] (!%p138_p2)   ;;  %vm313_vm1 = vcmask (!%p138_p2), 523264   ;;  %s1095_s28 = smov (!%p138_p2), 116  }
   0x7   : > { %434 = vmatpush1.bf16.msra.mxu1 (!%p138_p2), %v1038_v0  ;;  %318 = vmatpush1.bf16.msra.mxu0 (!%p138_p2), %v1040_v3  ;;  %v1043_v13 = vld [vmem:[%s1357_s1 + $0x18] sm:$0xff] (!%p138_p2)   ;;  %v1044_v14 = vld [vmem:[%s1357_s1 + $0x70] sm:$0xff] (!%p138_p2)   ;;  %v1045_v26 = vld [vmem:[%s1357_s1 + $0x20] sm:$0xff] (!%p138_p2)   ;;  %vm238_vm2 = vcmask (!%p138_p2), 949248  }
   0x8   : > { %435 = vmatprep.subr.bf16.mxu1 (!%p138_p2), %v1094_v1  ;;  %319 = vmatprep.subr.bf16.mxu0 (!%p138_p2), %v1094_v1  ;;  %v1046_v21 = vld [vmem:[%s1357_s1 + $0x78] sm:$0xff] (!%p138_p2)   ;;  %v1048_v29 = vld [vmem:[%s1357_s1 + $0x80] sm:$0xff] (!%p138_p2)   ;;  %v1047_v30 = vld [vmem:[%s1357_s1 + $0x28] sm:$0xff] (!%p138_p2)  }
   0x9   : > { %v1050_v31 = vld [vmem:[%s1357_s1 + $0x88] sm:$0xff] (!%p138_p2)   ;;  %v1049_v32 = vld [vmem:[%s1357_s1 + $0x30] sm:$0xff] (!%p138_p2)   ;;  %v1051_v34 = vld [vmem:[%s1357_s1 + $0x38] sm:$0xff] (!%p138_p2)  }
   0xa   : > { %v1052_v33 = vld [vmem:[%s1357_s1 + $0x90] sm:$0xff] (!%p138_p2)   ;;  %v1054_v35 = vld [vmem:[%s1357_s1 + $0x98] sm:$0xff] (!%p138_p2)   ;;  %v1053_v36 = vld [vmem:[%s1357_s1 + $0x40] sm:$0xff] (!%p138_p2)  }
   0xb   : > { %436 = vmatpush1.bf16.msra.mxu1 (!%p138_p2), %v1039_v2  ;;  %320 = vmatpush1.bf16.msra.mxu0 (!%p138_p2), %v1042_v4  ;;  %v1056_v37 = vld [vmem:[%s1357_s1 + $0xa0] sm:$0xff] (!%p138_p2)   ;;  %v1055_v38 = vld [vmem:[%s1357_s1 + $0x48] sm:$0xff] (!%p138_p2)   ;;  %v1057_v40 = vld [vmem:[%s1357_s1 + $0x50] sm:$0xff] (!%p138_p2)  }
   0xc   : > { %437 = vmatprep.subr.bf16.mxu1 (!%p138_p2), %v1094_v1  ;;  %321 = vmatprep.subr.bf16.mxu0 (!%p138_p2), %v1094_v1  ;;  %v1058_v39 = vld [vmem:[%s1357_s1 + $0xa8] sm:$0xff] (!%p138_p2)   ;;  %v1060_v41 = vld [vmem:[%s1357_s1 + $0xb0] sm:$0xff] (!%p138_p2)   ;;  %v1059_v42 = vld [vmem:[%s1357_s1 + $0x58] sm:$0xff] (!%p138_p2)  }
   0xd   : > { %s1361_s13 = smov (!%p161_p3, %s873_s13), 1  ;;  %v1062_v43 = vld [vmem:[%s1357_s1 + $0xb8] sm:$0xff]   ;;  %v1061_v44 = vld [vmem:[%s1357_s1 + $0x120] sm:$0xff]   ;;  %v1063_v45 = vld [vmem:[%s1357_s1 + $0x128] sm:$0xff]  }
   0xe   : > { %s1022_s20 = smul.u32 24, %s1361_s13  ;;  %v1065_v46 = vld [vmem:[%s1357_s1 + $0x130] sm:$0xff]   ;;  %v1067_v47 = vld [vmem:[%s1357_s1 + $0x138] sm:$0xff]   ;;  %v1069_v48 = vld [vmem:[%s1357_s1 + $0x140] sm:$0xff]   ;;  %s1014_s17 = sshll.u32 %s1361_s13, 3 }
   0xf   : > { %438 = vmatpush1.bf16.msra.mxu1 %v1041_v5  ;;  %322 = vmatpush1.bf16.msra.mxu0 %v1044_v14  ;;  %v1071_v49 = vld [vmem:[%s1357_s1 + $0x148] sm:$0xff]   ;;  %v1073_v50 = vld [vmem:[%s1357_s1 + $0x150] sm:$0xff]   ;;  %v1075_v51 = vld [vmem:[%s1357_s1 + $0x158] sm:$0xff]  }
  0x10   : > { %s165_s25 = scalar_lea.vmem %s1356_s0, %s1022_s20  ;;  %439 = vmatprep.subr.bf16.mxu1 %v1094_v1  ;;  %323 = vmatprep.subr.bf16.mxu0 %v1094_v1  ;;  %v1077_v52 = vld [vmem:[%s1357_s1 + $0x160] sm:$0xff]   ;;  %v1079_v53 = vld [vmem:[%s1357_s1 + $0x168] sm:$0xff]   ;;  %v1081_v54 = vld [vmem:[%s1357_s1 + $0x170] sm:$0xff]   ;;  %s170_s20 = scalar_lea.vmem %s1359_s3, %s1014_s17 }
  0x11   : > { %v1149_v6 = vld [vmem:[%s165_s25] ss:$8 sps:$4 sm:$0xff]   ;;  %v1035_v7 = vld [vmem:[%s165_s25 + $0x4] ss:$8 sps:$4 sm:$0xff]   ;;  %v174_v8 = vld [vmem:[%s165_s25 + $0x10] sm:$0x11] }
  0x12   : > { %234 = vrot.lane.b32.xlu0 %v1149_v6, %s1095_s28  ;;  %v933_v9 = vcombine.low %v174_v8, %v174_v8  ;;  %v503_v10 = vshrl.u32 %v1149_v6, 16  ;;  %v505_v11 = vshll.u32 %v1149_v6, 16  ;;  %v934_v12 = vcombine.high %v174_v8, %v174_v8  ;;  %932 = vmatprep.mubr.msk.bf16.mxu1 %vm313_vm1, %v1035_v7  ;;  %v1083_v55 = vld [vmem:[%s1357_s1 + $0x178] sm:$0xff]   ;;  %v1064_v57 = vld [vmem:[%s1357_s1 + $0xc0] sm:$0xff]   ;;  %v1066_v60 = vld [vmem:[%s1357_s1 + $0xc8] sm:$0xff]  }
  0x13   : > { %v514_v15 = vshrl.u32 %v1035_v7, 16  ;;  %v516_v16 = vshll.u32 %v1035_v7, 16  ;;  %440 = vmatpush1.bf16.msra.mxu1 %v1043_v13  ;;  %324 = vmatpush1.bf16.msra.mxu0 %v1046_v21  ;;  %v1068_v62 = vld [vmem:[%s1357_s1 + $0xd0] sm:$0xff]   ;;  %v1070_v2 = vld [vmem:[%s1357_s1 + $0xd8] sm:$0xff]   ;;  %v1072_v3 = vld [vmem:[%s1357_s1 + $0xe0] sm:$0xff]  }
  0x14   : > { %v507_v17 = vrot.slane %v505_v11, 1  ;;  %v510_v18 = vshll.u32 %v933_v9, 16  ;;  %v521_v19 = vshll.u32 %v934_v12, 16  ;;  %441 = vmatprep.subr.bf16.mxu1 %v1094_v1  ;;  %325 = vmatprep.subr.bf16.mxu0 %v1094_v1  ;;  %v1074_v4 = vld [vmem:[%s1357_s1 + $0xe8] sm:$0xff]   ;;  %v1076_v5 = vld [vmem:[%s1357_s1 + $0xf0] sm:$0xff]  }
  0x15   : > { %v518_v20 = vrot.slane %v516_v16, 1  ;;  %v1082_v8 = vld [vmem:[%s1357_s1 + $0x108] sm:$0xff]   ;;  %v1084_v9 = vld [vmem:[%s1357_s1 + $0x110] sm:$0xff]  }
  0x16   : > { %236 = vrot.lane.b32.xlu0 %v1035_v7, %s1095_s28  ;;  %v508_v22 = vor.u32 %v507_v17, %v503_v10  ;;  %v512_v23 = vrot.slane %v510_v18, 1  ;;  %v523_v24 = vrot.slane %v521_v19, 1  ;;  %v1080_v7 = vld [vmem:[%s1357_s1 + $0x100] sm:$0xff]   ;;  %v1085_v10 = vld [vmem:[%s1357_s1 + $0x118] sm:$0xff]  }
  0x17   : > { %v519_v25 = vor.u32 %v518_v20, %v514_v15  ;;  %442 = vmatpush1.bf16.msra.mxu1 %v1045_v26  ;;  %326 = vmatpush1.bf16.msra.mxu0 %v1048_v29 }
  0x18   : > { %v1174_v27 = vsel %vm501_vm0, %v508_v22, %v512_v23  ;;  %443 = vmatprep.subr.bf16.mxu1 %v1094_v1  ;;  %327 = vmatprep.subr.bf16.mxu0 %v1094_v1 }
  0x19   : > { %669 = vrot.lane.b32.xlu1 %v1174_v27, %s1095_s28  ;;  %v1180_v28 = vsel %vm501_vm0, %v519_v25, %v523_v24 }
  0x1b   : > { %444 = vmatpush1.bf16.msra.mxu1 %v1047_v30  ;;  %328 = vmatpush1.bf16.msra.mxu0 %v1050_v31 }
  0x1c   : > { %445 = vmatprep.subr.bf16.mxu1 %v1094_v1  ;;  %329 = vmatprep.subr.bf16.mxu0 %v1094_v1 }
  0x1d   : > { %671 = vrot.lane.b32.xlu1 %v1180_v28, %s1095_s28 }
  0x1f   : > { %446 = vmatpush1.bf16.msra.mxu1 %v1049_v32  ;;  %330 = vmatpush1.bf16.msra.mxu0 %v1052_v33 }
  0x20   : > { %447 = vmatprep.subr.bf16.mxu1 %v1094_v1  ;;  %331 = vmatprep.subr.bf16.mxu0 %v1094_v1 }
  0x23   : > { %448 = vmatpush1.bf16.msra.mxu1 %v1051_v34  ;;  %332 = vmatpush1.bf16.msra.mxu0 %v1054_v35 }
  0x24   : > { %449 = vmatprep.subr.bf16.mxu1 %v1094_v1  ;;  %333 = vmatprep.subr.bf16.mxu0 %v1094_v1 }
  0x27   : > { %450 = vmatpush1.bf16.msra.mxu1 %v1053_v36  ;;  %334 = vmatpush1.bf16.msra.mxu0 %v1056_v37 }
  0x28   : > { %451 = vmatprep.subr.bf16.mxu1 %v1094_v1  ;;  %335 = vmatprep.subr.bf16.mxu0 %v1094_v1 }
  0x2b   : > { %452 = vmatpush1.bf16.msra.mxu1 %v1055_v38  ;;  %336 = vmatpush1.bf16.msra.mxu0 %v1058_v39 }
  0x2c   : > { %453 = vmatprep.subr.bf16.mxu1 %v1094_v1  ;;  %337 = vmatprep.subr.bf16.mxu0 %v1094_v1 }
  0x2f   : > { %454 = vmatpush1.bf16.msra.mxu1 %v1057_v40  ;;  %338 = vmatpush1.bf16.msra.mxu0 %v1060_v41 }
  0x30   : > { %455 = vmatprep.subr.bf16.mxu1 %v1094_v1  ;;  %339 = vmatprep.subr.bf16.mxu0 %v1094_v1 }
  0x33   : > { %456 = vmatpush1.bf16.msra.mxu1 %v1059_v42  ;;  %340 = vmatpush1.bf16.msra.mxu0 %v1062_v43 }
  0x34   : > { %750 = vmatprep.subr.bf16.mxu1 %v1094_v1  ;;  %601 = vmatprep.subr.bf16.mxu0 %v1094_v1 }
  0x36   : > { %466 = vmatmul.mubr.bf16.vlgmr.msra.gmra.mrb[0].mxu1 %v1149_v6  ;;  %v1078_v6 = vld [vmem:[%s1357_s1 + $0xf8] sm:$0xff]  }
  0x37   : > { %751 = vmatpush1.bf16.msra.mxu1 %v1061_v44 }
  0x38   : > { %752 = vmatprep.subr.bf16.mxu1 %v1094_v1 }
  0x3b   : > { %753 = vmatpush1.bf16.msra.mxu1 %v1063_v45 }
  0x3c   : > { %754 = vmatprep.subr.bf16.mxu1 %v1094_v1 }
  0x3f   : > { %755 = vmatpush1.bf16.msra.mxu1 %v1065_v46 }
  0x40   : > { %756 = vmatprep.subr.bf16.mxu1 %v1094_v1 }
  0x43   : > { %757 = vmatpush1.bf16.msra.mxu1 %v1067_v47 }
  0x44   : > { %758 = vmatprep.subr.bf16.mxu1 %v1094_v1 }
  0x47   : > { %759 = vmatpush1.bf16.msra.mxu1 %v1069_v48 }
  0x48   : > { %760 = vmatprep.subr.bf16.mxu1 %v1094_v1 }
  0x4b   : > { %761 = vmatpush1.bf16.msra.mxu1 %v1071_v49 }
  0x4c   : > { %762 = vmatprep.subr.bf16.mxu1 %v1094_v1 }
  0x4f   : > { %763 = vmatpush1.bf16.msra.mxu1 %v1073_v50 }
  0x50   : > { %764 = vmatprep.subr.bf16.mxu1 %v1094_v1 }
  0x53   : > { %765 = vmatpush1.bf16.msra.mxu1 %v1075_v51 }
  0x54   : > { %766 = vmatprep.subr.bf16.mxu1 %v1094_v1 }
  0x57   : > { %767 = vmatpush1.bf16.msra.mxu1 %v1077_v52 }
  0x58   : > { %768 = vmatprep.subr.bf16.mxu1 %v1094_v1 }
  0x5b   : > { %769 = vmatpush1.bf16.msra.mxu1 %v1079_v53 }
  0x5c   : > { %770 = vmatprep.subr.bf16.mxu1 %v1094_v1 }
  0x5f   : > { %771 = vmatpush1.bf16.msra.mxu1 %v1081_v54 }
  0x60   : > { %772 = vmatprep.subr.bf16.mxu1 %v1094_v1 }
  0x63   : > { %773 = vmatpush1.bf16.msra.mxu1 %v1083_v55 }
  0x84   : > { %v235_v56 = vpop.permute.xlu0 %234 }
  0x88   : > { %v237_v58 = vpop.permute.xlu0 %236 }
  0x89   : > { %919 = vmatprep.mubr.msk.bf16.mxu0 %vm313_vm1, %v237_v58  ;;  %v239_v59 = vsel %vm238_vm2, %v235_v56, %v237_v58 }
  0x8a   : > { %350 = vmatmul.mubr.bf16.vlgmr.msra.gmra.mrb[0].mxu0 %v239_v59 }
  0x8b   : > { %602 = vmatpush1.bf16.msra.mxu0 %v1064_v57  ;;  %v670_v61 = vpop.permute.xlu1 %669  ;;  %971 = vmatprep.mubr.msk.bf16.mxu0 %vm313_vm1, %v1180_v28 }
  0x8c   : > { %603 = vmatprep.subr.bf16.mxu0 %v1094_v1 }
  0x8f   : > { %604 = vmatpush1.bf16.msra.mxu0 %v1066_v60  ;;  %v672_v63 = vpop.permute.xlu1 %671 }
  0x90   : > { %605 = vmatprep.subr.bf16.mxu0 %v1094_v1  ;;  %v673_v0 = vsel %vm238_vm2, %v670_v61, %v672_v63  ;;  %1008 = vmatprep.mubr.msk.bf16.mxu1 %vm313_vm1, %v672_v63 }
  0x91   : > { %783 = vmatmul.mubr.bf16.vlgmr.msra.gmra.mrb[4].mxu1 %v673_v0 }
  0x93   : > { %606 = vmatpush1.bf16.msra.mxu0 %v1068_v62 }
  0x94   : > { %607 = vmatprep.subr.bf16.mxu0 %v1094_v1 }
  0x97   : > { %608 = vmatpush1.bf16.msra.mxu0 %v1070_v2 }
  0x98   : > { %609 = vmatprep.subr.bf16.mxu0 %v1094_v1 }
  0x9b   : > { %610 = vmatpush1.bf16.msra.mxu0 %v1072_v3 }
  0x9c   : > { %611 = vmatprep.subr.bf16.mxu0 %v1094_v1 }
  0x9f   : > { %612 = vmatpush1.bf16.msra.mxu0 %v1074_v4 }
  0xa0   : > { %613 = vmatprep.subr.bf16.mxu0 %v1094_v1 }
  0xa3   : > { %614 = vmatpush1.bf16.msra.mxu0 %v1076_v5 }
  0xa4   : > { %615 = vmatprep.subr.bf16.mxu0 %v1094_v1 }
  0xa7   : > { %616 = vmatpush1.bf16.msra.mxu0 %v1078_v6 }
  0xa8   : > { %617 = vmatprep.subr.bf16.mxu0 %v1094_v1 }
  0xab   : > { %618 = vmatpush1.bf16.msra.mxu0 %v1080_v7 }
  0xac   : > { %619 = vmatprep.subr.bf16.mxu0 %v1094_v1 }
  0xaf   : > { %620 = vmatpush1.bf16.msra.mxu0 %v1082_v8 }
  0xb0   : > { %621 = vmatprep.subr.bf16.mxu0 %v1094_v1 }
  0xb3   : > { %622 = vmatpush1.bf16.msra.mxu0 %v1084_v9 }
  0xb4   : > { %623 = vmatprep.subr.bf16.mxu0 %v1094_v1 }
  0xb7   : > { %624 = vmatpush1.bf16.msra.mxu0 %v1085_v10 }
  0xba   : > { %634 = vmatmul.mubr.bf16.vlgmr.msra.gmra.mrb[4].mxu0 %v1174_v27  ;;  %v1009_v27 = vld [vmem:[%s1358_s2] ss:$0 sm:$0xff] }
 0x109   : > { %v467_v11 = vpop.f32.mrb[0].mxu1 }
 0x10a   : > { %v469_v12 = vpop.f32.mrb[1].mxu1 }
 0x10b   : > { %v470_v13 = vpop.f32.mrb[2].mxu1 }
 0x10c   : > { %v472_v14 = vpop.f32.mrb[3].mxu1 }
 0x15d   : > { %v351_v15 = vpop.f32.mrb[0].mxu0 }
 0x15e   : > { %v468_v16 = vadd.f32 %v467_v11, %v351_v15  ;;  %v353_v17 = vpop.f32.mrb[1].mxu0 }
 0x15f   : > { %v354_v18 = vpop.f32.mrb[2].mxu0 }
 0x160   : > { %v471_v19 = vadd.f32 %v470_v13, %v354_v18  ;;  %v356_v20 = vpop.f32.mrb[3].mxu0 }
 0x164   : > { %v784_v21 = vpop.f32.mrb[4].mxu1 }
 0x165   : > { %v786_v22 = vpop.f32.mrb[5].mxu1 }
 0x166   : > { %v787_v23 = vpop.f32.mrb[6].mxu1 }
 0x167   : > { %v789_v24 = vpop.f32.mrb[7].mxu1 }
 0x18d   : > { %v635_v25 = vpop.f32.mrb[4].mxu0 }
 0x18e   : > { %v642_v1 = vadd.f32 %v635_v25, %v468_v16  ;;  %v637_v26 = vpop.f32.mrb[5].mxu0 }
 0x18f   : > { %v638_v28 = vpop.f32.mrb[6].mxu0 }
 0x190   : > { %v791_v29 = vadd.f32 %v784_v21, %v642_v1  ;;  %v643_v30 = vadd.f32 %v638_v28, %v471_v19  ;;  %v640_v31 = vpop.f32.mrb[7].mxu0 }
 0x192   : > { %v800_v32 = vadd.f32 %v1009_v27, %v791_v29  ;;  %v792_v33 = vadd.f32 %v787_v23, %v643_v30 }
 0x194   : > { %v804_v34 = vmul.f32 0.2, %v800_v32  ;;  %v801_v35 = vadd.f32 %v1009_v27, %v792_v33  ;;  %vm802_vm3 = vcmp.ge.f32.partialorder %v800_v32, 0.0 }
 0x196   : > { %vm803_vm4 = vcmp.ge.f32.partialorder %v801_v35, 0.0  ;;  %v805_v36 = vmul.f32 0.2, %v801_v35  ;;  %v806_v37 = vsel %vm802_vm3, %v800_v32, %v804_v34 }
 0x198   : > { %v807_v38 = vsel %vm803_vm4, %v801_v35, %v805_v36 }
 0x199   : > { %v1020_v39 = vpack.c.bf16 %v807_v38, %v806_v37 }
 0x19b   : > { %1021 = vst [vmem:[%s170_s20] sm:$0xff] %v1020_v39  }
 0x19c PF: > { %s13_s12 = sadd.s32 1, %s1092_s12  }
 0x19d   : > { %p10_p4 = scmp.ge.s32.totalorder %s13_s12, 4  }
 0x19f   :  { %12 = sbr.rel (!%p10_p4) target bundleno = 1 (0x1), region = 65 }

// kernel: tile.48
= control target key start
LH: loop header
LB: loop body
LE: loop exit
PB: predicated region body
PF: predicated region fallthrough
CT: control target
= control target key end

     0   :  { %s22_s0 = inlined_call_operand.vmem [shape: f32[16], index: 0, kind: input, shape index: {}]   ;;  %s23_s1 = inlined_call_operand.vmem [shape: f32[8,16], index: 1, kind: output, shape index: {}]  }
   0x1   :  { %v4_v0 = vld [vmem:[%s22_s0] ss:$0 sm:$0xff] }
   0x2   :  { %5 = vst [vmem:[%s23_s1] sm:$0xff] %v4_v0 }

// kernel: tile.49
= control target key start
LH: loop header
LB: loop body
LE: loop exit
PB: predicated region body
PF: predicated region fallthrough
CT: control target
= control target key end

     0   :  { %s67_s10 = smov 112   ;;  %s68_s11 = smov 80   ;;  %vm3_vm0 = vcmask 130048   ;;  %vm9_vm1 = vcmask 1048448   ;;  %vm15_vm2 = vcmask 917248   ;;  %vm21_vm3 = vcmask 786048   ;;  %s111_s0 = inlined_call_operand.vmem [shape: f32[8,16], index: 0, kind: input, shape index: {}]   ;;  %s112_s1 = inlined_call_operand.vmem [shape: f32[1,128], index: 1, kind: output, shape index: {}]  }
   0x1   :  { %v53_v0 = vld [vmem:[%s111_s0 + $0x7] sm:$0x1]   ;;  %v55_v1 = vld [vmem:[%s111_s0 + $0x5] sm:$0x1]   ;;  %v54_v2 = vld [vmem:[%s111_s0 + $0x6] sm:$0x1]  }
   0x2   :  { %7 = vrot.lane.b32.xlu0 %v53_v0, %s67_s10  ;;  %19 = vrot.lane.b32.xlu1 %v55_v1, %s68_s11  ;;  %v56_v3 = vld [vmem:[%s111_s0 + $0x4] sm:$0x1]   ;;  %v2_v4 = vld [vmem:[%s111_s0] sm:$0x1]   ;;  %s69_s18 = smov 96   ;;  %s70_s19 = smov 64  }
   0x3   :  { %4 = vst.msk [vmem:[#allocation0] sm:$0x1] %vm3_vm0, %v2_v4   ;;  %v57_v5 = vld [vmem:[%s111_s0 + $0x3] sm:$0x1]   ;;  %v58_v6 = vld [vmem:[%s111_s0 + $0x2] sm:$0x1]  }
   0x4   :  { %s71_s24 = smov 48   ;;  %s72_s25 = smov 32   ;;  %v59_v7 = vld [vmem:[%s111_s0 + $0x1] sm:$0x1]   ;;  %vm27_vm4 = vcmask 654848   ;;  %vm33_vm5 = vcmask 523648  }
   0x5   :  { %s73_s0 = smov 16   ;;  %vm39_vm6 = vcmask 392448   ;;  %vm45_vm7 = vcmask 261248  }
   0x6   :  { %13 = vrot.lane.b32.xlu0 %v54_v2, %s69_s18  ;;  %25 = vrot.lane.b32.xlu1 %v56_v3, %s70_s19 }
   0xa   :  { %31 = vrot.lane.b32.xlu0 %v57_v5, %s71_s24  ;;  %37 = vrot.lane.b32.xlu1 %v58_v6, %s72_s25 }
   0xe   :  { %43 = vrot.lane.b32.xlu0 %v59_v7, %s73_s0 }
  0x74   :  { %v8_v8 = vpop.permute.xlu0 %7   ;;  %v20_v9 = vpop.permute.xlu1 %19  }
  0x75   :  { %10 = vst.msk [vmem:[#allocation0] sm:$0x1] %vm9_vm1, %v8_v8  }
  0x78   :  { %v14_v10 = vpop.permute.xlu0 %13   ;;  %v26_v11 = vpop.permute.xlu1 %25  }
  0x79   :  { %16 = vst.msk [vmem:[#allocation0] sm:$0x1] %vm15_vm2, %v14_v10  }
  0x7a   :  { %22 = vst.msk [vmem:[#allocation0] sm:$0x1] %vm21_vm3, %v20_v9  }
  0x7b   :  { %28 = vst.msk [vmem:[#allocation0] sm:$0x1] %vm27_vm4, %v26_v11  }
  0x7c   :  { %v32_v12 = vpop.permute.xlu0 %31   ;;  %v38_v13 = vpop.permute.xlu1 %37  }
  0x7d   :  { %34 = vst.msk [vmem:[#allocation0] sm:$0x1] %vm33_vm5, %v32_v12  }
  0x7e   :  { %40 = vst.msk [vmem:[#allocation0] sm:$0x1] %vm39_vm6, %v38_v13  }
  0x80   :  { %v44_v14 = vpop.permute.xlu0 %43  }
  0x81   :  { %46 = vst.msk [vmem:[#allocation0] sm:$0x1] %vm45_vm7, %v44_v14  }
  0x88   :  { %v50_v15 = vld [vmem:[#allocation0] sm:$0x1] }
  0x89   :  { %52 = vst [vmem:[%s112_s1] sm:$0x1] %v50_v15 }

// kernel: _lambda_.7
= control target key start
LH: loop header
LB: loop body
LE: loop exit
PB: predicated region body
PF: predicated region fallthrough
CT: control target
= control target key end

     0   :  { %s1445_s18 = smov 0   ;;  %s1705_s0 = inlined_call_operand.vmem [shape: bf16[2,9,288], index: 0, kind: input, shape index: {}]   ;;  %s1706_s1 = inlined_call_operand.vmem [shape: bf16[4,256,128], index: 1, kind: input, shape index: {}]   ;;  %s1707_s2 = inlined_call_operand.vmem [shape: f32[1,128], index: 2, kind: input, shape index: {}]   ;;  %s1708_s3 = inlined_call_operand.vmem [shape: bf16[2,8,128], index: 3, kind: output, shape index: {0}]   ;;  %s1709_s4 = inlined_call_operand.vmem [shape: f32[1,128], index: 4, kind: output, shape index: {1}]   ;;  %s1710_s5 = inlined_call_operand.vmem [shape: f32[1,128], index: 5, kind: output, shape index: {2}]  }
   0x1 LB: > { %s1451_s19 = sadd.s32 4294967295, %s1411_s18   ;;  %p1063_p0 = scmp.ge.s32.totalorder %s1411_s18, 1  ;;  %s1411_s18 = sphi %s1445_s18, %s16_s18  }
   0x2   : > { %p182_p1 = scmp.lt.s32.totalorder %s1411_s18, 3 }
   0x4   : > { %p183_p2 = pnand %p1063_p0, %p182_p1 }
   0x5   : > { %p209_p3 = scmp.lt.s32.totalorder (!%p183_p2), %s1451_s19, 1  ;;  %v1341_v0 = vld [vmem:[%s1706_s1 + $0x40] sm:$0xff] (!%p183_p2)   ;;  %v1343_v2 = vld [vmem:[%s1706_s1 + $0x48] sm:$0xff] (!%p183_p2)   ;;  %v1347_v13 = vld [vmem:[%s1706_s1 + $0x50] sm:$0xff] (!%p183_p2)   ;;  %vm306_vm0 = vcmask (!%p183_p2), 785408   ;;  %p1233_p4 = scmp.ne.s32.totalorder (!%p183_p2), %s1451_s19, 0 }
   0x6   : > { %186 = sbr.rel (%p183_p2) target bundleno = 412 (0x19c), region = 32  ;;  %v1342_v1 = vld [vmem:[%s1706_s1] sm:$0xff] (!%p183_p2)   ;;  %1258 = vmatprep.subr.bf16.mxu1 (!%p183_p2), %v1341_v0  ;;  %v1345_v4 = vld [vmem:[%s1706_s1 + $0x8] sm:$0xff] (!%p183_p2)   ;;  %v1349_v20 = vld [vmem:[%s1706_s1 + $0x10] sm:$0xff] (!%p183_p2)  }
   0x7   : > { %1259 = vmatpush3.bf16.msra.mxu1 (!%p183_p2), %v1342_v1  ;;  %v1344_v3 = vld [vmem:[%s1706_s1 + $0xc0] sm:$0xff] (!%p183_p2)   ;;  %v1348_v16 = vld [vmem:[%s1706_s1 + $0xc8] sm:$0xff] (!%p183_p2)   ;;  %v1351_v29 = vld [vmem:[%s1706_s1 + $0x58] sm:$0xff] (!%p183_p2)  }
   0x8   : > { %1260 = vmatprep.subr.bf16.mxu1 (!%p183_p2), %v1343_v2  ;;  %1236 = vmatprep.subr.bf16.mxu0 (!%p183_p2), %v1344_v3  ;;  %v1346_v5 = vld [vmem:[%s1706_s1 + $0x80] sm:$0xff] (!%p183_p2)   ;;  %v1350_v26 = vld [vmem:[%s1706_s1 + $0x88] sm:$0xff] (!%p183_p2)   ;;  %v1352_v30 = vld [vmem:[%s1706_s1 + $0xd0] sm:$0xff] (!%p183_p2)  }
   0x9   : > { %1237 = vmatpush3.bf16.msra.mxu0 (!%p183_p2), %v1346_v5  ;;  %v1353_v33 = vld [vmem:[%s1706_s1 + $0x18] sm:$0xff] (!%p183_p2)   ;;  %v1354_v34 = vld [vmem:[%s1706_s1 + $0x90] sm:$0xff] (!%p183_p2)   ;;  %v1355_v36 = vld [vmem:[%s1706_s1 + $0x60] sm:$0xff] (!%p183_p2)  }
   0xa   : > { %1238 = vmatprep.subr.bf16.mxu0 (!%p183_p2), %v1348_v16  ;;  %v1356_v37 = vld [vmem:[%s1706_s1 + $0xd8] sm:$0xff] (!%p183_p2)   ;;  %v1357_v38 = vld [vmem:[%s1706_s1 + $0x20] sm:$0xff] (!%p183_p2)   ;;  %v1359_v40 = vld [vmem:[%s1706_s1 + $0x68] sm:$0xff] (!%p183_p2)  }
   0xb   : > { %1261 = vmatpush3.bf16.msra.mxu1 (!%p183_p2), %v1345_v4  ;;  %v1358_v39 = vld [vmem:[%s1706_s1 + $0x98] sm:$0xff] (!%p183_p2)   ;;  %v1360_v41 = vld [vmem:[%s1706_s1 + $0xe0] sm:$0xff] (!%p183_p2)   ;;  %v1361_v42 = vld [vmem:[%s1706_s1 + $0x28] sm:$0xff] (!%p183_p2)  }
   0xc   : > { %1262 = vmatprep.subr.bf16.mxu1 (!%p183_p2), %v1347_v13  ;;  %v1362_v43 = vld [vmem:[%s1706_s1 + $0xa0] sm:$0xff] (!%p183_p2)   ;;  %v1363_v44 = vld [vmem:[%s1706_s1 + $0x70] sm:$0xff] (!%p183_p2)   ;;  %v1364_v45 = vld [vmem:[%s1706_s1 + $0xe8] sm:$0xff] (!%p183_p2)  }
   0xd   : > { %s210_s22 = scalar_select %p209_p3, %s1451_s19, 1  ;;  %1239 = vmatpush3.bf16.msra.mxu0 %v1350_v26  ;;  %v1365_v46 = vld [vmem:[%s1706_s1 + $0x30] sm:$0xff]   ;;  %v1366_v47 = vld [vmem:[%s1706_s1 + $0xa8] sm:$0xff]   ;;  %v1367_v48 = vld [vmem:[%s1706_s1 + $0x78] sm:$0xff]  }
   0xe   : > { %1240 = vmatprep.subr.bf16.mxu0 %v1352_v30  ;;  %v1368_v49 = vld [vmem:[%s1706_s1 + $0xf0] sm:$0xff]   ;;  %v1369_v50 = vld [vmem:[%s1706_s1 + $0x38] sm:$0xff]   ;;  %v1371_v52 = vld [vmem:[%s1706_s1 + $0x1c0] sm:$0xff]  }
   0xf   : > { %s1324_s27 = smul.u32 24, %s210_s22  ;;  %s1065_s28 = sshll.u32 %s210_s22, 2  ;;  %1263 = vmatpush3.bf16.msra.mxu1 %v1349_v20  ;;  %v1370_v51 = vld [vmem:[%s1706_s1 + $0xb0] sm:$0xff]   ;;  %v1372_v53 = vld [vmem:[%s1706_s1 + $0xf8] sm:$0xff]   ;;  %v1373_v54 = vld [vmem:[%s1706_s1 + $0x180] sm:$0xff]  }
  0x10   : > { %s1475_s10 = scalar_lea.vmem %s1708_s3, %s1065_s28  ;;  %s1413_s22 = smov 96   ;;  %1264 = vmatprep.subr.bf16.mxu1 %v1351_v29  ;;  %v1374_v55 = vld [vmem:[%s1706_s1 + $0xb8] sm:$0xff]   ;;  %v1375_v56 = vld [vmem:[%s1706_s1 + $0x1c8] sm:$0xff]   ;;  %v1376_v57 = vld [vmem:[%s1706_s1 + $0x140] sm:$0xff]  }
  0x11   : > { %s213_s13 = scalar_lea.vmem %s1705_s0, %s1324_s27  ;;  %1241 = vmatpush3.bf16.msra.mxu0 %v1354_v34  ;;  %v1377_v58 = vld [vmem:[%s1706_s1 + $0x188] sm:$0xff]   ;;  %v1379_v59 = vld [vmem:[%s1706_s1 + $0x1d0] sm:$0xff]   ;;  %v1383_v61 = vld [vmem:[%s1706_s1 + $0x1d8] sm:$0xff]  }
  0x12   : > { %v219_v6 = vld [vmem:[%s213_s13] sm:$0xff]  ;;  %v220_v7 = vld [vmem:[%s213_s13 + $0x8] sm:$0xf]  ;;  %v222_v8 = vld [vmem:[%s213_s13 + $0x14] sm:$0x1]  ;;  %1242 = vmatprep.subr.bf16.mxu0 %v1356_v37 }
  0x13   : > { %v1067_v9 = vcombine.high %v219_v6, %v219_v6  ;;  %v1483_v10 = vcombine.low %v219_v6, %v219_v6  ;;  %v1183_v11 = vcombine.low %v220_v7, %v222_v8  ;;  %v221_v12 = vld [vmem:[%s213_s13 + $0xc] sm:$0x11]  ;;  %v1068_v17 = vcombine.low %v220_v7, %v220_v7  ;;  %1265 = vmatpush3.bf16.msra.mxu1 %v1353_v33  ;;  %v1385_v62 = vld [vmem:[%s1706_s1 + $0x198] sm:$0xff]   ;;  %v1387_v63 = vld [vmem:[%s1706_s1 + $0x1e0] sm:$0xff]  }
  0x14   : > { %v1134_v14 = vcombine.high %v219_v6, %v221_v12  ;;  %v1133_v15 = vcombine.low %v219_v6, %v221_v12  ;;  %1266 = vmatprep.subr.bf16.mxu1 %v1355_v36  ;;  %v1381_v60 = vld [vmem:[%s1706_s1 + $0x190] sm:$0xff]   ;;  %v1389_v0 = vld [vmem:[%s1706_s1 + $0x1a0] sm:$0xff]   ;;  %v1391_v1 = vld [vmem:[%s1706_s1 + $0x1e8] sm:$0xff]  }
  0x15   : > { %302 = vrot.lane.b32.xlu0 %v1067_v9, %s1413_s22  ;;  %300 = vrot.lane.b32.xlu1 %v1483_v10, %s1413_s22  ;;  %v806_v18 = vshrl.u32 %v1183_v11, 16  ;;  %v808_v19 = vshll.u32 %v1183_v11, 16  ;;  %v1393_v2 = vld [vmem:[%s1706_s1 + $0x1a8] sm:$0xff]   ;;  %v1395_v3 = vld [vmem:[%s1706_s1 + $0x1f0] sm:$0xff]  }
  0x16   : > { %v626_v21 = vshrl.u32 %v1134_v14, 16  ;;  %v628_v22 = vshll.u32 %v1134_v14, 16  ;;  %v619_v23 = vshrl.u32 %v1133_v15, 16  ;;  %v621_v24 = vshll.u32 %v1133_v15, 16  ;;  %575 = vmatprep.mubr.bf16.mxu1 %v1067_v9  ;;  %1243 = vmatpush3.bf16.msra.mxu0 %v1358_v39  ;;  %v1397_v4 = vld [vmem:[%s1706_s1 + $0x1b0] sm:$0xff]   ;;  %v1399_v5 = vld [vmem:[%s1706_s1 + $0x1f8] sm:$0xff]  }
  0x17   : > { %v810_v25 = vrot.slane %v808_v19, 1  ;;  %1267 = vmatpush3.bf16.msra.mxu1 %v1357_v38  ;;  %1244 = vmatprep.subr.bf16.mxu0 %v1360_v41  ;;  %v1401_v6 = vld [vmem:[%s1706_s1 + $0x1b8] sm:$0xff]   ;;  %v1380_v12 = vld [vmem:[%s1706_s1 + $0x148] sm:$0xff]   ;;  %v1386_v20 = vld [vmem:[%s1706_s1 + $0x110] sm:$0xff]  }
  0x18   : > { %v630_v27 = vrot.slane %v628_v22, 1  ;;  %v623_v28 = vrot.slane %v621_v24, 1  ;;  %1268 = vmatprep.subr.bf16.mxu1 %v1359_v40  ;;  %v1382_v15 = vld [vmem:[%s1706_s1 + $0x108] sm:$0xff]   ;;  %v1388_v22 = vld [vmem:[%s1706_s1 + $0x158] sm:$0xff]   ;;  %v1392_v24 = vld [vmem:[%s1706_s1 + $0x160] sm:$0xff]  }
  0x19   : > { %304 = vrot.lane.b32.xlu0 %v1068_v17, %s1413_s22  ;;  %v811_v31 = vor.u32 %v810_v25, %v806_v18  ;;  %v1384_v17 = vld [vmem:[%s1706_s1 + $0x150] sm:$0xff]   ;;  %v1394_v25 = vld [vmem:[%s1706_s1 + $0x120] sm:$0xff]   ;;  %v1396_v26 = vld [vmem:[%s1706_s1 + $0x168] sm:$0xff]  }
  0x1a   : > { %v1507_v32 = vor.u32 %v630_v27, %v626_v21  ;;  %v1517_v35 = vor.u32 %v623_v28, %v619_v23  ;;  %1245 = vmatpush3.bf16.msra.mxu0 %v1362_v43  ;;  %v1390_v23 = vld [vmem:[%s1706_s1 + $0x118] sm:$0xff]   ;;  %v1398_v27 = vld [vmem:[%s1706_s1 + $0x128] sm:$0xff]   ;;  %v1400_v28 = vld [vmem:[%s1706_s1 + $0x170] sm:$0xff]  }
  0x1b   : > { %1269 = vmatpush3.bf16.msra.mxu1 %v1361_v42  ;;  %1246 = vmatprep.subr.bf16.mxu0 %v1364_v45  ;;  %v1402_v29 = vld [vmem:[%s1706_s1 + $0x130] sm:$0xff]   ;;  %v1403_v30 = vld [vmem:[%s1706_s1 + $0x178] sm:$0xff]  }
  0x1c   : > { %814 = vrot.lane.b32.xlu1 %v1507_v32, %s1413_s22  ;;  %1270 = vmatprep.subr.bf16.mxu1 %v1363_v44 }
  0x1d   : > { %816 = vrot.lane.b32.xlu0 %v811_v31, %s1413_s22  ;;  %v1404_v31 = vld [vmem:[%s1706_s1 + $0x138] sm:$0xff]  }
  0x1e   : > { %1247 = vmatpush3.bf16.msra.mxu0 %v1366_v47 }
  0x1f   : > { %1271 = vmatpush3.bf16.msra.mxu1 %v1365_v46  ;;  %1248 = vmatprep.subr.bf16.mxu0 %v1368_v49 }
  0x20   : > { %812 = vrot.lane.b32.xlu1 %v1517_v35, %s1413_s22  ;;  %1272 = vmatprep.subr.bf16.mxu1 %v1367_v48 }
  0x22   : > { %1249 = vmatpush3.bf16.msra.mxu0 %v1370_v51 }
  0x23   : > { %1273 = vmatpush3.bf16.msra.mxu1 %v1369_v50  ;;  %1250 = vmatprep.subr.bf16.mxu0 %v1372_v53 }
  0x24   : > { %1302 = vmatprep.subr.bf16.mxu1 %v1371_v52 }
  0x26   : > { %576 = vmatmul.mubr.bf16.vlgmr.msra.gmra.mrb[0].mxu1 %v1483_v10  ;;  %1251 = vmatpush3.bf16.msra.mxu0 %v1374_v55  ;;  %v1378_v10 = vld [vmem:[%s1706_s1 + $0x100] sm:$0xff]  }
  0x27   : > { %1303 = vmatpush3.bf16.msra.mxu1 %v1373_v54  ;;  %1280 = vmatprep.subr.bf16.mxu0 %v1376_v57  ;;  %v1232_v54 = vld [vmem:[%s1707_s2] ss:$0 sm:$0xff]  ;;  %v1414_v57 = vmov (!%p1233_p4), 0.0  }
  0x28   : > { %1304 = vmatprep.subr.bf16.mxu1 %v1375_v56  ;;  %971 = vst [vmem:[%s1709_s4] sm:$0x1] (!%p1233_p4), %v1414_v57  ;;  %972 = vst [vmem:[%s1710_s5] sm:$0x1] (!%p1233_p4), %v1414_v57 }
  0x2b   : > { %1305 = vmatpush3.bf16.msra.mxu1 %v1377_v58 }
  0x2c   : > { %1306 = vmatprep.subr.bf16.mxu1 %v1379_v59 }
  0x2f   : > { %1307 = vmatpush3.bf16.msra.mxu1 %v1381_v60 }
  0x30   : > { %1308 = vmatprep.subr.bf16.mxu1 %v1383_v61 }
  0x33   : > { %1309 = vmatpush3.bf16.msra.mxu1 %v1385_v62 }
  0x34   : > { %1310 = vmatprep.subr.bf16.mxu1 %v1387_v63 }
  0x37   : > { %1311 = vmatpush3.bf16.msra.mxu1 %v1389_v0 }
  0x38   : > { %1312 = vmatprep.subr.bf16.mxu1 %v1391_v1 }
  0x3b   : > { %1313 = vmatpush3.bf16.msra.mxu1 %v1393_v2 }
  0x3c   : > { %1314 = vmatprep.subr.bf16.mxu1 %v1395_v3 }
  0x3f   : > { %1315 = vmatpush3.bf16.msra.mxu1 %v1397_v4 }
  0x40   : > { %1316 = vmatprep.subr.bf16.mxu1 %v1399_v5 }
  0x43   : > { %1317 = vmatpush3.bf16.msra.mxu1 %v1401_v6 }
  0x87   : > { %v303_v7 = vpop.permute.xlu0 %302  ;;  %v301_v8 = vpop.permute.xlu1 %300 }
  0x88   : > { %v307_v13 = vsel %vm306_vm0, %v301_v8, %v303_v7 }
  0x8b   : > { %v305_v9 = vpop.permute.xlu0 %304 }
  0x8c   : > { %v308_v11 = vsel %vm306_vm0, %v303_v7, %v305_v9 }
  0x8d   : > { %439 = vmatprep.mubr.bf16.mxu0 %v308_v11 }
  0x8e   : > { %440 = vmatmul.mubr.bf16.vlgmr.msra.gmra.mrb[0].mxu0 %v307_v13  ;;  %v815_v14 = vpop.permute.xlu1 %814 }
  0x8f   : > { %1281 = vmatpush3.bf16.msra.mxu0 %v1378_v10  ;;  %v817_v16 = vpop.permute.xlu0 %816  ;;  %762 = vmatprep.mubr.bf16.mxu0 %v1507_v32 }
  0x90   : > { %1282 = vmatprep.subr.bf16.mxu0 %v1380_v12  ;;  %v819_v18 = vsel %vm306_vm0, %v815_v14, %v817_v16 }
  0x91   : > { %950 = vmatprep.mubr.bf16.mxu1 %v819_v18 }
  0x92   : > { %v813_v19 = vpop.permute.xlu1 %812 }
  0x93   : > { %1283 = vmatpush3.bf16.msra.mxu0 %v1382_v15  ;;  %v818_v21 = vsel %vm306_vm0, %v813_v19, %v815_v14 }
  0x94   : > { %1284 = vmatprep.subr.bf16.mxu0 %v1384_v17  ;;  %951 = vmatmul.mubr.bf16.vlgmr.msra.gmra.mrb[4].mxu1 %v818_v21 }
  0x97   : > { %1285 = vmatpush3.bf16.msra.mxu0 %v1386_v20 }
  0x98   : > { %1286 = vmatprep.subr.bf16.mxu0 %v1388_v22 }
  0x9b   : > { %1287 = vmatpush3.bf16.msra.mxu0 %v1390_v23 }
  0x9c   : > { %1288 = vmatprep.subr.bf16.mxu0 %v1392_v24 }
  0x9f   : > { %1289 = vmatpush3.bf16.msra.mxu0 %v1394_v25 }
  0xa0   : > { %1290 = vmatprep.subr.bf16.mxu0 %v1396_v26 }
  0xa3   : > { %1291 = vmatpush3.bf16.msra.mxu0 %v1398_v27 }
  0xa4   : > { %1292 = vmatprep.subr.bf16.mxu0 %v1400_v28 }
  0xa7   : > { %1293 = vmatpush3.bf16.msra.mxu0 %v1402_v29 }
  0xa8   : > { %1294 = vmatprep.subr.bf16.mxu0 %v1403_v30 }
  0xab   : > { %1295 = vmatpush3.bf16.msra.mxu0 %v1404_v31 }
  0xae   : > { %763 = vmatmul.mubr.bf16.vlgmr.msra.gmra.mrb[4].mxu0 %v1517_v35 }
  0xf9   : > { %v1274_v32 = vpop.f32.mrb[0].mxu1 }
  0xfa   : > { %v1275_v33 = vpop.f32.mrb[1].mxu1 }
  0xfb   : > { %v1276_v34 = vadd.f32 %v1275_v33, %v1274_v32  ;;  %v1277_v36 = vpop.f32.mrb[2].mxu1 }
  0xfc   : > { %v1278_v37 = vpop.f32.mrb[3].mxu1 }
 0x161   : > { %v1252_v38 = vpop.f32.mrb[0].mxu0 }
 0x162   : > { %v1253_v39 = vpop.f32.mrb[1].mxu0 }
 0x163   : > { %v1254_v40 = vadd.f32 %v1253_v39, %v1252_v38  ;;  %v1255_v41 = vpop.f32.mrb[2].mxu0 }
 0x164   : > { %v1256_v42 = vpop.f32.mrb[3].mxu0 }
 0x165   : > { %v578_v43 = vadd.f32 %v1276_v34, %v1254_v40 }
 0x167   : > { %v1318_v44 = vpop.f32.mrb[4].mxu1 }
 0x168   : > { %v1319_v45 = vpop.f32.mrb[5].mxu1 }
 0x169   : > { %v1320_v46 = vadd.f32 %v1319_v45, %v1318_v44  ;;  %v1321_v47 = vpop.f32.mrb[6].mxu1 }
 0x16a   : > { %v1322_v48 = vpop.f32.mrb[7].mxu1 }
 0x181   : > { %v1296_v49 = vpop.f32.mrb[4].mxu0 }
 0x182   : > { %v1297_v50 = vpop.f32.mrb[5].mxu0 }
 0x183   : > { %v1298_v51 = vadd.f32 %v1297_v50, %v1296_v49  ;;  %v1299_v35 = vpop.f32.mrb[6].mxu0  ;;  %970 = sbr.rel (%p1233_p4) target bundleno = 394 (0x18a), region = 36 }
 0x184   : > { %v1300_v52 = vpop.f32.mrb[7].mxu0 }
 0x185   : > { %v770_v53 = vadd.f32 %v1298_v51, %v578_v43 }
 0x187   : > { %v958_v55 = vadd.f32 %v1320_v46, %v770_v53 }
 0x189   : > { %v966_v56 = vadd.f32 %v1232_v54, %v958_v55 }
 0x18a PF: > { %v973_v5 = vld [vmem:[%s1709_s4] sm:$0x1] }
 0x18b   : > { %v974_v58 = vrot.slane %v966_v56, 4  ;;  %v983_v59 = vmul.f32 %v966_v56, %v966_v56  ;;  %v992_v60 = vpack.c.bf16 %v966_v56, %v966_v56  ;;  %v982_v8 = vld [vmem:[%s1710_s5] sm:$0x1] }
 0x18d   : > { %v975_v61 = vadd.f32 %v974_v58, %v966_v56  ;;  %v984_v62 = vrot.slane %v983_v59, 4  ;;  %993 = vst [vmem:[%s1475_s10] sm:$0xf] %v992_v60 }
 0x18f   : > { %v976_v63 = vrot.slane %v975_v61, 2  ;;  %v985_v0 = vadd.f32 %v984_v62, %v983_v59 }
 0x191   : > { %v977_v1 = vadd.f32 %v976_v63, %v975_v61  ;;  %v986_v2 = vrot.slane %v985_v0, 2 }
 0x193   : > { %v978_v3 = vrot.slane %v977_v1, 1  ;;  %v987_v4 = vadd.f32 %v986_v2, %v985_v0 }
 0x195   : > { %v979_v6 = vadd.f32 %v978_v3, %v977_v1  ;;  %v988_v7 = vrot.slane %v987_v4, 1 }
 0x197   : > { %v980_v9 = vadd.f32 %v979_v6, %v973_v5  ;;  %v989_v10 = vadd.f32 %v988_v7, %v987_v4 }
 0x199   : > { %981 = vst [vmem:[%s1709_s4] sm:$0x1] %v980_v9  ;;  %v990_v11 = vadd.f32 %v989_v10, %v982_v8 }
 0x19b   : > { %991 = vst [vmem:[%s1710_s5] sm:$0x1] %v990_v11 }
 0x19c PF: > { %s16_s18 = sadd.s32 1, %s1411_s18  }
 0x19d   : > { %p13_p5 = scmp.ge.s32.totalorder %s16_s18, 4  }
 0x19f   :  { %15 = sbr.rel (!%p13_p5) target bundleno = 1 (0x1), region = 85 }

// kernel: _lambda_.8
= control target key start
LH: loop header
LB: loop body
LE: loop exit
PB: predicated region body
PF: predicated region fallthrough
CT: control target
= control target key end

     0   :  { %s265_s12 = smov 0   ;;  %s301_s0 = inlined_call_operand.vmem [shape: bf16[2,8,128], index: 0, kind: input, shape index: {}]   ;;  %s302_s1 = inlined_call_operand.vmem [shape: f32[1,128], index: 1, kind: input, shape index: {}]   ;;  %s303_s2 = inlined_call_operand.vmem [shape: f32[1,128], index: 2, kind: input, shape index: {}]   ;;  %s304_s3 = inlined_call_operand.vmem [shape: bf16[2,8,128], index: 3, kind: output, shape index: {}]  }
   0x1 LB: > { %s242_s13 = sadd.s32 4294967295, %s267_s12   ;;  %p246_p0 = scmp.ge.s32.totalorder %s267_s12, 1  ;;  %s267_s12 = sphi %s265_s12, %s13_s12  }
   0x2   : > { %p136_p1 = scmp.lt.s32.totalorder %s267_s12, 3 }
   0x4   : > { %p137_p2 = pnand %p246_p0, %p136_p1 }
   0x5   : > { %p158_p3 = scmp.lt.s32.totalorder (!%p137_p2), %s242_s13, 1  ;;  %v249_v1 = vld [vmem:[%s302_s1] ss:$0 sm:$0xff] (!%p137_p2) }
   0x6   : > { %140 = sbr.rel (%p137_p2) target bundleno = 29 (0x1d), region = 32  ;;  %v250_v3 = vld [vmem:[%s303_s2] ss:$0 sm:$0xff] (!%p137_p2) }
   0xd   : > { %s306_s13 = smov (!%p158_p3, %s242_s13), 1 }
   0xe   : > { %s247_s14 = sshll.u32 %s306_s13, 2 }
   0xf   : > { %s161_s17 = scalar_lea.vmem %s301_s0, %s247_s14  ;;  %s165_s24 = scalar_lea.vmem %s304_s3, %s247_s14 }
  0x10   : > { %v166_v0 = vld [vmem:[%s161_s17] sm:$0xf] }
  0x11   : > { %v167_v2 = vunpack.c.l.bf16 %v166_v0 }
  0x13   : > { %v175_v4 = vmul.f32 %v249_v1, %v167_v2 }
  0x15   : > { %v183_v5 = vadd.f32 %v250_v3, %v175_v4 }
  0x17   : > { %vm184_vm0 = vcmp.ge.f32.partialorder %v183_v5, 0.0  ;;  %v185_v6 = vmul.f32 0.2, %v183_v5 }
  0x19   : > { %v186_v7 = vsel %vm184_vm0, %v183_v5, %v185_v6 }
  0x1a   : > { %v187_v8 = vpack.c.bf16 %v186_v7, %v186_v7 }
  0x1c   : > { %188 = vst [vmem:[%s165_s24] sm:$0xf] %v187_v8 }
  0x1d PF: > { %s13_s12 = sadd.s32 1, %s267_s12  }
  0x1e   : > { %p10_p4 = scmp.ge.s32.totalorder %s13_s12, 4  }
  0x20   :  { %12 = sbr.rel (!%p10_p4) target bundleno = 1 (0x1), region = 62 }

// kernel: _lambda_.9
= control target key start
LH: loop header
LB: loop body
LE: loop exit
PB: predicated region body
PF: predicated region fallthrough
CT: control target
= control target key end

     0   :  { %s1434_s18 = smov 0   ;;  %s1696_s0 = inlined_call_operand.vmem [shape: bf16[2,5,320], index: 0, kind: input, shape index: {}]   ;;  %s1697_s1 = inlined_call_operand.vmem [shape: bf16[4,256,128], index: 1, kind: input, shape index: {}]   ;;  %s1698_s2 = inlined_call_operand.vmem [shape: f32[1,128], index: 2, kind: input, shape index: {}]   ;;  %s1699_s3 = inlined_call_operand.vmem [shape: bf16[2,4,128], index: 3, kind: output, shape index: {0}]   ;;  %s1700_s4 = inlined_call_operand.vmem [shape: f32[1,128], index: 4, kind: output, shape index: {1}]   ;;  %s1701_s5 = inlined_call_operand.vmem [shape: f32[1,128], index: 5, kind: output, shape index: {2}]  }
   0x1 LB: > { %s1440_s19 = sadd.s32 4294967295, %s1400_s18   ;;  %p1058_p0 = scmp.ge.s32.totalorder %s1400_s18, 1  ;;  %s1400_s18 = sphi %s1434_s18, %s16_s18  }
   0x2   : > { %p182_p1 = scmp.lt.s32.totalorder %s1400_s18, 3 }
   0x4   : > { %p183_p2 = pnand %p1058_p0, %p182_p1 }
   0x5   : > { %p209_p3 = scmp.lt.s32.totalorder (!%p183_p2), %s1440_s19, 1  ;;  %v1330_v0 = vld [vmem:[%s1697_s1 + $0x40] sm:$0xff] (!%p183_p2)   ;;  %v1332_v2 = vld [vmem:[%s1697_s1 + $0x48] sm:$0xff] (!%p183_p2)   ;;  %v1336_v7 = vld [vmem:[%s1697_s1 + $0x50] sm:$0xff] (!%p183_p2)   ;;  %vm301_vm0 = vcmask (!%p183_p2), 523264   ;;  %p1225_p4 = scmp.ne.s32.totalorder (!%p183_p2), %s1440_s19, 0 }
   0x6   : > { %186 = sbr.rel (%p183_p2) target bundleno = 413 (0x19d), region = 32  ;;  %v1331_v1 = vld [vmem:[%s1697_s1] sm:$0xff] (!%p183_p2)   ;;  %1250 = vmatprep.subr.bf16.mxu1 (!%p183_p2), %v1330_v0  ;;  %v1334_v4 = vld [vmem:[%s1697_s1 + $0x8] sm:$0xff] (!%p183_p2)   ;;  %v1338_v16 = vld [vmem:[%s1697_s1 + $0x10] sm:$0xff] (!%p183_p2)  }
   0x7   : > { %1251 = vmatpush3.bf16.msra.mxu1 (!%p183_p2), %v1331_v1  ;;  %v1333_v3 = vld [vmem:[%s1697_s1 + $0xc0] sm:$0xff] (!%p183_p2)   ;;  %v1337_v11 = vld [vmem:[%s1697_s1 + $0xc8] sm:$0xff] (!%p183_p2)   ;;  %v1340_v23 = vld [vmem:[%s1697_s1 + $0x58] sm:$0xff] (!%p183_p2)  }
   0x8   : > { %1252 = vmatprep.subr.bf16.mxu1 (!%p183_p2), %v1332_v2  ;;  %1228 = vmatprep.subr.bf16.mxu0 (!%p183_p2), %v1333_v3  ;;  %v1335_v5 = vld [vmem:[%s1697_s1 + $0x80] sm:$0xff] (!%p183_p2)   ;;  %v1339_v17 = vld [vmem:[%s1697_s1 + $0x88] sm:$0xff] (!%p183_p2)   ;;  %v1341_v26 = vld [vmem:[%s1697_s1 + $0xd0] sm:$0xff] (!%p183_p2)  }
   0x9   : > { %1229 = vmatpush3.bf16.msra.mxu0 (!%p183_p2), %v1335_v5  ;;  %v1342_v27 = vld [vmem:[%s1697_s1 + $0x18] sm:$0xff] (!%p183_p2)   ;;  %v1343_v29 = vld [vmem:[%s1697_s1 + $0x90] sm:$0xff] (!%p183_p2)   ;;  %v1344_v30 = vld [vmem:[%s1697_s1 + $0x60] sm:$0xff] (!%p183_p2)  }
   0xa   : > { %1230 = vmatprep.subr.bf16.mxu0 (!%p183_p2), %v1337_v11  ;;  %v1345_v31 = vld [vmem:[%s1697_s1 + $0xd8] sm:$0xff] (!%p183_p2)   ;;  %v1346_v32 = vld [vmem:[%s1697_s1 + $0x20] sm:$0xff] (!%p183_p2)   ;;  %v1348_v34 = vld [vmem:[%s1697_s1 + $0x68] sm:$0xff] (!%p183_p2)  }
   0xb   : > { %1253 = vmatpush3.bf16.msra.mxu1 (!%p183_p2), %v1334_v4  ;;  %v1347_v33 = vld [vmem:[%s1697_s1 + $0x98] sm:$0xff] (!%p183_p2)   ;;  %v1349_v35 = vld [vmem:[%s1697_s1 + $0xe0] sm:$0xff] (!%p183_p2)   ;;  %v1350_v36 = vld [vmem:[%s1697_s1 + $0x28] sm:$0xff] (!%p183_p2)  }
   0xc   : > { %1254 = vmatprep.subr.bf16.mxu1 (!%p183_p2), %v1336_v7  ;;  %v1351_v37 = vld [vmem:[%s1697_s1 + $0xa0] sm:$0xff] (!%p183_p2)   ;;  %v1352_v38 = vld [vmem:[%s1697_s1 + $0x70] sm:$0xff] (!%p183_p2)   ;;  %v1353_v39 = vld [vmem:[%s1697_s1 + $0xe8] sm:$0xff] (!%p183_p2)  }
   0xd   : > { %s210_s22 = scalar_select %p209_p3, %s1440_s19, 1  ;;  %1231 = vmatpush3.bf16.msra.mxu0 %v1339_v17  ;;  %v1354_v40 = vld [vmem:[%s1697_s1 + $0x30] sm:$0xff]   ;;  %v1355_v41 = vld [vmem:[%s1697_s1 + $0xa8] sm:$0xff]   ;;  %v1356_v42 = vld [vmem:[%s1697_s1 + $0x78] sm:$0xff]  }
   0xe   : > { %1232 = vmatprep.subr.bf16.mxu0 %v1341_v26  ;;  %v1357_v43 = vld [vmem:[%s1697_s1 + $0xf0] sm:$0xff]   ;;  %v1358_v44 = vld [vmem:[%s1697_s1 + $0x38] sm:$0xff]   ;;  %v1360_v46 = vld [vmem:[%s1697_s1 + $0x1c0] sm:$0xff]  }
   0xf   : > { %s1316_s27 = smul.u32 12, %s210_s22  ;;  %s1060_s28 = sshll.u32 %s210_s22, 1  ;;  %1255 = vmatpush3.bf16.msra.mxu1 %v1338_v16  ;;  %v1359_v45 = vld [vmem:[%s1697_s1 + $0xb0] sm:$0xff]   ;;  %v1361_v47 = vld [vmem:[%s1697_s1 + $0xf8] sm:$0xff]   ;;  %v1362_v48 = vld [vmem:[%s1697_s1 + $0x180] sm:$0xff]  }
  0x10   : > { %s1464_s10 = scalar_lea.vmem %s1699_s3, %s1060_s28  ;;  %s1402_s22 = smov 64   ;;  %1256 = vmatprep.subr.bf16.mxu1 %v1340_v23  ;;  %v1363_v49 = vld [vmem:[%s1697_s1 + $0xb8] sm:$0xff]   ;;  %v1364_v50 = vld [vmem:[%s1697_s1 + $0x1c8] sm:$0xff]   ;;  %v1365_v51 = vld [vmem:[%s1697_s1 + $0x140] sm:$0xff]  }
  0x11   : > { %s213_s13 = scalar_lea.vmem %s1696_s0, %s1316_s27  ;;  %1233 = vmatpush3.bf16.msra.mxu0 %v1343_v29  ;;  %v1366_v52 = vld [vmem:[%s1697_s1 + $0x188] sm:$0xff]   ;;  %v1368_v53 = vld [vmem:[%s1697_s1 + $0x1d0] sm:$0xff]   ;;  %v1372_v55 = vld [vmem:[%s1697_s1 + $0x1d8] sm:$0xff]  }
  0x12   : > { %v219_v6 = vld [vmem:[%s213_s13] sm:$0x77]  ;;  %v1329_v10 = vld [vmem:[%s213_s13 + $0x8] ss:$0 sps:$4 sm:$0x77]   ;;  %1234 = vmatprep.subr.bf16.mxu0 %v1345_v31  ;;  %v1370_v54 = vld [vmem:[%s1697_s1 + $0x190] sm:$0xff]  }
  0x13   : > { %v1062_v8 = vcombine.high %v219_v6, %v219_v6  ;;  %v1475_v9 = vcombine.low %v219_v6, %v219_v6  ;;  %v798_v14 = vshrl.u32 %v1329_v10, 16  ;;  %v800_v15 = vshll.u32 %v1329_v10, 16  ;;  %1257 = vmatpush3.bf16.msra.mxu1 %v1342_v27  ;;  %v1374_v56 = vld [vmem:[%s1697_s1 + $0x198] sm:$0xff]   ;;  %v1376_v57 = vld [vmem:[%s1697_s1 + $0x1e0] sm:$0xff]   ;;  %v1380_v59 = vld [vmem:[%s1697_s1 + $0x1e8] sm:$0xff]  }
  0x14   : > { %1258 = vmatprep.subr.bf16.mxu1 %v1344_v30  ;;  %v1378_v58 = vld [vmem:[%s1697_s1 + $0x1a0] sm:$0xff]   ;;  %v1382_v60 = vld [vmem:[%s1697_s1 + $0x1a8] sm:$0xff]   ;;  %v1384_v61 = vld [vmem:[%s1697_s1 + $0x1f0] sm:$0xff]  }
  0x15   : > { %297 = vrot.lane.b32.xlu0 %v1062_v8, %s1402_s22  ;;  %295 = vrot.lane.b32.xlu1 %v1475_v9, %s1402_s22  ;;  %v619_v12 = vshrl.u32 %v1062_v8, 16  ;;  %v621_v13 = vshll.u32 %v1062_v8, 16  ;;  %v612_v18 = vshrl.u32 %v1475_v9, 16  ;;  %v614_v19 = vshll.u32 %v1475_v9, 16  ;;  %v1386_v62 = vld [vmem:[%s1697_s1 + $0x1b0] sm:$0xff]   ;;  %v1388_v63 = vld [vmem:[%s1697_s1 + $0x1f8] sm:$0xff]  }
  0x16   : > { %570 = vmatprep.mubr.bf16.mxu1 %v1062_v8  ;;  %v802_v21 = vrot.slane %v800_v15, 1  ;;  %1235 = vmatpush3.bf16.msra.mxu0 %v1347_v33  ;;  %v1390_v0 = vld [vmem:[%s1697_s1 + $0x1b8] sm:$0xff]   ;;  %v1367_v4 = vld [vmem:[%s1697_s1 + $0x100] sm:$0xff]   ;;  %v1369_v6 = vld [vmem:[%s1697_s1 + $0x148] sm:$0xff]  }
  0x17   : > { %v623_v20 = vrot.slane %v621_v13, 1  ;;  %v616_v22 = vrot.slane %v614_v19, 1  ;;  %1259 = vmatpush3.bf16.msra.mxu1 %v1346_v32  ;;  %1236 = vmatprep.subr.bf16.mxu0 %v1349_v35  ;;  %v1373_v11 = vld [vmem:[%s1697_s1 + $0x150] sm:$0xff]   ;;  %v1377_v16 = vld [vmem:[%s1697_s1 + $0x158] sm:$0xff]   ;;  %v1383_v19 = vld [vmem:[%s1697_s1 + $0x120] sm:$0xff]  }
  0x18   : > { %v803_v25 = vor.u32 %v802_v21, %v798_v14  ;;  %1260 = vmatprep.subr.bf16.mxu1 %v1348_v34  ;;  %v1375_v15 = vld [vmem:[%s1697_s1 + $0x110] sm:$0xff]   ;;  %v1379_v17 = vld [vmem:[%s1697_s1 + $0x118] sm:$0xff]   ;;  %v1387_v21 = vld [vmem:[%s1697_s1 + $0x128] sm:$0xff]  }
  0x19   : > { %299 = vrot.lane.b32.xlu0 %v1329_v10, %s1402_s22  ;;  %v1495_v24 = vor.u32 %v623_v20, %v619_v12  ;;  %v1505_v28 = vor.u32 %v616_v22, %v612_v18  ;;  %v1381_v18 = vld [vmem:[%s1697_s1 + $0x160] sm:$0xff]   ;;  %v1385_v20 = vld [vmem:[%s1697_s1 + $0x168] sm:$0xff]   ;;  %v1389_v22 = vld [vmem:[%s1697_s1 + $0x170] sm:$0xff]  }
  0x1a   : > { %1237 = vmatpush3.bf16.msra.mxu0 %v1351_v37  ;;  %v1391_v23 = vld [vmem:[%s1697_s1 + $0x130] sm:$0xff]  }
  0x1b   : > { %806 = vrot.lane.b32.xlu1 %v1495_v24, %s1402_s22  ;;  %1261 = vmatpush3.bf16.msra.mxu1 %v1350_v36 }
  0x1c   : > { %1262 = vmatprep.subr.bf16.mxu1 %v1352_v38  ;;  %1238 = vmatprep.subr.bf16.mxu0 %v1353_v39 }
  0x1d   : > { %808 = vrot.lane.b32.xlu0 %v803_v25, %s1402_s22  ;;  %v1393_v25 = vld [vmem:[%s1697_s1 + $0x138] sm:$0xff]  }
  0x1e   : > { %1239 = vmatpush3.bf16.msra.mxu0 %v1355_v41 }
  0x1f   : > { %804 = vrot.lane.b32.xlu1 %v1505_v28, %s1402_s22  ;;  %1263 = vmatpush3.bf16.msra.mxu1 %v1354_v40 }
  0x20   : > { %1264 = vmatprep.subr.bf16.mxu1 %v1356_v42  ;;  %1240 = vmatprep.subr.bf16.mxu0 %v1357_v43 }
  0x22   : > { %1241 = vmatpush3.bf16.msra.mxu0 %v1359_v45 }
  0x23   : > { %1265 = vmatpush3.bf16.msra.mxu1 %v1358_v44  ;;  %1242 = vmatprep.subr.bf16.mxu0 %v1361_v47 }
  0x24   : > { %1294 = vmatprep.subr.bf16.mxu1 %v1360_v46 }
  0x26   : > { %571 = vmatmul.mubr.bf16.vlgmr.msra.gmra.mrb[0].mxu1 %v1475_v9  ;;  %1243 = vmatpush3.bf16.msra.mxu0 %v1363_v49  ;;  %v1371_v9 = vld [vmem:[%s1697_s1 + $0x108] sm:$0xff]  }
  0x27   : > { %1295 = vmatpush3.bf16.msra.mxu1 %v1362_v48  ;;  %1272 = vmatprep.subr.bf16.mxu0 %v1365_v51  ;;  %v1224_v48 = vld [vmem:[%s1698_s2] ss:$0 sm:$0xff]  ;;  %v1403_v51 = vmov (!%p1225_p4), 0.0  }
  0x28   : > { %1296 = vmatprep.subr.bf16.mxu1 %v1364_v50  ;;  %963 = vst [vmem:[%s1700_s4] sm:$0x1] (!%p1225_p4), %v1403_v51  ;;  %964 = vst [vmem:[%s1701_s5] sm:$0x1] (!%p1225_p4), %v1403_v51 }
  0x2b   : > { %1297 = vmatpush3.bf16.msra.mxu1 %v1366_v52 }
  0x2c   : > { %1298 = vmatprep.subr.bf16.mxu1 %v1368_v53 }
  0x2f   : > { %1299 = vmatpush3.bf16.msra.mxu1 %v1370_v54 }
  0x30   : > { %1300 = vmatprep.subr.bf16.mxu1 %v1372_v55 }
  0x33   : > { %1301 = vmatpush3.bf16.msra.mxu1 %v1374_v56 }
  0x34   : > { %1302 = vmatprep.subr.bf16.mxu1 %v1376_v57 }
  0x37   : > { %1303 = vmatpush3.bf16.msra.mxu1 %v1378_v58 }
  0x38   : > { %1304 = vmatprep.subr.bf16.mxu1 %v1380_v59 }
  0x3b   : > { %1305 = vmatpush3.bf16.msra.mxu1 %v1382_v60 }
  0x3c   : > { %1306 = vmatprep.subr.bf16.mxu1 %v1384_v61 }
  0x3f   : > { %1307 = vmatpush3.bf16.msra.mxu1 %v1386_v62 }
  0x40   : > { %1308 = vmatprep.subr.bf16.mxu1 %v1388_v63 }
  0x43   : > { %1309 = vmatpush3.bf16.msra.mxu1 %v1390_v0 }
  0x87   : > { %v298_v1 = vpop.permute.xlu0 %297  ;;  %v296_v2 = vpop.permute.xlu1 %295 }
  0x88   : > { %v302_v7 = vsel %vm301_vm0, %v296_v2, %v298_v1 }
  0x8b   : > { %v300_v3 = vpop.permute.xlu0 %299 }
  0x8c   : > { %v303_v5 = vsel %vm301_vm0, %v298_v1, %v300_v3 }
  0x8d   : > { %434 = vmatprep.mubr.bf16.mxu0 %v303_v5  ;;  %v807_v8 = vpop.permute.xlu1 %806 }
  0x8e   : > { %435 = vmatmul.mubr.bf16.vlgmr.msra.gmra.mrb[0].mxu0 %v302_v7 }
  0x8f   : > { %1273 = vmatpush3.bf16.msra.mxu0 %v1367_v4  ;;  %v809_v10 = vpop.permute.xlu0 %808  ;;  %755 = vmatprep.mubr.bf16.mxu0 %v1495_v24  ;;  %v1392_v24 = vld [vmem:[%s1697_s1 + $0x178] sm:$0xff]  }
  0x90   : > { %1274 = vmatprep.subr.bf16.mxu0 %v1369_v6  ;;  %v811_v12 = vsel %vm301_vm0, %v807_v8, %v809_v10 }
  0x91   : > { %v805_v13 = vpop.permute.xlu1 %804  ;;  %942 = vmatprep.mubr.bf16.mxu1 %v811_v12 }
  0x92   : > { %v810_v14 = vsel %vm301_vm0, %v805_v13, %v807_v8 }
  0x93   : > { %1275 = vmatpush3.bf16.msra.mxu0 %v1371_v9  ;;  %943 = vmatmul.mubr.bf16.vlgmr.msra.gmra.mrb[4].mxu1 %v810_v14 }
  0x94   : > { %1276 = vmatprep.subr.bf16.mxu0 %v1373_v11 }
  0x97   : > { %1277 = vmatpush3.bf16.msra.mxu0 %v1375_v15 }
  0x98   : > { %1278 = vmatprep.subr.bf16.mxu0 %v1377_v16 }
  0x9b   : > { %1279 = vmatpush3.bf16.msra.mxu0 %v1379_v17 }
  0x9c   : > { %1280 = vmatprep.subr.bf16.mxu0 %v1381_v18 }
  0x9f   : > { %1281 = vmatpush3.bf16.msra.mxu0 %v1383_v19 }
  0xa0   : > { %1282 = vmatprep.subr.bf16.mxu0 %v1385_v20 }
  0xa3   : > { %1283 = vmatpush3.bf16.msra.mxu0 %v1387_v21 }
  0xa4   : > { %1284 = vmatprep.subr.bf16.mxu0 %v1389_v22 }
  0xa7   : > { %1285 = vmatpush3.bf16.msra.mxu0 %v1391_v23 }
  0xa8   : > { %1286 = vmatprep.subr.bf16.mxu0 %v1392_v24 }
  0xab   : > { %1287 = vmatpush3.bf16.msra.mxu0 %v1393_v25 }
  0xae   : > { %756 = vmatmul.mubr.bf16.vlgmr.msra.gmra.mrb[4].mxu0 %v1505_v28 }
  0xf9   : > { %v1266_v26 = vpop.f32.mrb[0].mxu1 }
  0xfa   : > { %v1267_v27 = vpop.f32.mrb[1].mxu1 }
  0xfb   : > { %v1268_v29 = vadd.f32 %v1267_v27, %v1266_v26  ;;  %v1269_v30 = vpop.f32.mrb[2].mxu1 }
  0xfc   : > { %v1270_v31 = vpop.f32.mrb[3].mxu1 }
 0x161   : > { %v1244_v32 = vpop.f32.mrb[0].mxu0 }
 0x162   : > { %v1245_v33 = vpop.f32.mrb[1].mxu0 }
 0x163   : > { %v1246_v34 = vadd.f32 %v1245_v33, %v1244_v32  ;;  %v1247_v35 = vpop.f32.mrb[2].mxu0 }
 0x164   : > { %v1248_v36 = vpop.f32.mrb[3].mxu0 }
 0x165   : > { %v573_v37 = vadd.f32 %v1268_v29, %v1246_v34 }
 0x166   : > { %v1310_v38 = vpop.f32.mrb[4].mxu1 }
 0x167   : > { %v1311_v39 = vpop.f32.mrb[5].mxu1 }
 0x168   : > { %v1312_v40 = vadd.f32 %v1311_v39, %v1310_v38  ;;  %v1313_v41 = vpop.f32.mrb[6].mxu1 }
 0x169   : > { %v1314_v42 = vpop.f32.mrb[7].mxu1 }
 0x181   : > { %v1288_v43 = vpop.f32.mrb[4].mxu0 }
 0x182   : > { %v1289_v44 = vpop.f32.mrb[5].mxu0 }
 0x183   : > { %v1290_v45 = vadd.f32 %v1289_v44, %v1288_v43  ;;  %v1291_v28 = vpop.f32.mrb[6].mxu0  ;;  %962 = sbr.rel (%p1225_p4) target bundleno = 394 (0x18a), region = 36 }
 0x184   : > { %v1292_v46 = vpop.f32.mrb[7].mxu0 }
 0x185   : > { %v763_v47 = vadd.f32 %v1290_v45, %v573_v37 }
 0x187   : > { %v950_v49 = vadd.f32 %v1312_v40, %v763_v47 }
 0x189   : > { %v958_v50 = vadd.f32 %v1224_v48, %v950_v49 }
 0x18a PF: > { %vm966_vm1 = vcmask 1043456   ;;  %v965_v1 = vld [vmem:[%s1700_s4] sm:$0x1] }
 0x18b   : > { %v977_v52 = vmul.f32 %v958_v50, %v958_v50  ;;  %v987_v53 = vpack.c.bf16 %v958_v50, %v958_v50  ;;  %v967_v54 = vsel %vm966_vm1, %v958_v50, 0.0  ;;  %v976_v4 = vld [vmem:[%s1701_s5] sm:$0x1] }
 0x18c   : > { %v968_v55 = vrot.slane %v967_v54, 4 }
 0x18d   : > { %v978_v56 = vsel %vm966_vm1, %v977_v52, 0.0  ;;  %988 = vst [vmem:[%s1464_s10] sm:$0x3] %v987_v53 }
 0x18e   : > { %v979_v57 = vrot.slane %v978_v56, 4  ;;  %v969_v58 = vadd.f32 %v968_v55, %v967_v54 }
 0x190   : > { %v980_v59 = vadd.f32 %v979_v57, %v978_v56  ;;  %v970_v60 = vrot.slane %v969_v58, 2 }
 0x192   : > { %v981_v61 = vrot.slane %v980_v59, 2  ;;  %v971_v62 = vadd.f32 %v970_v60, %v969_v58 }
 0x194   : > { %v982_v63 = vadd.f32 %v981_v61, %v980_v59  ;;  %v972_v0 = vrot.slane %v971_v62, 1 }
 0x196   : > { %v983_v2 = vrot.slane %v982_v63, 1  ;;  %v973_v3 = vadd.f32 %v972_v0, %v971_v62 }
 0x198   : > { %v984_v5 = vadd.f32 %v983_v2, %v982_v63  ;;  %v974_v6 = vadd.f32 %v973_v3, %v965_v1 }
 0x19a   : > { %v985_v7 = vadd.f32 %v984_v5, %v976_v4  ;;  %975 = vst [vmem:[%s1700_s4] sm:$0x1] %v974_v6 }
 0x19c   : > { %986 = vst [vmem:[%s1701_s5] sm:$0x1] %v985_v7 }
 0x19d PF: > { %s16_s18 = sadd.s32 1, %s1400_s18  }
 0x19e   : > { %p13_p5 = scmp.ge.s32.totalorder %s16_s18, 4  }
 0x1a0   :  { %15 = sbr.rel (!%p13_p5) target bundleno = 1 (0x1), region = 85 }

// kernel: tile.58
= control target key start
LH: loop header
LB: loop body
LE: loop exit
PB: predicated region body
PF: predicated region fallthrough
CT: control target
= control target key end

     0   :  { %s22_s0 = inlined_call_operand.vmem [shape: f32[32], index: 0, kind: input, shape index: {}]   ;;  %s23_s1 = inlined_call_operand.vmem [shape: f32[4,32], index: 1, kind: output, shape index: {}]  }
   0x1   :  { %v4_v0 = vld [vmem:[%s22_s0] ss:$0 sm:$0xff] }
   0x2   :  { %5 = vst [vmem:[%s23_s1] sm:$0xf] %v4_v0 }

// kernel: tile.59
= control target key start
LH: loop header
LB: loop body
LE: loop exit
PB: predicated region body
PF: predicated region fallthrough
CT: control target
= control target key end

     0   :  { %vm7_vm0 = vcmask 261120   ;;  %s37_s8 = smov 32   ;;  %s38_s9 = smov 64   ;;  %vm13_vm1 = vcmask 1048320   ;;  %vm19_vm2 = vcmask 785920   ;;  %vm25_vm3 = vcmask 523520   ;;  %s55_s0 = inlined_call_operand.vmem [shape: f32[4,32], index: 0, kind: input, shape index: {}]   ;;  %s56_s1 = inlined_call_operand.vmem [shape: f32[1,128], index: 1, kind: output, shape index: {}]  }
   0x1   :  { %v4_v0 = vld [vmem:[%s55_s0] sm:$0xf]  ;;  %s36_s0 = smov 96  }
   0x2   :  { %5 = vst [vmem:[#allocation1] sm:$0xf] %v4_v0 }
   0x9   :  { %v10_v1 = vld [vmem:[#allocation1 + $0x3] sm:$0x1]   ;;  %v22_v2 = vld [vmem:[#allocation1 + $0x1] sm:$0x1]   ;;  %v6_v3 = vld [vmem:[#allocation1] sm:$0x1]  }
   0xa   :  { %11 = vrot.lane.b32.xlu0 %v10_v1, %s36_s0  ;;  %23 = vrot.lane.b32.xlu1 %v22_v2, %s37_s8  ;;  %v16_v4 = vld [vmem:[#allocation1 + $0x2] sm:$0x1]   ;;  %8 = vst.msk [vmem:[#allocation0] sm:$0x1] %vm7_vm0, %v6_v3  }
   0xe   :  { %17 = vrot.lane.b32.xlu0 %v16_v4, %s38_s9 }
  0x7c   :  { %v12_v5 = vpop.permute.xlu0 %11   ;;  %v24_v6 = vpop.permute.xlu1 %23  }
  0x7d   :  { %14 = vst.msk [vmem:[#allocation0] sm:$0x1] %vm13_vm1, %v12_v5  }
  0x80   :  { %v18_v7 = vpop.permute.xlu0 %17  }
  0x81   :  { %20 = vst.msk [vmem:[#allocation0] sm:$0x1] %vm19_vm2, %v18_v7  }
  0x82   :  { %26 = vst.msk [vmem:[#allocation0] sm:$0x1] %vm25_vm3, %v24_v6  }
  0x89   :  { %v30_v8 = vld [vmem:[#allocation0] sm:$0x1] }
  0x8a   :  { %32 = vst [vmem:[%s56_s1] sm:$0x1] %v30_v8 }

// kernel: tile.40
= control target key start
LH: loop header
LB: loop body
LE: loop exit
PB: predicated region body
PF: predicated region fallthrough
CT: control target
= control target key end

     0   :  { %s26_s0 = inlined_call_operand.<no memory space> [shape: f32[], index: 0, kind: input, shape index: {}]   ;;  %s27_s1 = inlined_call_operand.vmem [shape: f32[1,192], index: 1, kind: output, shape index: {}]  }
   0x1   :  { %v2_v0 = vstv %s26_s0 }
   0x2   :  { %3 = vst [vmem:[%s27_s1] sm:$0x1] %v2_v0  ;;  %6 = vst [vmem:[%s27_s1 + $0x1] sm:$0x1] %v2_v0 }

// kernel: _lambda_.10
= control target key start
LH: loop header
LB: loop body
LE: loop exit
PB: predicated region body
PF: predicated region fallthrough
CT: control target
= control target key end

     0   :  { %s3237_s24 = smov 0   ;;  %s3966_s0 = inlined_call_operand.vmem [shape: bf16[2,4,128], index: 0, kind: input, shape index: {}]   ;;  %s3967_s1 = inlined_call_operand.vmem [shape: f32[1,128], index: 1, kind: input, shape index: {}]   ;;  %s3968_s2 = inlined_call_operand.vmem [shape: f32[1,128], index: 2, kind: input, shape index: {}]   ;;  %s3969_s3 = inlined_call_operand.vmem [shape: bf16[16,96,192], index: 3, kind: input, shape index: {}]   ;;  %s3970_s4 = inlined_call_operand.vmem [shape: f32[1,192], index: 4, kind: input, shape index: {}]   ;;  %s3971_s5 = inlined_call_operand.vmem [shape: bf16[2,3,192], index: 5, kind: output, shape index: {0}]   ;;  %s3972_s6 = inlined_call_operand.vmem [shape: f32[1,192], index: 6, kind: output, shape index: {1}]   ;;  %s3973_s7 = inlined_call_operand.vmem [shape: f32[1,192], index: 7, kind: output, shape index: {2}]  }
   0x1 LB: > { %s3243_s25 = sadd.s32 4294967295, %s3187_s24   ;;  %p2478_p0 = scmp.ge.s32.totalorder %s3187_s24, 1  ;;  %s3187_s24 = sphi %s3237_s24, %s18_s24  }
   0x2   : > { %p231_p1 = scmp.lt.s32.totalorder %s3187_s24, 3 }
   0x4   : > { %p232_p2 = pnand %p2478_p0, %p231_p1 }
   0x5   : > { %p262_p3 = scmp.lt.s32.totalorder (!%p232_p2), %s3243_s25, 1  ;;  %v2893_v0 = vld [vmem:[%s3969_s3 + $0x4] ss:$8 sps:$4 sm:$0xff] (!%p232_p2)   ;;  %vm294_vm0 = vcmask (!%p232_p2), 521216   ;;  %v2895_v1 = vld [vmem:[%s3969_s3] ss:$8 sps:$4 sm:$0xff] (!%p232_p2)  }
   0x6   : > { %235 = sbr.rel (%p232_p2) target bundleno = 680 (0x2a8), region = 40  ;;  %v3189_v2 = vmov (!%p232_p2), 0.0   ;;  %504 = vmatprep.subr.bf16.mxu1 (!%p232_p2), %v2893_v0  ;;  %v2896_v3 = vld [vmem:[%s3969_s3 + $0x14] ss:$8 sps:$4 sm:$0xff] (!%p232_p2)   ;;  %v2898_v4 = vld [vmem:[%s3969_s3 + $0x10] ss:$8 sps:$4 sm:$0xff] (!%p232_p2)  }
   0x7   : > { %293 = vst [vmem:[#allocation2] sm:$0x3f] (!%p232_p2), %v3189_v2  ;;  %295 = vst.msk [vmem:[#allocation2 + $0x8] sm:$0x3f] (!%p232_p2), %vm294_vm0, %v3189_v2  ;;  %505 = vmatpush1.bf16.msra.mxu1 (!%p232_p2), %v2895_v1  ;;  %v2899_v5 = vld [vmem:[%s3969_s3 + $0x24] ss:$8 sps:$4 sm:$0xff] (!%p232_p2)  }
   0x8   : > { %506 = vmatprep.subr.bf16.mxu1 (!%p232_p2), %v2896_v3  ;;  %v2482_v7 = vld [vmem:[%s3967_s1] ss:$0 sm:$0xff] (!%p232_p2)  ;;  %v3190_v8 = vmov (!%p232_p2), 0   ;;  %v2902_v13 = vld [vmem:[%s3969_s3 + $0x34] ss:$8 sps:$4 sm:$0xff] (!%p232_p2)   ;;  %s3191_s17 = smov (!%p232_p2), 32  }
   0x9   : > { %536 = vmatprep.mubr.bf16.mxu1 (!%p232_p2), %v3190_v8  ;;  %432 = vmatprep.mubr.bf16.mxu0 (!%p232_p2), %v3190_v8  ;;  %v2483_v10 = vld [vmem:[%s3968_s2] ss:$0 sm:$0xff] (!%p232_p2)  ;;  %v2904_v14 = vld [vmem:[%s3969_s3 + $0x30] ss:$8 sps:$4 sm:$0xff] (!%p232_p2)   ;;  %v2905_v16 = vld [vmem:[%s3969_s3 + $0x44] ss:$8 sps:$4 sm:$0xff] (!%p232_p2)  }
   0xa   : > { %v2901_v11 = vld [vmem:[%s3969_s3 + $0x20] ss:$8 sps:$4 sm:$0xff] (!%p232_p2)   ;;  %v2908_v20 = vld [vmem:[%s3969_s3 + $0x54] ss:$8 sps:$4 sm:$0xff] (!%p232_p2)   ;;  %v2910_v22 = vld [vmem:[%s3969_s3 + $0x50] ss:$8 sps:$4 sm:$0xff] (!%p232_p2)  }
   0xb   : > { %507 = vmatpush1.bf16.msra.mxu1 (!%p232_p2), %v2898_v4  ;;  %v2907_v18 = vld [vmem:[%s3969_s3 + $0x40] ss:$8 sps:$4 sm:$0xff] (!%p232_p2)   ;;  %v2911_v23 = vld [vmem:[%s3969_s3 + $0x64] ss:$8 sps:$4 sm:$0xff] (!%p232_p2)   ;;  %v2914_v25 = vld [vmem:[%s3969_s3 + $0x74] ss:$8 sps:$4 sm:$0xff] (!%p232_p2)  }
   0xc   : > { %508 = vmatprep.subr.bf16.mxu1 (!%p232_p2), %v2899_v5  ;;  %v2913_v24 = vld [vmem:[%s3969_s3 + $0x60] ss:$8 sps:$4 sm:$0xff] (!%p232_p2)   ;;  %400 = vmatprep.subr.bf16.mxu0 (!%p232_p2), %v2911_v23  ;;  %v2922_v26 = vld [vmem:[%s3969_s3 + $0x124] ss:$8 sps:$4 sm:$0xff] (!%p232_p2)   ;;  %v2916_v27 = vld [vmem:[%s3969_s3 + $0x70] ss:$8 sps:$4 sm:$0xff] (!%p232_p2)  }
   0xd   : > { %s263_s28 = scalar_select %p262_p3, %s3243_s25, 1  ;;  %401 = vmatpush1.bf16.msra.mxu0 %v2913_v24  ;;  %v2917_v28 = vld [vmem:[%s3969_s3 + $0x84] ss:$8 sps:$4 sm:$0xff]   ;;  %v2919_v29 = vld [vmem:[%s3969_s3 + $0x80] ss:$8 sps:$4 sm:$0xff]   ;;  %vm301_vm2 = vcmask 1044737  }
   0xe   : > { %402 = vmatprep.subr.bf16.mxu0 %v2914_v25  ;;  %v2923_v30 = vld [vmem:[%s3969_s3 + $0x94] ss:$8 sps:$4 sm:$0xff]   ;;  %v2925_v31 = vld [vmem:[%s3969_s3 + $0x90] ss:$8 sps:$4 sm:$0xff]   ;;  %v2929_v32 = vld [vmem:[%s3969_s3 + $0xa4] ss:$8 sps:$4 sm:$0xff]  }
   0xf   : > { %s2479_s10 = sshll.u32 %s263_s28, 1  ;;  %s2876_s11 = sshll.u32 %s263_s28, 2  ;;  %509 = vmatpush1.bf16.msra.mxu1 %v2901_v11  ;;  %v2931_v33 = vld [vmem:[%s3969_s3 + $0xa0] ss:$8 sps:$4 sm:$0xff]   ;;  %v2935_v34 = vld [vmem:[%s3969_s3 + $0xb4] ss:$8 sps:$4 sm:$0xff]  }
  0x10   : > { %s265_s16 = scalar_lea.vmem %s3966_s0, %s2479_s10  ;;  %s3267_s19 = scalar_lea.vmem %s3971_s5, %s2876_s11  ;;  %510 = vmatprep.subr.bf16.mxu1 %v2902_v13  ;;  %v2937_v35 = vld [vmem:[%s3969_s3 + $0xb0] ss:$8 sps:$4 sm:$0xff]   ;;  %v2943_v36 = vld [vmem:[%s3969_s3 + $0xc4] ss:$8 sps:$4 sm:$0xff]   ;;  %vm303_vm3 = vcmask 258049   ;;  %vm396_vm4 = vcmask 785408  }
  0x11   : > { %v272_v6 = vld [vmem:[%s265_s16] sm:$0x3]  ;;  %403 = vmatpush1.bf16.msra.mxu0 %v2916_v27  ;;  %v2928_v43 = vld [vmem:[%s3969_s3 + $0x134] ss:$8 sps:$4 sm:$0xff]   ;;  %s3192_s13 = smov 64   ;;  %s3193_s14 = smov 96  }
  0x12   : > { %v273_v9 = vunpack.c.l.bf16 %v272_v6  ;;  %404 = vmatprep.subr.bf16.mxu0 %v2917_v28  ;;  %v2920_v42 = vld [vmem:[%s3969_s3 + $0x120] ss:$8 sps:$4 sm:$0xff]   ;;  %v2926_v47 = vld [vmem:[%s3969_s3 + $0x130] ss:$8 sps:$4 sm:$0xff]   ;;  %v2934_v48 = vld [vmem:[%s3969_s3 + $0x144] ss:$8 sps:$4 sm:$0xff]  }
  0x13   : > { %511 = vmatpush1.bf16.msra.mxu1 %v2904_v14  ;;  %v2932_v52 = vld [vmem:[%s3969_s3 + $0x140] ss:$8 sps:$4 sm:$0xff]   ;;  %v2940_v53 = vld [vmem:[%s3969_s3 + $0x154] ss:$8 sps:$4 sm:$0xff]   ;;  %v2938_v56 = vld [vmem:[%s3969_s3 + $0x150] ss:$8 sps:$4 sm:$0xff]  }
  0x14   : > { %v281_v12 = vmul.f32 %v2482_v7, %v273_v9  ;;  %512 = vmatprep.subr.bf16.mxu1 %v2905_v16  ;;  %v2946_v57 = vld [vmem:[%s3969_s3 + $0x164] ss:$8 sps:$4 sm:$0xff]   ;;  %v2944_v58 = vld [vmem:[%s3969_s3 + $0x160] ss:$8 sps:$4 sm:$0xff]   ;;  %v2952_v59 = vld [vmem:[%s3969_s3 + $0x174] ss:$8 sps:$4 sm:$0xff]  }
  0x15   : > { %405 = vmatpush1.bf16.msra.mxu0 %v2919_v29  ;;  %v2950_v61 = vld [vmem:[%s3969_s3 + $0x170] ss:$8 sps:$4 sm:$0xff]   ;;  %v2958_v62 = vld [vmem:[%s3969_s3 + $0x1e4] ss:$8 sps:$4 sm:$0xff]   ;;  %v2941_v6 = vld [vmem:[%s3969_s3 + $0xc0] ss:$8 sps:$4 sm:$0xff]  }
  0x16   : > { %v289_v15 = vadd.f32 %v2483_v10, %v281_v12  ;;  %406 = vmatprep.subr.bf16.mxu0 %v2923_v30  ;;  %v2949_v7 = vld [vmem:[%s3969_s3 + $0xd4] ss:$8 sps:$4 sm:$0xff]   ;;  %v2947_v11 = vld [vmem:[%s3969_s3 + $0xd0] ss:$8 sps:$4 sm:$0xff]   ;;  %v2955_v12 = vld [vmem:[%s3969_s3 + $0xe4] ss:$8 sps:$4 sm:$0xff]  }
  0x17   : > { %513 = vmatpush1.bf16.msra.mxu1 %v2907_v18  ;;  %vm689_vm5 = vcmask 261120   ;;  %v2953_v14 = vld [vmem:[%s3969_s3 + $0xe0] ss:$8 sps:$4 sm:$0xff]   ;;  %v2961_v16 = vld [vmem:[%s3969_s3 + $0xf4] ss:$8 sps:$4 sm:$0xff]   ;;  %vm564_vm6 = vcmask 523264  }
  0x18   : > { %vm290_vm1 = vcmp.ge.f32.partialorder %v289_v15, 0.0  ;;  %v291_v17 = vmul.f32 0.2, %v289_v15  ;;  %514 = vmatprep.subr.bf16.mxu1 %v2908_v20  ;;  %v2967_v23 = vld [vmem:[%s3969_s3 + $0x104] ss:$8 sps:$4 sm:$0xff]   ;;  %p2872_p4 = scmp.ne.s32.totalorder %s3243_s25, 0 }
  0x19   : > { %407 = vmatpush1.bf16.msra.mxu0 %v2925_v31  ;;  %v2970_v24 = vld [vmem:[%s3969_s3 + $0x204] ss:$8 sps:$4 sm:$0xff]   ;;  %v2965_v25 = vld [vmem:[%s3969_s3 + $0x100] ss:$8 sps:$4 sm:$0xff]   ;;  %v2973_v27 = vld [vmem:[%s3969_s3 + $0x114] ss:$8 sps:$4 sm:$0xff]  }
  0x1a   : > { %v292_v19 = vsel %vm290_vm1, %v289_v15, %v291_v17  ;;  %408 = vmatprep.subr.bf16.mxu0 %v2929_v32  ;;  %v2956_v15 = vld [vmem:[%s3969_s3 + $0x1e0] ss:$8 sps:$4 sm:$0xff]   ;;  %v2976_v28 = vld [vmem:[%s3969_s3 + $0x214] ss:$8 sps:$4 sm:$0xff]   ;;  %v2971_v29 = vld [vmem:[%s3969_s3 + $0x110] ss:$8 sps:$4 sm:$0xff]  }
  0x1b   : > { %v297_v21 = vrot.slane %v292_v19, 7  ;;  %515 = vmatpush1.bf16.msra.mxu1 %v2910_v22  ;;  %v2964_v19 = vld [vmem:[%s3969_s3 + $0x1f4] ss:$8 sps:$4 sm:$0xff]   ;;  %v2962_v22 = vld [vmem:[%s3969_s3 + $0x1f0] ss:$8 sps:$4 sm:$0xff]  }
  0x1c   : > { %754 = vmatprep.subr.bf16.mxu1 %v2922_v26  ;;  %v2968_v26 = vld [vmem:[%s3969_s3 + $0x200] ss:$8 sps:$4 sm:$0xff]   ;;  %v2974_v30 = vld [vmem:[%s3969_s3 + $0x210] ss:$8 sps:$4 sm:$0xff]   ;;  %v2979_v31 = vld [vmem:[%s3969_s3 + $0x184] ss:$8 sps:$4 sm:$0xff]  }
  0x1d   : > { %298 = vrot.lane.b32.xlu0 %v297_v21, %s3191_s17  ;;  %409 = vmatpush1.bf16.msra.mxu0 %v2931_v33  ;;  %v2959_v21 = vld [vmem:[%s3969_s3 + $0xf0] ss:$8 sps:$4 sm:$0xff]   ;;  %v2982_v32 = vld [vmem:[%s3969_s3 + $0x224] ss:$8 sps:$4 sm:$0xff]   ;;  %v2977_v33 = vld [vmem:[%s3969_s3 + $0x180] ss:$8 sps:$4 sm:$0xff]  }
  0x1e   : > { %410 = vmatprep.subr.bf16.mxu0 %v2935_v34  ;;  %v2980_v34 = vld [vmem:[%s3969_s3 + $0x220] ss:$8 sps:$4 sm:$0xff]  }
  0x21   : > { %411 = vmatpush1.bf16.msra.mxu0 %v2937_v35  ;;  %v2985_v35 = vld [vmem:[%s3969_s3 + $0x194] ss:$8 sps:$4 sm:$0xff]  }
  0x22   : > { %629 = vmatprep.subr.bf16.mxu0 %v2943_v36 }
  0x8f   : > { %v299_v37 = vpop.permute.xlu0 %298 }
  0x90   : > { %302 = vst.msk [vmem:[#allocation2] sm:$0x1e] %vm301_vm2, %v299_v37 }
  0x91   : > { %304 = vst.msk [vmem:[#allocation2 + $0x8] sm:$0x1e] %vm303_vm3, %v299_v37  ;;  %v2988_v37 = vld [vmem:[%s3969_s3 + $0x234] ss:$8 sps:$4 sm:$0xff]  }
  0x97   : > { %v305_v38 = vld [vmem:[#allocation2] sm:$0x3f] }
  0x98   : > { %v306_v39 = vld [vmem:[#allocation2 + $0x8] sm:$0x3f]  ;;  %v307_v40 = vpack.c.bf16 %v305_v38, %v305_v38  ;;  %v2983_v38 = vld [vmem:[%s3969_s3 + $0x190] ss:$8 sps:$4 sm:$0xff]  }
  0x99   : > { %v545_v41 = vpack.c.bf16 %v306_v39, %v306_v39  ;;  %v2986_v39 = vld [vmem:[%s3969_s3 + $0x230] ss:$8 sps:$4 sm:$0xff]  }
  0x9a   : > { %560 = vrot.lane.b32.xlu1 %v307_v40, %s3192_s13  ;;  %334 = vrot.lane.b32.xlu0 %v307_v40, %s3193_s14  ;;  %v812_v44 = vshll.u32 %v307_v40, 16  ;;  %v810_v49 = vshrl.u32 %v307_v40, 16  ;;  %v3391_v60 = vrot.slane %v307_v40, 1 }
  0x9b   : > { %2521 = vmatmul.mubr.msk.bf16.vlgmr.msra.gmra.mrb[0].mxu1 %vm396_vm4, %v307_v40  ;;  %v1059_v46 = vshll.u32 %v545_v41, 16  ;;  %v1057_v54 = vshrl.u32 %v545_v41, 16  ;;  %v1552_v63 = vrot.slane %v545_v41, 1 }
  0x9c   : > { %v814_v45 = vrot.slane %v812_v44, 1  ;;  %755 = vmatpush1.bf16.msra.mxu1 %v2920_v42  ;;  %786 = vmatprep.mubr.bf16.mxu1 %v3190_v8  ;;  %v1801_v0 = vrot.slane %v810_v49, 1  ;;  %v1802_v1 = vrot.slane %v812_v44, 2  ;;  %v2989_v42 = vld [vmem:[%s3969_s3 + $0x1a0] ss:$8 sps:$4 sm:$0xff]  }
  0x9d   : > { %756 = vmatprep.subr.bf16.mxu1 %v2928_v43  ;;  %v1061_v51 = vrot.slane %v1059_v46, 1  ;;  %v2044_v3 = vrot.slane %v1057_v54, 1  ;;  %v2045_v4 = vrot.slane %v1059_v46, 2  ;;  %v2992_v43 = vld [vmem:[%s3969_s3 + $0x2a0] ss:$8 sps:$4 sm:$0xff]  }
  0x9e   : > { %562 = vrot.lane.b32.xlu1 %v545_v41, %s3192_s13  ;;  %685 = vrot.lane.b32.xlu0 %v307_v40, %s3191_s17  ;;  %v3362_v50 = vor.u32 %v814_v45, %v810_v49  ;;  %v3406_v2 = vor.u32 %v1802_v1, %v1801_v0  ;;  %v2991_v40 = vld [vmem:[%s3969_s3 + $0x1a4] ss:$8 sps:$4 sm:$0xff]   ;;  %v2997_v44 = vld [vmem:[%s3969_s3 + $0x1b4] ss:$8 sps:$4 sm:$0xff]  }
  0x9f   : > { %v1062_v55 = vor.u32 %v1061_v51, %v1057_v54  ;;  %v2046_v5 = vor.u32 %v2045_v4, %v2044_v3  ;;  %v3000_v45 = vld [vmem:[%s3969_s3 + $0x2b4] ss:$8 sps:$4 sm:$0xff]   ;;  %v3003_v49 = vld [vmem:[%s3969_s3 + $0x1c4] ss:$8 sps:$4 sm:$0xff]   ;;  %v3019_v4 = vld [vmem:[%s3969_s3 + $0x250] ss:$8 sps:$4 sm:$0xff]  }
  0xa0   : > { %757 = vmatpush1.bf16.msra.mxu1 %v2926_v47  ;;  %v2995_v47 = vld [vmem:[%s3969_s3 + $0x1b0] ss:$8 sps:$4 sm:$0xff]   ;;  %v3006_v51 = vld [vmem:[%s3969_s3 + $0x2c4] ss:$8 sps:$4 sm:$0xff]   ;;  %v3009_v54 = vld [vmem:[%s3969_s3 + $0x1d4] ss:$8 sps:$4 sm:$0xff]  }
  0xa1   : > { %758 = vmatprep.subr.bf16.mxu1 %v2934_v48  ;;  %v2998_v48 = vld [vmem:[%s3969_s3 + $0x2b0] ss:$8 sps:$4 sm:$0xff]   ;;  %v3024_v3 = vld [vmem:[%s3969_s3 + $0x2f4] ss:$8 sps:$4 sm:$0xff]  }
  0xa2   : > { %687 = vrot.lane.b32.xlu1 %v545_v41, %s3191_s17  ;;  %935 = vrot.lane.b32.xlu0 %v3362_v50, %s3193_s14  ;;  %v2994_v41 = vld [vmem:[%s3969_s3 + $0x2a4] ss:$8 sps:$4 sm:$0xff]  }
  0xa4   : > { %759 = vmatpush1.bf16.msra.mxu1 %v2932_v52  ;;  %v3001_v52 = vld [vmem:[%s3969_s3 + $0x1c0] ss:$8 sps:$4 sm:$0xff]  }
  0xa5   : > { %760 = vmatprep.subr.bf16.mxu1 %v2940_v53  ;;  %v3004_v53 = vld [vmem:[%s3969_s3 + $0x2c0] ss:$8 sps:$4 sm:$0xff]  }
  0xa6   : > { %1063 = vrot.lane.b32.xlu1 %v3362_v50, %s3192_s13  ;;  %1065 = vrot.lane.b32.xlu0 %v1062_v55, %s3192_s13 }
  0xa8   : > { %761 = vmatpush1.bf16.msra.mxu1 %v2938_v56  ;;  %v3007_v56 = vld [vmem:[%s3969_s3 + $0x1d0] ss:$8 sps:$4 sm:$0xff]  }
  0xa9   : > { %762 = vmatprep.subr.bf16.mxu1 %v2946_v57  ;;  %v3010_v57 = vld [vmem:[%s3969_s3 + $0x2d0] ss:$8 sps:$4 sm:$0xff]  }
  0xaa   : > { %1187 = vrot.lane.b32.xlu1 %v3362_v50, %s3191_s17  ;;  %1189 = vrot.lane.b32.xlu0 %v1062_v55, %s3191_s17  ;;  %v3012_v55 = vld [vmem:[%s3969_s3 + $0x2d4] ss:$8 sps:$4 sm:$0xff]  }
  0xac   : > { %763 = vmatpush1.bf16.msra.mxu1 %v2944_v58  ;;  %v3015_v58 = vld [vmem:[%s3969_s3 + $0x244] ss:$8 sps:$4 sm:$0xff]  }
  0xad   : > { %764 = vmatprep.subr.bf16.mxu1 %v2952_v59  ;;  %v3018_v59 = vld [vmem:[%s3969_s3 + $0x2e4] ss:$8 sps:$4 sm:$0xff]  }
  0xae   : > { %1431 = vrot.lane.b32.xlu1 %v3391_v60, %s3193_s14  ;;  %1553 = vrot.lane.b32.xlu0 %v3391_v60, %s3192_s13 }
  0xb0   : > { %765 = vmatpush1.bf16.msra.mxu1 %v2950_v61  ;;  %v3013_v61 = vld [vmem:[%s3969_s3 + $0x240] ss:$8 sps:$4 sm:$0xff]  }
  0xb1   : > { %1000 = vmatprep.subr.bf16.mxu1 %v2958_v62  ;;  %v3016_v62 = vld [vmem:[%s3969_s3 + $0x2e0] ss:$8 sps:$4 sm:$0xff]  }
  0xb2   : > { %1555 = vrot.lane.b32.xlu1 %v1552_v63, %s3192_s13  ;;  %1677 = vrot.lane.b32.xlu0 %v3391_v60, %s3191_s17 }
  0xb6   : > { %1679 = vrot.lane.b32.xlu1 %v1552_v63, %s3191_s17  ;;  %1923 = vrot.lane.b32.xlu0 %v3406_v2, %s3193_s14  ;;  %v3021_v63 = vld [vmem:[%s3969_s3 + $0x254] ss:$8 sps:$4 sm:$0xff]  }
  0xba   : > { %2047 = vrot.lane.b32.xlu1 %v3406_v2, %s3192_s13  ;;  %2049 = vrot.lane.b32.xlu0 %v2046_v5, %s3192_s13 }
  0xbe   : > { %2171 = vrot.lane.b32.xlu1 %v3406_v2, %s3191_s17  ;;  %2173 = vrot.lane.b32.xlu0 %v2046_v5, %s3191_s17  ;;  %v3022_v5 = vld [vmem:[%s3969_s3 + $0x2f0] ss:$8 sps:$4 sm:$0xff]  }
 0x10c   : > { %v561_v9 = vpop.permute.xlu1 %560  ;;  %v335_v10 = vpop.permute.xlu0 %334 }
 0x10d   : > { %2508 = vmatmul.mubr.msk.bf16.vlgmr.msra.gmra.mrb[0].mxu0 %vm396_vm4, %v335_v10  ;;  %v3025_v10 = vld [vmem:[%s3969_s3 + $0x260] ss:$8 sps:$4 sm:$0xff]  }
 0x10e   : > { %630 = vmatpush1.bf16.msra.mxu0 %v2941_v6  ;;  %661 = vmatprep.mubr.bf16.mxu0 %v3190_v8  ;;  %v3027_v6 = vld [vmem:[%s3969_s3 + $0x264] ss:$8 sps:$4 sm:$0xff]  }
 0x10f   : > { %631 = vmatprep.subr.bf16.mxu0 %v2949_v7 }
 0x110   : > { %v563_v13 = vpop.permute.xlu1 %562  ;;  %v686_v17 = vpop.permute.xlu0 %685 }
 0x111   : > { %v565_v36 = vsel %vm564_vm6, %v561_v9, %v563_v13  ;;  %v3036_v13 = vld [vmem:[%s3969_s3 + $0x374] ss:$8 sps:$4 sm:$0xff]  }
 0x112   : > { %632 = vmatpush1.bf16.msra.mxu0 %v2947_v11  ;;  %v3028_v11 = vld [vmem:[%s3969_s3 + $0x360] ss:$8 sps:$4 sm:$0xff]  }
 0x113   : > { %633 = vmatprep.subr.bf16.mxu0 %v2955_v12  ;;  %v3033_v12 = vld [vmem:[%s3969_s3 + $0x274] ss:$8 sps:$4 sm:$0xff]  }
 0x114   : > { %v688_v18 = vpop.permute.xlu1 %687  ;;  %v936_v46 = vpop.permute.xlu0 %935 }
 0x115   : > { %v690_v20 = vsel %vm689_vm5, %v686_v17, %v688_v18  ;;  %v3039_v17 = vld [vmem:[%s3969_s3 + $0x284] ss:$8 sps:$4 sm:$0xff]  }
 0x116   : > { %634 = vmatpush1.bf16.msra.mxu0 %v2953_v14  ;;  %2571 = vmatmul.mubr.msk.bf16.vlgmr.msra.gmra.mrb[4].mxu1 %vm396_vm4, %v690_v20  ;;  %v3042_v18 = vld [vmem:[%s3969_s3 + $0x384] ss:$8 sps:$4 sm:$0xff]   ;;  %v3040_v20 = vld [vmem:[%s3969_s3 + $0x380] ss:$8 sps:$4 sm:$0xff]  }
 0x117   : > { %1001 = vmatpush1.bf16.msra.mxu1 %v2956_v15  ;;  %635 = vmatprep.subr.bf16.mxu0 %v2961_v16  ;;  %v3031_v15 = vld [vmem:[%s3969_s3 + $0x270] ss:$8 sps:$4 sm:$0xff]  }
 0x118   : > { %1002 = vmatprep.subr.bf16.mxu1 %v2964_v19  ;;  %1032 = vmatprep.mubr.bf16.mxu1 %v3190_v8  ;;  %v1064_v0 = vpop.permute.xlu1 %1063  ;;  %v1066_v1 = vpop.permute.xlu0 %1065  ;;  %v3034_v16 = vld [vmem:[%s3969_s3 + $0x370] ss:$8 sps:$4 sm:$0xff]   ;;  %v3037_v19 = vld [vmem:[%s3969_s3 + $0x280] ss:$8 sps:$4 sm:$0xff]  }
 0x11a   : > { %636 = vmatpush1.bf16.msra.mxu0 %v2959_v21  ;;  %v3045_v21 = vld [vmem:[%s3969_s3 + $0x294] ss:$8 sps:$4 sm:$0xff]  }
 0x11b   : > { %1003 = vmatpush1.bf16.msra.mxu1 %v2962_v22  ;;  %637 = vmatprep.subr.bf16.mxu0 %v2967_v23  ;;  %v3048_v22 = vld [vmem:[%s3969_s3 + $0x394] ss:$8 sps:$4 sm:$0xff]   ;;  %v3043_v23 = vld [vmem:[%s3969_s3 + $0x290] ss:$8 sps:$4 sm:$0xff]  }
 0x11c   : > { %1004 = vmatprep.subr.bf16.mxu1 %v2970_v24  ;;  %v1188_v7 = vpop.permute.xlu1 %1187  ;;  %v1190_v9 = vpop.permute.xlu0 %1189  ;;  %v3046_v24 = vld [vmem:[%s3969_s3 + $0x390] ss:$8 sps:$4 sm:$0xff]  }
 0x11d   : > { %v1191_v14 = vsel %vm689_vm5, %v1188_v7, %v1190_v9  ;;  %v3105_v7 = vld [vmem:[%s3969_s3 + $0x3f4] ss:$8 sps:$4 sm:$0xff]  }
 0x11e   : > { %638 = vmatpush1.bf16.msra.mxu0 %v2965_v25  ;;  %v3051_v25 = vld [vmem:[%s3969_s3 + $0x304] ss:$8 sps:$4 sm:$0xff]  }
 0x11f   : > { %1005 = vmatpush1.bf16.msra.mxu1 %v2968_v26  ;;  %639 = vmatprep.subr.bf16.mxu0 %v2973_v27  ;;  %v3054_v26 = vld [vmem:[%s3969_s3 + $0x3a4] ss:$8 sps:$4 sm:$0xff]   ;;  %v3049_v27 = vld [vmem:[%s3969_s3 + $0x300] ss:$8 sps:$4 sm:$0xff]  }
 0x120   : > { %1006 = vmatprep.subr.bf16.mxu1 %v2976_v28  ;;  %v3052_v28 = vld [vmem:[%s3969_s3 + $0x3a0] ss:$8 sps:$4 sm:$0xff]  }
 0x122   : > { %640 = vmatpush1.bf16.msra.mxu0 %v2971_v29  ;;  %v3057_v29 = vld [vmem:[%s3969_s3 + $0x314] ss:$8 sps:$4 sm:$0xff]  }
 0x123   : > { %1007 = vmatpush1.bf16.msra.mxu1 %v2974_v30  ;;  %879 = vmatprep.subr.bf16.mxu0 %v2979_v31  ;;  %v1067_v30 = vsel %vm564_vm6, %v1064_v0, %v1066_v1  ;;  %v3060_v31 = vld [vmem:[%s3969_s3 + $0x3b4] ss:$8 sps:$4 sm:$0xff]   ;;  %v3094_v0 = vld [vmem:[%s3969_s3 + $0x470] ss:$8 sps:$4 sm:$0xff]  }
 0x124   : > { %1008 = vmatprep.subr.bf16.mxu1 %v2982_v32  ;;  %v3055_v32 = vld [vmem:[%s3969_s3 + $0x310] ss:$8 sps:$4 sm:$0xff]  }
 0x125   : > { %2546 = vmatmul.mubr.msk.bf16.vlgmr.msra.gmra.mrb[4].mxu0 %vm396_vm4, %v565_v36  ;;  %v3061_v36 = vld [vmem:[%s3969_s3 + $0x320] ss:$8 sps:$4 sm:$0xff]  }
 0x126   : > { %880 = vmatpush1.bf16.msra.mxu0 %v2977_v33  ;;  %911 = vmatprep.mubr.bf16.mxu0 %v3190_v8  ;;  %v3058_v33 = vld [vmem:[%s3969_s3 + $0x3b0] ss:$8 sps:$4 sm:$0xff]  }
 0x127   : > { %1009 = vmatpush1.bf16.msra.mxu1 %v2980_v34  ;;  %881 = vmatprep.subr.bf16.mxu0 %v2985_v35  ;;  %v3063_v34 = vld [vmem:[%s3969_s3 + $0x324] ss:$8 sps:$4 sm:$0xff]  }
 0x128   : > { %1010 = vmatprep.subr.bf16.mxu1 %v2988_v37  ;;  %v3066_v35 = vld [vmem:[%s3969_s3 + $0x424] ss:$8 sps:$4 sm:$0xff]   ;;  %v3064_v37 = vld [vmem:[%s3969_s3 + $0x420] ss:$8 sps:$4 sm:$0xff]  }
 0x12a   : > { %882 = vmatpush1.bf16.msra.mxu0 %v2983_v38  ;;  %v3069_v38 = vld [vmem:[%s3969_s3 + $0x334] ss:$8 sps:$4 sm:$0xff]  }
 0x12b   : > { %1011 = vmatpush1.bf16.msra.mxu1 %v2986_v39  ;;  %883 = vmatprep.subr.bf16.mxu0 %v2991_v40  ;;  %v3072_v39 = vld [vmem:[%s3969_s3 + $0x434] ss:$8 sps:$4 sm:$0xff]   ;;  %v1432_v40 = vpop.permute.xlu1 %1431 }
 0x12c   : > { %1255 = vmatprep.subr.bf16.mxu1 %v2994_v41  ;;  %v3067_v41 = vld [vmem:[%s3969_s3 + $0x330] ss:$8 sps:$4 sm:$0xff]  }
 0x12e   : > { %884 = vmatpush1.bf16.msra.mxu0 %v2989_v42  ;;  %2621 = vmatmul.mubr.msk.bf16.vlgmr.msra.gmra.mrb[8].mxu1 %vm396_vm4, %v936_v46  ;;  %v3070_v42 = vld [vmem:[%s3969_s3 + $0x430] ss:$8 sps:$4 sm:$0xff]   ;;  %v3076_v46 = vld [vmem:[%s3969_s3 + $0x440] ss:$8 sps:$4 sm:$0xff]  }
 0x12f   : > { %1256 = vmatpush1.bf16.msra.mxu1 %v2992_v43  ;;  %885 = vmatprep.subr.bf16.mxu0 %v2997_v44  ;;  %v3075_v43 = vld [vmem:[%s3969_s3 + $0x344] ss:$8 sps:$4 sm:$0xff]  }
 0x130   : > { %1257 = vmatprep.subr.bf16.mxu1 %v3000_v45  ;;  %1287 = vmatprep.mubr.bf16.mxu1 %v3190_v8  ;;  %v3078_v44 = vld [vmem:[%s3969_s3 + $0x444] ss:$8 sps:$4 sm:$0xff]   ;;  %v3073_v45 = vld [vmem:[%s3969_s3 + $0x340] ss:$8 sps:$4 sm:$0xff]  }
 0x132   : > { %886 = vmatpush1.bf16.msra.mxu0 %v2995_v47  ;;  %v3081_v47 = vld [vmem:[%s3969_s3 + $0x354] ss:$8 sps:$4 sm:$0xff]  }
 0x133   : > { %1258 = vmatpush1.bf16.msra.mxu1 %v2998_v48  ;;  %887 = vmatprep.subr.bf16.mxu0 %v3003_v49  ;;  %v3084_v48 = vld [vmem:[%s3969_s3 + $0x454] ss:$8 sps:$4 sm:$0xff]   ;;  %v3079_v49 = vld [vmem:[%s3969_s3 + $0x350] ss:$8 sps:$4 sm:$0xff]  }
 0x134   : > { %1259 = vmatprep.subr.bf16.mxu1 %v3006_v51  ;;  %v3082_v51 = vld [vmem:[%s3969_s3 + $0x450] ss:$8 sps:$4 sm:$0xff]  }
 0x136   : > { %888 = vmatpush1.bf16.msra.mxu0 %v3001_v52  ;;  %v3087_v52 = vld [vmem:[%s3969_s3 + $0x3c4] ss:$8 sps:$4 sm:$0xff]  }
 0x137   : > { %1260 = vmatpush1.bf16.msra.mxu1 %v3004_v53  ;;  %889 = vmatprep.subr.bf16.mxu0 %v3009_v54  ;;  %v3090_v53 = vld [vmem:[%s3969_s3 + $0x464] ss:$8 sps:$4 sm:$0xff]   ;;  %v3085_v54 = vld [vmem:[%s3969_s3 + $0x3c0] ss:$8 sps:$4 sm:$0xff]  }
 0x138   : > { %1261 = vmatprep.subr.bf16.mxu1 %v3012_v55  ;;  %v3088_v55 = vld [vmem:[%s3969_s3 + $0x460] ss:$8 sps:$4 sm:$0xff]  }
 0x13a   : > { %890 = vmatpush1.bf16.msra.mxu0 %v3007_v56  ;;  %v3093_v56 = vld [vmem:[%s3969_s3 + $0x3d4] ss:$8 sps:$4 sm:$0xff]  }
 0x13b   : > { %1262 = vmatpush1.bf16.msra.mxu1 %v3010_v57  ;;  %1131 = vmatprep.subr.bf16.mxu0 %v3015_v58  ;;  %v1556_v57 = vpop.permute.xlu1 %1555  ;;  %v3096_v58 = vld [vmem:[%s3969_s3 + $0x474] ss:$8 sps:$4 sm:$0xff]  }
 0x13c   : > { %1263 = vmatprep.subr.bf16.mxu1 %v3018_v59  ;;  %v1554_v59 = vpop.permute.xlu0 %1553 }
 0x13d   : > { %2596 = vmatmul.mubr.msk.bf16.vlgmr.msra.gmra.mrb[8].mxu0 %vm396_vm4, %v3362_v50  ;;  %v3030_v50 = vld [vmem:[%s3969_s3 + $0x364] ss:$8 sps:$4 sm:$0xff]  }
 0x13e   : > { %1132 = vmatpush1.bf16.msra.mxu0 %v3013_v61  ;;  %1163 = vmatprep.mubr.bf16.mxu0 %v3190_v8 }
 0x13f   : > { %1264 = vmatpush1.bf16.msra.mxu1 %v3016_v62  ;;  %1133 = vmatprep.subr.bf16.mxu0 %v3021_v63  ;;  %v3091_v62 = vld [vmem:[%s3969_s3 + $0x3d0] ss:$8 sps:$4 sm:$0xff]  }
 0x140   : > { %1265 = vmatprep.subr.bf16.mxu1 %v3024_v3  ;;  %v3102_v3 = vld [vmem:[%s3969_s3 + $0x4e4] ss:$8 sps:$4 sm:$0xff]   ;;  %v1678_v9 = vpop.permute.xlu0 %1677 }
 0x142   : > { %1134 = vmatpush1.bf16.msra.mxu0 %v3019_v4 }
 0x143   : > { %1266 = vmatpush1.bf16.msra.mxu1 %v3022_v5  ;;  %1135 = vmatprep.subr.bf16.mxu0 %v3027_v6  ;;  %v1680_v5 = vpop.permute.xlu1 %1679  ;;  %v3097_v6 = vld [vmem:[%s3969_s3 + $0x3e0] ss:$8 sps:$4 sm:$0xff]  }
 0x144   : > { %1496 = vmatprep.subr.bf16.mxu1 %v3030_v50  ;;  %v3100_v50 = vld [vmem:[%s3969_s3 + $0x4e0] ss:$8 sps:$4 sm:$0xff]  }
 0x146   : > { %1136 = vmatpush1.bf16.msra.mxu0 %v3025_v10  ;;  %2671 = vmatmul.mubr.msk.bf16.vlgmr.msra.gmra.mrb[12].mxu1 %vm396_vm4, %v1191_v14  ;;  %v3108_v10 = vld [vmem:[%s3969_s3 + $0x4f4] ss:$8 sps:$4 sm:$0xff]   ;;  %v3111_v14 = vld [vmem:[%s3969_s3 + $0x404] ss:$8 sps:$4 sm:$0xff]  }
 0x147   : > { %1497 = vmatpush1.bf16.msra.mxu1 %v3028_v11  ;;  %1137 = vmatprep.subr.bf16.mxu0 %v3033_v12  ;;  %v1681_v11 = vsel %vm689_vm5, %v1678_v9, %v1680_v5  ;;  %v3103_v12 = vld [vmem:[%s3969_s3 + $0x3f0] ss:$8 sps:$4 sm:$0xff]   ;;  %v3180_v5 = vld [vmem:[%s3969_s3 + $0x594] ss:$8 sps:$4 sm:$0xff]  }
 0x148   : > { %1498 = vmatprep.subr.bf16.mxu1 %v3036_v13  ;;  %1528 = vmatprep.mubr.bf16.mxu1 %v3190_v8  ;;  %v3106_v13 = vld [vmem:[%s3969_s3 + $0x4f0] ss:$8 sps:$4 sm:$0xff]  }
 0x14a   : > { %1138 = vmatpush1.bf16.msra.mxu0 %v3031_v15  ;;  %v3114_v15 = vld [vmem:[%s3969_s3 + $0x504] ss:$8 sps:$4 sm:$0xff]  }
 0x14b   : > { %1499 = vmatpush1.bf16.msra.mxu1 %v3034_v16  ;;  %1139 = vmatprep.subr.bf16.mxu0 %v3039_v17  ;;  %v3109_v16 = vld [vmem:[%s3969_s3 + $0x400] ss:$8 sps:$4 sm:$0xff]  }
 0x14c   : > { %1500 = vmatprep.subr.bf16.mxu1 %v3042_v18  ;;  %v3112_v17 = vld [vmem:[%s3969_s3 + $0x500] ss:$8 sps:$4 sm:$0xff]   ;;  %v3117_v18 = vld [vmem:[%s3969_s3 + $0x414] ss:$8 sps:$4 sm:$0xff]  }
 0x14e   : > { %1140 = vmatpush1.bf16.msra.mxu0 %v3037_v19  ;;  %v3120_v19 = vld [vmem:[%s3969_s3 + $0x514] ss:$8 sps:$4 sm:$0xff]  }
 0x14f   : > { %1501 = vmatpush1.bf16.msra.mxu1 %v3040_v20  ;;  %1141 = vmatprep.subr.bf16.mxu0 %v3045_v21  ;;  %v3115_v20 = vld [vmem:[%s3969_s3 + $0x410] ss:$8 sps:$4 sm:$0xff]  }
 0x150   : > { %1502 = vmatprep.subr.bf16.mxu1 %v3048_v22  ;;  %v3118_v21 = vld [vmem:[%s3969_s3 + $0x510] ss:$8 sps:$4 sm:$0xff]   ;;  %v3123_v22 = vld [vmem:[%s3969_s3 + $0x484] ss:$8 sps:$4 sm:$0xff]  }
 0x152   : > { %1142 = vmatpush1.bf16.msra.mxu0 %v3043_v23  ;;  %v3126_v23 = vld [vmem:[%s3969_s3 + $0x524] ss:$8 sps:$4 sm:$0xff]  }
 0x153   : > { %1503 = vmatpush1.bf16.msra.mxu1 %v3046_v24  ;;  %1375 = vmatprep.subr.bf16.mxu0 %v3051_v25  ;;  %v3121_v24 = vld [vmem:[%s3969_s3 + $0x480] ss:$8 sps:$4 sm:$0xff]  }
 0x154   : > { %1504 = vmatprep.subr.bf16.mxu1 %v3054_v26  ;;  %v3124_v25 = vld [vmem:[%s3969_s3 + $0x520] ss:$8 sps:$4 sm:$0xff]   ;;  %v3129_v26 = vld [vmem:[%s3969_s3 + $0x494] ss:$8 sps:$4 sm:$0xff]  }
 0x155   : > { %2646 = vmatmul.mubr.msk.bf16.vlgmr.msra.gmra.mrb[12].mxu0 %vm396_vm4, %v1067_v30  ;;  %v3130_v30 = vld [vmem:[%s3969_s3 + $0x530] ss:$8 sps:$4 sm:$0xff]  }
 0x156   : > { %1376 = vmatpush1.bf16.msra.mxu0 %v3049_v27  ;;  %1407 = vmatprep.mubr.bf16.mxu0 %v3190_v8  ;;  %v1557_v27 = vsel %vm564_vm6, %v1554_v59, %v1556_v57  ;;  %v3163_v57 = vld [vmem:[%s3969_s3 + $0x550] ss:$8 sps:$4 sm:$0xff]   ;;  %v3171_v59 = vld [vmem:[%s3969_s3 + $0x564] ss:$8 sps:$4 sm:$0xff]  }
 0x157   : > { %1505 = vmatpush1.bf16.msra.mxu1 %v3052_v28  ;;  %1377 = vmatprep.subr.bf16.mxu0 %v3057_v29  ;;  %v3132_v28 = vld [vmem:[%s3969_s3 + $0x534] ss:$8 sps:$4 sm:$0xff]   ;;  %v3127_v29 = vld [vmem:[%s3969_s3 + $0x490] ss:$8 sps:$4 sm:$0xff]  }
 0x158   : > { %1506 = vmatprep.subr.bf16.mxu1 %v3060_v31  ;;  %v3135_v31 = vld [vmem:[%s3969_s3 + $0x4a4] ss:$8 sps:$4 sm:$0xff]  }
 0x15a   : > { %1378 = vmatpush1.bf16.msra.mxu0 %v3055_v32  ;;  %v3138_v32 = vld [vmem:[%s3969_s3 + $0x5a4] ss:$8 sps:$4 sm:$0xff]  }
 0x15b   : > { %1507 = vmatpush1.bf16.msra.mxu1 %v3058_v33  ;;  %1379 = vmatprep.subr.bf16.mxu0 %v3063_v34  ;;  %v3133_v33 = vld [vmem:[%s3969_s3 + $0x4a0] ss:$8 sps:$4 sm:$0xff]  }
 0x15c   : > { %1745 = vmatprep.subr.bf16.mxu1 %v3066_v35  ;;  %v3136_v34 = vld [vmem:[%s3969_s3 + $0x5a0] ss:$8 sps:$4 sm:$0xff]   ;;  %v3141_v35 = vld [vmem:[%s3969_s3 + $0x4b4] ss:$8 sps:$4 sm:$0xff]  }
 0x15e   : > { %1380 = vmatpush1.bf16.msra.mxu0 %v3061_v36  ;;  %2721 = vmatmul.mubr.msk.bf16.vlgmr.msra.gmra.mrb[16].mxu1 %vm396_vm4, %v1432_v40  ;;  %v3144_v36 = vld [vmem:[%s3969_s3 + $0x5b4] ss:$8 sps:$4 sm:$0xff]   ;;  %v3147_v40 = vld [vmem:[%s3969_s3 + $0x4c4] ss:$8 sps:$4 sm:$0xff]  }
 0x15f   : > { %1746 = vmatpush1.bf16.msra.mxu1 %v3064_v37  ;;  %1381 = vmatprep.subr.bf16.mxu0 %v3069_v38  ;;  %v1924_v37 = vpop.permute.xlu0 %1923  ;;  %v3139_v38 = vld [vmem:[%s3969_s3 + $0x4b0] ss:$8 sps:$4 sm:$0xff]  }
 0x160   : > { %1747 = vmatprep.subr.bf16.mxu1 %v3072_v39  ;;  %1777 = vmatprep.mubr.bf16.mxu1 %v3190_v8  ;;  %v3142_v39 = vld [vmem:[%s3969_s3 + $0x5b0] ss:$8 sps:$4 sm:$0xff]  }
 0x162   : > { %1382 = vmatpush1.bf16.msra.mxu0 %v3067_v41  ;;  %v3150_v41 = vld [vmem:[%s3969_s3 + $0x5c4] ss:$8 sps:$4 sm:$0xff]  }
 0x163   : > { %1748 = vmatpush1.bf16.msra.mxu1 %v3070_v42  ;;  %1383 = vmatprep.subr.bf16.mxu0 %v3075_v43  ;;  %v3145_v42 = vld [vmem:[%s3969_s3 + $0x4c0] ss:$8 sps:$4 sm:$0xff]  }
 0x164   : > { %1749 = vmatprep.subr.bf16.mxu1 %v3078_v44  ;;  %v3148_v43 = vld [vmem:[%s3969_s3 + $0x5c0] ss:$8 sps:$4 sm:$0xff]   ;;  %v3153_v44 = vld [vmem:[%s3969_s3 + $0x4d4] ss:$8 sps:$4 sm:$0xff]  }
 0x166   : > { %1384 = vmatpush1.bf16.msra.mxu0 %v3073_v45  ;;  %v3156_v45 = vld [vmem:[%s3969_s3 + $0x5d4] ss:$8 sps:$4 sm:$0xff]  }
 0x167   : > { %1750 = vmatpush1.bf16.msra.mxu1 %v3076_v46  ;;  %1385 = vmatprep.subr.bf16.mxu0 %v3081_v47  ;;  %v3151_v46 = vld [vmem:[%s3969_s3 + $0x4d0] ss:$8 sps:$4 sm:$0xff]  }
 0x168   : > { %1751 = vmatprep.subr.bf16.mxu1 %v3084_v48  ;;  %v3154_v47 = vld [vmem:[%s3969_s3 + $0x5d0] ss:$8 sps:$4 sm:$0xff]   ;;  %v3159_v48 = vld [vmem:[%s3969_s3 + $0x544] ss:$8 sps:$4 sm:$0xff]  }
 0x16a   : > { %1386 = vmatpush1.bf16.msra.mxu0 %v3079_v49  ;;  %v3162_v49 = vld [vmem:[%s3969_s3 + $0x5e4] ss:$8 sps:$4 sm:$0xff]  }
 0x16b   : > { %1752 = vmatpush1.bf16.msra.mxu1 %v3082_v51  ;;  %1621 = vmatprep.subr.bf16.mxu0 %v3087_v52  ;;  %v3157_v51 = vld [vmem:[%s3969_s3 + $0x540] ss:$8 sps:$4 sm:$0xff]  }
 0x16c   : > { %1753 = vmatprep.subr.bf16.mxu1 %v3090_v53  ;;  %v3160_v52 = vld [vmem:[%s3969_s3 + $0x5e0] ss:$8 sps:$4 sm:$0xff]   ;;  %v3165_v53 = vld [vmem:[%s3969_s3 + $0x554] ss:$8 sps:$4 sm:$0xff]  }
 0x16d   : > { %2696 = vmatmul.mubr.msk.bf16.vlgmr.msra.gmra.mrb[16].mxu0 %vm396_vm4, %v3391_v60  ;;  %v3099_v60 = vld [vmem:[%s3969_s3 + $0x3e4] ss:$8 sps:$4 sm:$0xff]  }
 0x16e   : > { %v3728_v61 = vpop.f32.mrb[0].mxu1  ;;  %1622 = vmatpush1.bf16.msra.mxu0 %v3085_v54  ;;  %1653 = vmatprep.mubr.bf16.mxu0 %v3190_v8  ;;  %v2048_v54 = vpop.permute.xlu1 %2047 }
 0x16f   : > { %v3734_v63 = vpop.f32.mrb[1].mxu1  ;;  %1754 = vmatpush1.bf16.msra.mxu1 %v3088_v55  ;;  %1623 = vmatprep.subr.bf16.mxu0 %v3093_v56  ;;  %v2050_v55 = vpop.permute.xlu0 %2049  ;;  %v3168_v56 = vld [vmem:[%s3969_s3 + $0x5f4] ss:$8 sps:$4 sm:$0xff]  }
 0x170   : > { %v542_v1 = vpop.f32.mrb[2].mxu1  ;;  %1755 = vmatprep.subr.bf16.mxu1 %v3096_v58  ;;  %v3166_v58 = vld [vmem:[%s3969_s3 + $0x5f0] ss:$8 sps:$4 sm:$0xff]  }
 0x171   : > { %v543_v4 = vpop.f32.mrb[3].mxu1  ;;  %v3172_v1 = vld [vmem:[%s3969_s3 + $0x570] ss:$8 sps:$4 sm:$0xff]  }
 0x172   : > { %1624 = vmatpush1.bf16.msra.mxu0 %v3091_v62  ;;  %v2172_v62 = vpop.permute.xlu1 %2171  ;;  %v3175_v4 = vld [vmem:[%s3969_s3 + $0x580] ss:$8 sps:$4 sm:$0xff]  }
 0x173   : > { %1756 = vmatpush1.bf16.msra.mxu1 %v3094_v0  ;;  %1625 = vmatprep.subr.bf16.mxu0 %v3099_v60  ;;  %v3169_v0 = vld [vmem:[%s3969_s3 + $0x560] ss:$8 sps:$4 sm:$0xff]  }
 0x174   : > { %1988 = vmatprep.subr.bf16.mxu1 %v3102_v3  ;;  %v3177_v3 = vld [vmem:[%s3969_s3 + $0x584] ss:$8 sps:$4 sm:$0xff]  }
 0x176   : > { %1626 = vmatpush1.bf16.msra.mxu0 %v3097_v6  ;;  %2771 = vmatmul.mubr.msk.bf16.vlgmr.msra.gmra.mrb[20].mxu1 %vm396_vm4, %v1681_v11  ;;  %v3178_v6 = vld [vmem:[%s3969_s3 + $0x590] ss:$8 sps:$4 sm:$0xff]  }
 0x177   : > { %1989 = vmatpush1.bf16.msra.mxu1 %v3100_v50  ;;  %1627 = vmatprep.subr.bf16.mxu0 %v3105_v7  ;;  %v2051_v50 = vsel %vm564_vm6, %v2048_v54, %v2050_v55 }
 0x178   : > { %1990 = vmatprep.subr.bf16.mxu1 %v3108_v10  ;;  %2020 = vmatprep.mubr.bf16.mxu1 %v3190_v8 }
 0x17a   : > { %1628 = vmatpush1.bf16.msra.mxu0 %v3103_v12 }
 0x17b   : > { %1991 = vmatpush1.bf16.msra.mxu1 %v3106_v13  ;;  %1629 = vmatprep.subr.bf16.mxu0 %v3111_v14 }
 0x17c   : > { %1992 = vmatprep.subr.bf16.mxu1 %v3114_v15 }
 0x17e   : > { %1630 = vmatpush1.bf16.msra.mxu0 %v3109_v16 }
 0x17f   : > { %1993 = vmatpush1.bf16.msra.mxu1 %v3112_v17  ;;  %1631 = vmatprep.subr.bf16.mxu0 %v3117_v18 }
 0x180   : > { %1994 = vmatprep.subr.bf16.mxu1 %v3120_v19 }
 0x182   : > { %1632 = vmatpush1.bf16.msra.mxu0 %v3115_v20 }
 0x183   : > { %1995 = vmatpush1.bf16.msra.mxu1 %v3118_v21  ;;  %1867 = vmatprep.subr.bf16.mxu0 %v3123_v22 }
 0x184   : > { %1996 = vmatprep.subr.bf16.mxu1 %v3126_v23 }
 0x185   : > { %2746 = vmatmul.mubr.msk.bf16.vlgmr.msra.gmra.mrb[20].mxu0 %vm396_vm4, %v1557_v27 }
 0x186   : > { %1868 = vmatpush1.bf16.msra.mxu0 %v3121_v24  ;;  %1899 = vmatprep.mubr.bf16.mxu0 %v3190_v8 }
 0x187   : > { %1997 = vmatpush1.bf16.msra.mxu1 %v3124_v25  ;;  %1869 = vmatprep.subr.bf16.mxu0 %v3129_v26 }
 0x188   : > { %1998 = vmatprep.subr.bf16.mxu1 %v3132_v28 }
 0x18a   : > { %1870 = vmatpush1.bf16.msra.mxu0 %v3127_v29 }
 0x18b   : > { %1999 = vmatpush1.bf16.msra.mxu1 %v3130_v30  ;;  %1871 = vmatprep.subr.bf16.mxu0 %v3135_v31 }
 0x18c   : > { %2239 = vmatprep.subr.bf16.mxu1 %v3138_v32 }
 0x18e   : > { %1872 = vmatpush1.bf16.msra.mxu0 %v3133_v33  ;;  %2821 = vmatmul.mubr.msk.bf16.vlgmr.msra.gmra.mrb[24].mxu1 %vm396_vm4, %v1924_v37 }
 0x18f   : > { %2240 = vmatpush1.bf16.msra.mxu1 %v3136_v34  ;;  %1873 = vmatprep.subr.bf16.mxu0 %v3141_v35 }
 0x190   : > { %2241 = vmatprep.subr.bf16.mxu1 %v3144_v36  ;;  %2271 = vmatprep.mubr.bf16.mxu1 %v3190_v8 }
 0x192   : > { %1874 = vmatpush1.bf16.msra.mxu0 %v3139_v38 }
 0x193   : > { %2242 = vmatpush1.bf16.msra.mxu1 %v3142_v39  ;;  %1875 = vmatprep.subr.bf16.mxu0 %v3147_v40 }
 0x194   : > { %2243 = vmatprep.subr.bf16.mxu1 %v3150_v41 }
 0x196   : > { %1876 = vmatpush1.bf16.msra.mxu0 %v3145_v42 }
 0x197   : > { %2244 = vmatpush1.bf16.msra.mxu1 %v3148_v43  ;;  %1877 = vmatprep.subr.bf16.mxu0 %v3153_v44 }
 0x198   : > { %2245 = vmatprep.subr.bf16.mxu1 %v3156_v45 }
 0x19a   : > { %1878 = vmatpush1.bf16.msra.mxu0 %v3151_v46 }
 0x19b   : > { %2246 = vmatpush1.bf16.msra.mxu1 %v3154_v47  ;;  %2115 = vmatprep.subr.bf16.mxu0 %v3159_v48 }
 0x19c   : > { %2247 = vmatprep.subr.bf16.mxu1 %v3162_v49 }
 0x19d   : > { %2796 = vmatmul.mubr.msk.bf16.vlgmr.msra.gmra.mrb[24].mxu0 %vm396_vm4, %v3406_v2  ;;  %v2174_v2 = vpop.permute.xlu0 %2173 }
 0x19e   : > { %2116 = vmatpush1.bf16.msra.mxu0 %v3157_v51  ;;  %2147 = vmatprep.mubr.bf16.mxu0 %v3190_v8  ;;  %v3174_v8 = vld [vmem:[%s3969_s3 + $0x574] ss:$8 sps:$4 sm:$0xff]   ;;  %v2175_v60 = vsel %vm689_vm5, %v2172_v62, %v2174_v2 }
 0x19f   : > { %2248 = vmatpush1.bf16.msra.mxu1 %v3160_v52  ;;  %2117 = vmatprep.subr.bf16.mxu0 %v3165_v53 }
 0x1a0   : > { %2249 = vmatprep.subr.bf16.mxu1 %v3168_v56 }
 0x1a2   : > { %2118 = vmatpush1.bf16.msra.mxu0 %v3163_v57 }
 0x1a3   : > { %2250 = vmatpush1.bf16.msra.mxu1 %v3166_v58  ;;  %2119 = vmatprep.subr.bf16.mxu0 %v3171_v59 }
 0x1a6   : > { %2120 = vmatpush1.bf16.msra.mxu0 %v3169_v0  ;;  %2871 = vmatmul.mubr.msk.bf16.vlgmr.msra.gmra.mrb[28].mxu1 %vm396_vm4, %v2175_v60 }
 0x1a7   : > { %2121 = vmatprep.subr.bf16.mxu0 %v3174_v8 }
 0x1aa   : > { %2122 = vmatpush1.bf16.msra.mxu0 %v3172_v1 }
 0x1ab   : > { %2123 = vmatprep.subr.bf16.mxu0 %v3177_v3 }
 0x1ae   : > { %2124 = vmatpush1.bf16.msra.mxu0 %v3175_v4 }
 0x1af   : > { %2125 = vmatprep.subr.bf16.mxu0 %v3180_v5 }
 0x1b2   : > { %2126 = vmatpush1.bf16.msra.mxu0 %v3178_v6 }
 0x1b5   : > { %2846 = vmatmul.mubr.msk.bf16.vlgmr.msra.gmra.mrb[28].mxu0 %vm396_vm4, %v2051_v50 }
 0x1e0   : > { %v434_v7 = vpop.f32.mrb[0].mxu0 }
 0x1e1   : > { %v539_v9 = vadd.f32 %v3728_v61, %v434_v7  ;;  %v436_v10 = vpop.f32.mrb[1].mxu0 }
 0x1e2   : > { %v541_v11 = vadd.f32 %v3734_v63, %v436_v10  ;;  %v438_v12 = vpop.f32.mrb[2].mxu0 }
 0x1e3   : > { %v439_v13 = vpop.f32.mrb[3].mxu0 }
 0x1e9   : > { %v788_v14 = vpop.f32.mrb[4].mxu1 }
 0x1ea   : > { %v790_v15 = vpop.f32.mrb[5].mxu1 }
 0x1eb   : > { %v792_v16 = vpop.f32.mrb[6].mxu1 }
 0x1ec   : > { %v793_v17 = vpop.f32.mrb[7].mxu1 }
 0x1f8   : > { %v663_v18 = vpop.f32.mrb[4].mxu0 }
 0x1f9   : > { %v670_v19 = vadd.f32 %v663_v18, %v539_v9  ;;  %v665_v20 = vpop.f32.mrb[5].mxu0 }
 0x1fa   : > { %v671_v21 = vadd.f32 %v665_v20, %v541_v11  ;;  %v667_v22 = vpop.f32.mrb[6].mxu0 }
 0x1fb   : > { %v668_v23 = vpop.f32.mrb[7].mxu0  ;;  %v795_v24 = vadd.f32 %v788_v14, %v670_v19 }
 0x1fc   : > { %v796_v25 = vadd.f32 %v790_v15, %v671_v21 }
 0x201   : > { %v1034_v26 = vpop.f32.mrb[8].mxu1 }
 0x202   : > { %v1036_v27 = vpop.f32.mrb[9].mxu1 }
 0x203   : > { %v1038_v61 = vpop.f32.mrb[10].mxu1 }
 0x204   : > { %v1039_v28 = vpop.f32.mrb[11].mxu1 }
 0x205   : > { %v2282_v28 = vld [vmem:[%s3970_s4] sm:$0x3] }
 0x210   : > { %v913_v29 = vpop.f32.mrb[8].mxu0 }
 0x211   : > { %v920_v63 = vadd.f32 %v913_v29, %v795_v24  ;;  %v915_v30 = vpop.f32.mrb[9].mxu0 }
 0x212   : > { %v921_v31 = vadd.f32 %v915_v30, %v796_v25  ;;  %v917_v32 = vpop.f32.mrb[10].mxu0 }
 0x213   : > { %v918_v33 = vpop.f32.mrb[11].mxu0  ;;  %v1041_v34 = vadd.f32 %v1034_v26, %v920_v63  ;;  %v2284_v26 = vlaneseq }
 0x214   : > { %v1042_v35 = vadd.f32 %v1036_v27, %v921_v31 }
 0x215   : > { %v3925_v27 = vshrl.u32 %v2284_v26, 7  ;;  %vm2302_vm7 = vcmp.lt.s32.totalorder (!%p2872_p4), %v2284_v26, 192 }
 0x217   : > { %v2286_v61 = vsub.s32 0, %v3925_v27  ;;  %v2290_v29 = vsub.s32 1, %v3925_v27 }
 0x219   : > { %v1289_v36 = vpop.f32.mrb[12].mxu1  ;;  %v2287_v31 = vrot.slane %v2282_v28, %v2286_v61 }
 0x21a   : > { %v1291_v37 = vpop.f32.mrb[13].mxu1 }
 0x21b   : > { %v1293_v38 = vpop.f32.mrb[14].mxu1 }
 0x21c   : > { %v1294_v39 = vpop.f32.mrb[15].mxu1 }
 0x228   : > { %v1165_v40 = vpop.f32.mrb[12].mxu0 }
 0x229   : > { %v1172_v41 = vadd.f32 %v1165_v40, %v1041_v34  ;;  %v1167_v42 = vpop.f32.mrb[13].mxu0  ;;  %v2291_v34 = vrot.slane %v2282_v28, %v2290_v29 }
 0x22a   : > { %v1173_v43 = vadd.f32 %v1167_v42, %v1042_v35  ;;  %v1169_v44 = vpop.f32.mrb[14].mxu0 }
 0x22b   : > { %v1170_v45 = vpop.f32.mrb[15].mxu0  ;;  %v1296_v46 = vadd.f32 %v1289_v36, %v1172_v41  ;;  %v3194_v41 = vmov (!%p2872_p4), 0.0  }
 0x22c   : > { %v1297_v47 = vadd.f32 %v1291_v37, %v1173_v43  ;;  %2304 = vst.msk [vmem:[%s3972_s6] sm:$0x3] (!%p2872_p4), %vm2302_vm7, %v3194_v41  ;;  %2305 = vst.msk [vmem:[%s3973_s7] sm:$0x3] (!%p2872_p4), %vm2302_vm7, %v3194_v41 }
 0x231   : > { %v1530_v48 = vpop.f32.mrb[16].mxu1 }
 0x232   : > { %v1532_v49 = vpop.f32.mrb[17].mxu1 }
 0x233   : > { %v1534_v51 = vpop.f32.mrb[18].mxu1 }
 0x234   : > { %v1535_v52 = vpop.f32.mrb[19].mxu1 }
 0x240   : > { %v1409_v53 = vpop.f32.mrb[16].mxu0 }
 0x241   : > { %v1416_v54 = vadd.f32 %v1409_v53, %v1296_v46  ;;  %v1411_v55 = vpop.f32.mrb[17].mxu0 }
 0x242   : > { %v1417_v56 = vadd.f32 %v1411_v55, %v1297_v47  ;;  %v1413_v57 = vpop.f32.mrb[18].mxu0 }
 0x243   : > { %v1414_v58 = vpop.f32.mrb[19].mxu0  ;;  %v1537_v59 = vadd.f32 %v1530_v48, %v1416_v54 }
 0x244   : > { %v1538_v62 = vadd.f32 %v1532_v49, %v1417_v56 }
 0x249   : > { %v1779_v2 = vpop.f32.mrb[20].mxu1 }
 0x24a   : > { %v1781_v0 = vpop.f32.mrb[21].mxu1 }
 0x24b   : > { %v1783_v8 = vpop.f32.mrb[22].mxu1 }
 0x24c   : > { %v1784_v60 = vpop.f32.mrb[23].mxu1 }
 0x258   : > { %v1655_v1 = vpop.f32.mrb[20].mxu0 }
 0x259   : > { %v1662_v3 = vadd.f32 %v1655_v1, %v1537_v59  ;;  %v1657_v4 = vpop.f32.mrb[21].mxu0 }
 0x25a   : > { %v1663_v5 = vadd.f32 %v1657_v4, %v1538_v62  ;;  %v1659_v6 = vpop.f32.mrb[22].mxu0 }
 0x25b   : > { %v1660_v50 = vpop.f32.mrb[23].mxu0  ;;  %v1786_v7 = vadd.f32 %v1779_v2, %v1662_v3 }
 0x25c   : > { %v1787_v9 = vadd.f32 %v1781_v0, %v1663_v5 }
 0x261   : > { %v2022_v10 = vpop.f32.mrb[24].mxu1 }
 0x262   : > { %v2024_v11 = vpop.f32.mrb[25].mxu1 }
 0x263   : > { %v2026_v12 = vpop.f32.mrb[26].mxu1 }
 0x264   : > { %v2027_v13 = vpop.f32.mrb[27].mxu1 }
 0x270   : > { %v1901_v14 = vpop.f32.mrb[24].mxu0 }
 0x271   : > { %v1908_v15 = vadd.f32 %v1901_v14, %v1786_v7  ;;  %v1903_v16 = vpop.f32.mrb[25].mxu0 }
 0x272   : > { %v1909_v17 = vadd.f32 %v1903_v16, %v1787_v9  ;;  %v1905_v18 = vpop.f32.mrb[26].mxu0 }
 0x273   : > { %v1906_v19 = vpop.f32.mrb[27].mxu0  ;;  %v2029_v20 = vadd.f32 %v2022_v10, %v1908_v15 }
 0x274   : > { %v2030_v21 = vadd.f32 %v2024_v11, %v1909_v17 }
 0x279   : > { %v2273_v22 = vpop.f32.mrb[28].mxu1 }
 0x27a   : > { %v2275_v23 = vpop.f32.mrb[29].mxu1 }
 0x27b   : > { %v2277_v24 = vpop.f32.mrb[30].mxu1 }
 0x27c   : > { %v2278_v25 = vpop.f32.mrb[31].mxu1 }
 0x288   : > { %v2149_v63 = vpop.f32.mrb[28].mxu0  ;;  %2299 = sbr.rel (%p2872_p4) target bundleno = 655 (0x28f), region = 44 }
 0x289   : > { %v2156_v30 = vadd.f32 %v2149_v63, %v2029_v20  ;;  %v2151_v32 = vpop.f32.mrb[29].mxu0 }
 0x28a   : > { %v2157_v33 = vadd.f32 %v2151_v32, %v2030_v21  ;;  %v2153_v35 = vpop.f32.mrb[30].mxu0 }
 0x28b   : > { %v2280_v36 = vadd.f32 %v2273_v22, %v2156_v30  ;;  %v2154_v37 = vpop.f32.mrb[31].mxu0 }
 0x28c   : > { %v2281_v38 = vadd.f32 %v2275_v23, %v2157_v33 }
 0x28d   : > { %v2294_v39 = vadd.f32 %v2287_v31, %v2280_v36 }
 0x28e   : > { %v2295_v40 = vadd.f32 %v2291_v34, %v2281_v38 }
 0x28f PF: > { %vm2307_vm8 = vcmask 1042432   ;;  %vm2315_vm9 = vcmask 518144   ;;  %v2348_v42 = vmul.f32 %v2294_v39, %v2294_v39  ;;  %v3195_v49 = vmov 1966171168   ;;  %v2404_v10 = vld [vmem:[%s3267_s19] sm:$0xf] }
 0x290   : > { %v2308_v43 = vsel %vm2307_vm8, %v2294_v39, 0.0  ;;  %v2316_v44 = vsel %vm2315_vm9, %v2295_v40, 0.0  ;;  %v2349_v47 = vmul.f32 %v2295_v40, %v2295_v40  ;;  %v2327_v51 = vunpack.c.l.s4 %v3195_v49  ;;  %v2306_v25 = vld [vmem:[%s3972_s6] sm:$0x3] }
 0x291   : > { %v2309_v45 = vrot.slane %v2308_v43, 4  ;;  %v2317_v46 = vrot.slane %v2316_v44, 4  ;;  %v2350_v48 = vsel %vm2307_vm8, %v2348_v42, 0.0  ;;  %v3196_v56 = vmov 1983009808  }
 0x292   : > { %v2351_v52 = vrot.slane %v2350_v48, 4  ;;  %v2357_v55 = vsel %vm2315_vm9, %v2349_v47, 0.0  ;;  %v2390_v57 = vunpack.c.l.s4 %v3196_v56  ;;  %v2873_v62 = vpack.c.bf16 %v2295_v40, %v2294_v39 }
 0x293   : > { %v2310_v53 = vadd.f32 %v2309_v45, %v2308_v43  ;;  %v2318_v54 = vadd.f32 %v2317_v46, %v2316_v44  ;;  %v2358_v59 = vrot.slane %v2357_v55, 4  ;;  %vm2397_vm10 = vcmask 1041408  }
 0x294   : > { %v2352_v58 = vadd.f32 %v2351_v52, %v2350_v48  ;;  %v2391_v8 = vunpack.c.0.s8 %v2390_v57  ;;  %vm2398_vm11 = vsmask.f32 1280  ;;  %vm2400_vm13 = vcmask 519170  }
 0x295   : > { %v2311_v2 = vrot.slane %v2310_v53, 2  ;;  %v2319_v0 = vrot.slane %v2318_v54, 2  ;;  %v2359_v1 = vadd.f32 %v2358_v59, %v2357_v55  ;;  %vm3940_vm12 = vmand %vm2397_vm10, %vm2398_vm11  ;;  %vm2401_vm14 = vsmask.f32 3328 }
 0x296   : > { %v2353_v60 = vrot.slane %v2352_v58, 2  ;;  %v2328_v6 = vunpack.c.0.s8 %v2327_v51  ;;  %v2394_v50 = vsub.s32 %v2391_v8, %v3925_v27  ;;  %vm2402_vm15 = vmand %vm2400_vm13, %vm2401_vm14  ;;  %vm2344_vm1 = vcmp.lt.s32.totalorder %v2284_v26, 192 }
 0x297   : > { %v2312_v4 = vadd.f32 %v2311_v2, %v2310_v53  ;;  %v2320_v5 = vadd.f32 %v2319_v0, %v2318_v54  ;;  %v2360_v9 = vrot.slane %v2359_v1, 2  ;;  %vm2403_vm0 = vmor %vm2402_vm15, %vm3940_vm12 }
 0x298   : > { %v2354_v7 = vadd.f32 %v2353_v60, %v2352_v58  ;;  %v2395_v13 = vrot.slane %v2873_v62, %v2394_v50  ;;  %v2331_v18 = vsub.s32 %v2328_v6, %v3925_v27  ;;  %v2347_v27 = vld [vmem:[%s3973_s7] sm:$0x3] }
 0x299   : > { %v2313_v11 = vrot.slane %v2312_v4, 1  ;;  %v2321_v12 = vrot.slane %v2320_v5, 1  ;;  %v2361_v15 = vadd.f32 %v2360_v9, %v2359_v1 }
 0x29a   : > { %v2355_v14 = vrot.slane %v2354_v7, 1  ;;  %v2405_v19 = vsel %vm2403_vm0, %v2395_v13, %v2404_v10 }
 0x29b   : > { %v2314_v16 = vadd.f32 %v2313_v11, %v2312_v4  ;;  %v2322_v17 = vadd.f32 %v2321_v12, %v2320_v5  ;;  %v2362_v21 = vrot.slane %v2361_v15, 1  ;;  %2406 = vst [vmem:[%s3267_s19] sm:$0xf] %v2405_v19 }
 0x29c   : > { %v2356_v20 = vadd.f32 %v2355_v14, %v2354_v7 }
 0x29d   : > { %v2325_v22 = vcombine.low %v2314_v16, %v2322_v17  ;;  %v2363_v23 = vadd.f32 %v2362_v21, %v2361_v15 }
 0x29f   : > { %v2332_v24 = vrot.slane %v2325_v22, %v2331_v18  ;;  %v2366_v61 = vcombine.low %v2356_v20, %v2363_v23 }
 0x2a1   : > { %v2339_v28 = vrot.slane %v2332_v24, %v2331_v18  ;;  %v2373_v29 = vrot.slane %v2366_v61, %v2331_v18 }
 0x2a3   : > { %v2341_v63 = vadd.f32 %v2339_v28, %v2306_v25  ;;  %v2380_v30 = vrot.slane %v2373_v29, %v2331_v18 }
 0x2a5   : > { %2346 = vst.msk [vmem:[%s3972_s6] sm:$0x3] %vm2344_vm1, %v2341_v63  ;;  %v2382_v31 = vadd.f32 %v2380_v30, %v2347_v27 }
 0x2a7   : > { %2383 = vst.msk [vmem:[%s3973_s7] sm:$0x3] %vm2344_vm1, %v2382_v31 }
 0x2a8 PF: > { %s18_s24 = sadd.s32 1, %s3187_s24  }
 0x2a9   : > { %p15_p5 = scmp.ge.s32.totalorder %s18_s24, 4  }
 0x2ab   :  { %17 = sbr.rel (!%p15_p5) target bundleno = 1 (0x1), region = 105 }

// kernel: tile.68
= control target key start
LH: loop header
LB: loop body
LE: loop exit
PB: predicated region body
PF: predicated region fallthrough
CT: control target
= control target key end

     0   :  { %s22_s0 = inlined_call_operand.vmem [shape: f32[64], index: 0, kind: input, shape index: {}]   ;;  %s23_s1 = inlined_call_operand.vmem [shape: f32[3,64], index: 1, kind: output, shape index: {}]  }
   0x1   :  { %v4_v0 = vld [vmem:[%s22_s0] ss:$0 sm:$0xff] }
   0x2   :  { %5 = vst [vmem:[%s23_s1] sm:$0xf] %v4_v0 }

// kernel: tile.69
= control target key start
LH: loop header
LB: loop body
LE: loop exit
PB: predicated region body
PF: predicated region fallthrough
CT: control target
= control target key end

     0   :  { %vm8_vm0 = vcmask 523264   ;;  %s29_s8 = smov 64   ;;  %vm14_vm1 = vcmask 1048064   ;;  %s49_s0 = inlined_call_operand.vmem [shape: f32[3,64], index: 0, kind: input, shape index: {}]   ;;  %s50_s1 = inlined_call_operand.vmem [shape: f32[1,192], index: 1, kind: output, shape index: {}]  }
   0x1   :  { %v4_v0 = vld [vmem:[%s49_s0] sm:$0xf]  ;;  %s6_s0 = smov 3 }
   0x2   :  { %5 = vst [vmem:[#allocation1] sm:$0xf] %v4_v0 }
   0x9   :  { %v11_v1 = vld [vmem:[#allocation1 + $0x1] sm:$0x1]   ;;  %v7_v2 = vld [vmem:[#allocation1] ss:$2 sm:%s6_s0]  }
   0xa   :  { %12 = vrot.lane.b32.xlu0 %v11_v1, %s29_s8  ;;  %9 = vst.msk [vmem:[#allocation0] ss:$8 sm:$0x3] %vm8_vm0, %v7_v2  }
  0x11   :  { %v23_v3 = vld [vmem:[#allocation0 + $0x8] sm:$0x1] }
  0x12   :  { %27 = vst [vmem:[%s50_s1 + $0x1] sm:$0x1] %v23_v3 }
  0x7c   :  { %v13_v4 = vpop.permute.xlu0 %12  }
  0x7d   :  { %15 = vst.msk [vmem:[#allocation0] sm:$0x1] %vm14_vm1, %v13_v4  }
  0x84   :  { %v19_v5 = vld [vmem:[#allocation0] sm:$0x1] }
  0x85   :  { %21 = vst [vmem:[%s50_s1] sm:$0x1] %v19_v5 }

// kernel: tile.78
= control target key start
LH: loop header
LB: loop body
LE: loop exit
PB: predicated region body
PF: predicated region fallthrough
CT: control target
= control target key end

     0   :  { %s22_s0 = inlined_call_operand.vmem [shape: f32[128], index: 0, kind: input, shape index: {}]   ;;  %s23_s1 = inlined_call_operand.vmem [shape: f32[2,128], index: 1, kind: output, shape index: {}]  }
   0x1   :  { %v4_v0 = vld [vmem:[%s22_s0] ss:$0 sm:$0xff] }
   0x2   :  { %5 = vst [vmem:[%s23_s1] sm:$0x3] %v4_v0 }

// kernel: _lambda_.11
= control target key start
LH: loop header
LB: loop body
LE: loop exit
PB: predicated region body
PF: predicated region fallthrough
CT: control target
= control target key end

     0   :  { %s3627_s18 = smov 0   ;;  %s4539_s0 = inlined_call_operand.vmem [shape: bf16[2,3,192], index: 0, kind: input, shape index: {}]   ;;  %s4540_s1 = inlined_call_operand.vmem [shape: f32[1,192], index: 1, kind: input, shape index: {}]   ;;  %s4541_s2 = inlined_call_operand.vmem [shape: f32[1,192], index: 2, kind: input, shape index: {}]   ;;  %s4542_s3 = inlined_call_operand.vmem [shape: bf16[16,128,256], index: 3, kind: input, shape index: {}]   ;;  %s4543_s4 = inlined_call_operand.vmem [shape: f32[1,256], index: 4, kind: input, shape index: {}]   ;;  %s4544_s5 = inlined_call_operand.vmem [shape: f32[2,2,256], index: 5, kind: output, shape index: {}]  }
   0x1 LB: > { %s2681_s19 = sadd.s32 4294967295, %s3592_s18   ;;  %p2685_p0 = scmp.ge.s32.totalorder %s3592_s18, 1  ;;  %s3592_s18 = sphi %s3627_s18, %s15_s18  }
   0x2   : > { %p187_p1 = scmp.lt.s32.totalorder %s3592_s18, 3 }
   0x4   : > { %p188_p2 = pnand %p2685_p0, %p187_p1 }
   0x5   : > { %p215_p3 = scmp.lt.s32.totalorder (!%p188_p2), %s2681_s19, 1  ;;  %v230_v0 = vlaneseq (!%p188_p2)  ;;  %v228_v1 = vld [vmem:[%s4540_s1] sm:$0x3] (!%p188_p2)  ;;  %v3202_v2 = vld [vmem:[%s4542_s3 + $0x4] ss:$8 sps:$4 sm:$0xff] (!%p188_p2)   ;;  %vm259_vm0 = vcmask (!%p188_p2), 520192  }
   0x6   : > { %191 = sbr.rel (%p188_p2) target bundleno = 720 (0x2d0), region = 40  ;;  %v3204_v4 = vld [vmem:[%s4542_s3] ss:$8 sps:$4 sm:$0xff] (!%p188_p2)   ;;  %v3594_v5 = vmov (!%p188_p2), 0.0   ;;  %524 = vmatprep.subr.bf16.mxu1 (!%p188_p2), %v3202_v2  ;;  %v3205_v7 = vld [vmem:[%s4542_s3 + $0x14] ss:$8 sps:$4 sm:$0xff] (!%p188_p2)  }
   0x7   : > { %v231_v3 = vshrl.u32 (!%p188_p2), %v230_v0, 7  ;;  %257 = vst [vmem:[#allocation2] sm:$0x1f] (!%p188_p2), %v3594_v5  ;;  %260 = vst.msk [vmem:[#allocation2 + $0x10] sm:$0x1f] (!%p188_p2), %vm259_vm0, %v3594_v5  ;;  %525 = vmatpush1.bf16.msra.mxu1 (!%p188_p2), %v3204_v4  ;;  %v3595_v26 = vmov (!%p188_p2), 0  }
   0x8   : > { %258 = vst [vmem:[#allocation2 + $0x8] sm:$0x1f] (!%p188_p2), %v3594_v5  ;;  %v241_v6 = vld [vmem:[%s4541_s2] sm:$0x3] (!%p188_p2)  ;;  %v3207_v10 = vld [vmem:[%s4542_s3 + $0x10] ss:$8 sps:$4 sm:$0xff] (!%p188_p2)   ;;  %526 = vmatprep.subr.bf16.mxu1 (!%p188_p2), %v3205_v7  ;;  %556 = vmatprep.mubr.bf16.mxu1 (!%p188_p2), %v3595_v26 }
   0x9   : > { %v3653_v8 = vsub.s32 (!%p188_p2), 0, %v231_v3  ;;  %v3655_v9 = vsub.s32 (!%p188_p2), 1, %v231_v3  ;;  %v3208_v11 = vld [vmem:[%s4542_s3 + $0x24] ss:$8 sps:$4 sm:$0xff] (!%p188_p2)   ;;  %v3210_v20 = vld [vmem:[%s4542_s3 + $0x20] ss:$8 sps:$4 sm:$0xff] (!%p188_p2)   ;;  %435 = vmatprep.mubr.bf16.mxu0 (!%p188_p2), %v3595_v26 }
   0xa   : > { %v3211_v21 = vld [vmem:[%s4542_s3 + $0x34] ss:$8 sps:$4 sm:$0xff] (!%p188_p2)   ;;  %v3213_v23 = vld [vmem:[%s4542_s3 + $0x30] ss:$8 sps:$4 sm:$0xff] (!%p188_p2)   ;;  %v3214_v25 = vld [vmem:[%s4542_s3 + $0x44] ss:$8 sps:$4 sm:$0xff] (!%p188_p2)  }
   0xb   : > { %v233_v13 = vrot.slane (!%p188_p2), %v228_v1, %v3653_v8  ;;  %v237_v14 = vrot.slane (!%p188_p2), %v228_v1, %v3655_v9  ;;  %v246_v15 = vrot.slane (!%p188_p2), %v241_v6, %v3653_v8  ;;  %v250_v16 = vrot.slane (!%p188_p2), %v241_v6, %v3655_v9  ;;  %527 = vmatpush1.bf16.msra.mxu1 (!%p188_p2), %v3207_v10  ;;  %v3216_v28 = vld [vmem:[%s4542_s3 + $0x40] ss:$8 sps:$4 sm:$0xff] (!%p188_p2)   ;;  %v3217_v30 = vld [vmem:[%s4542_s3 + $0x54] ss:$8 sps:$4 sm:$0xff] (!%p188_p2)   ;;  %v3219_v33 = vld [vmem:[%s4542_s3 + $0x50] ss:$8 sps:$4 sm:$0xff] (!%p188_p2)  }
   0xc   : > { %528 = vmatprep.subr.bf16.mxu1 (!%p188_p2), %v3208_v11  ;;  %s3596_s29 = smov (!%p188_p2), 64   ;;  %v3220_v36 = vld [vmem:[%s4542_s3 + $0x64] ss:$8 sps:$4 sm:$0xff] (!%p188_p2)   ;;  %v3222_v37 = vld [vmem:[%s4542_s3 + $0x60] ss:$8 sps:$4 sm:$0xff] (!%p188_p2)   ;;  %vm273_vm2 = vcmask (!%p188_p2), 1043969  }
   0xd   : > { %s4546_s19 = smov (!%p215_p3, %s2681_s19), 1  ;;  %v238_v18 = vcombine.low %v233_v13, %v237_v14  ;;  %v251_v19 = vcombine.low %v246_v15, %v250_v16  ;;  %v3223_v38 = vld [vmem:[%s4542_s3 + $0x74] ss:$8 sps:$4 sm:$0xff]   ;;  %v3225_v40 = vld [vmem:[%s4542_s3 + $0x70] ss:$8 sps:$4 sm:$0xff]   ;;  %vm269_vm3 = vcmask 523264  }
   0xe   : > { %s3189_s30 = sshll.u32 %s4546_s19, 2  ;;  %v278_v34 = vld [vmem:[#allocation2 + $0x10] sm:$0x1f]  ;;  %v3226_v41 = vld [vmem:[%s4542_s3 + $0x84] ss:$8 sps:$4 sm:$0xff]  }
   0xf   : > { %s219_s10 = scalar_lea.vmem %s4539_s0, %s3189_s30  ;;  %529 = vmatpush1.bf16.msra.mxu1 %v3210_v20  ;;  %v3706_v39 = vpack.c.bf16 %v278_v34, %v278_v34  ;;  %v3230_v42 = vld [vmem:[%s4542_s3 + $0x184] ss:$8 sps:$4 sm:$0xff]   ;;  %v3231_v43 = vld [vmem:[%s4542_s3 + $0x80] ss:$8 sps:$4 sm:$0xff]   ;;  %v3232_v44 = vld [vmem:[%s4542_s3 + $0x94] ss:$8 sps:$4 sm:$0xff]   ;;  %403 = vmatprep.subr.bf16.mxu0 %v3226_v41  ;;  %s224_s17 = scalar_lea.vmem %s4544_s5, %s3189_s30 }
  0x10   : > { %v226_v12 = vld [vmem:[%s219_s10] sm:$0xf]  ;;  %530 = vmatprep.subr.bf16.mxu1 %v3211_v21  ;;  %404 = vmatpush1.bf16.msra.mxu0 %v3231_v43  ;;  %v3237_v45 = vld [vmem:[%s4542_s3 + $0x90] ss:$8 sps:$4 sm:$0xff]   ;;  %v3238_v46 = vld [vmem:[%s4542_s3 + $0xa4] ss:$8 sps:$4 sm:$0xff]  }
  0x11   : > { %v227_v17 = vunpack.c.l.bf16 %v226_v12  ;;  %405 = vmatprep.subr.bf16.mxu0 %v3232_v44  ;;  %v3243_v47 = vld [vmem:[%s4542_s3 + $0xa0] ss:$8 sps:$4 sm:$0xff]   ;;  %v3244_v48 = vld [vmem:[%s4542_s3 + $0xb4] ss:$8 sps:$4 sm:$0xff]   ;;  %v3249_v49 = vld [vmem:[%s4542_s3 + $0xb0] ss:$8 sps:$4 sm:$0xff]  }
  0x12   : > { %v3250_v50 = vld [vmem:[%s4542_s3 + $0xc4] ss:$8 sps:$4 sm:$0xff]   ;;  %v3255_v51 = vld [vmem:[%s4542_s3 + $0xc0] ss:$8 sps:$4 sm:$0xff]   ;;  %v3256_v52 = vld [vmem:[%s4542_s3 + $0xd4] ss:$8 sps:$4 sm:$0xff]  }
  0x13   : > { %v240_v22 = vmul.f32 %v238_v18, %v227_v17  ;;  %531 = vmatpush1.bf16.msra.mxu1 %v3213_v23  ;;  %v3261_v53 = vld [vmem:[%s4542_s3 + $0xd0] ss:$8 sps:$4 sm:$0xff]   ;;  %v3262_v54 = vld [vmem:[%s4542_s3 + $0xe4] ss:$8 sps:$4 sm:$0xff]   ;;  %v3267_v55 = vld [vmem:[%s4542_s3 + $0xe0] ss:$8 sps:$4 sm:$0xff]  }
  0x14   : > { %532 = vmatprep.subr.bf16.mxu1 %v3214_v25  ;;  %406 = vmatpush1.bf16.msra.mxu0 %v3237_v45  ;;  %v3268_v56 = vld [vmem:[%s4542_s3 + $0xf4] ss:$8 sps:$4 sm:$0xff]   ;;  %v3273_v57 = vld [vmem:[%s4542_s3 + $0xf0] ss:$8 sps:$4 sm:$0xff]   ;;  %v3276_v59 = vld [vmem:[%s4542_s3 + $0x104] ss:$8 sps:$4 sm:$0xff]  }
  0x15   : > { %v253_v24 = vadd.f32 %v251_v19, %v240_v22  ;;  %407 = vmatprep.subr.bf16.mxu0 %v3238_v46  ;;  %v3228_v63 = vld [vmem:[%s4542_s3 + $0x180] ss:$8 sps:$4 sm:$0xff]   ;;  %v3236_v1 = vld [vmem:[%s4542_s3 + $0x194] ss:$8 sps:$4 sm:$0xff]   ;;  %v1313_v3 = vshll.u32 %v3706_v39, 16  ;;  %v1311_v13 = vshrl.u32 %v3706_v39, 16 }
  0x16   : > { %v3234_v4 = vld [vmem:[%s4542_s3 + $0x190] ss:$8 sps:$4 sm:$0xff]   ;;  %v3242_v6 = vld [vmem:[%s4542_s3 + $0x1a4] ss:$8 sps:$4 sm:$0xff]   ;;  %v3240_v15 = vld [vmem:[%s4542_s3 + $0x1a0] ss:$8 sps:$4 sm:$0xff]  }
  0x17   : > { %vm254_vm1 = vcmp.ge.f32.partialorder %v253_v24, 0.0  ;;  %v255_v27 = vmul.f32 0.2, %v253_v24  ;;  %533 = vmatpush1.bf16.msra.mxu1 %v3216_v28  ;;  %v1315_v14 = vrot.slane %v1313_v3, 1  ;;  %v3248_v16 = vld [vmem:[%s4542_s3 + $0x1b4] ss:$8 sps:$4 sm:$0xff]  }
  0x18   : > { %534 = vmatprep.subr.bf16.mxu1 %v3217_v30  ;;  %408 = vmatpush1.bf16.msra.mxu0 %v3243_v47  ;;  %v3246_v22 = vld [vmem:[%s4542_s3 + $0x1b0] ss:$8 sps:$4 sm:$0xff]   ;;  %v3254_v23 = vld [vmem:[%s4542_s3 + $0x1c4] ss:$8 sps:$4 sm:$0xff]   ;;  %v3252_v25 = vld [vmem:[%s4542_s3 + $0x1c0] ss:$8 sps:$4 sm:$0xff]  }
  0x19   : > { %v256_v29 = vsel %vm254_vm1, %v253_v24, %v255_v27  ;;  %409 = vmatprep.subr.bf16.mxu0 %v3244_v48  ;;  %v1316_v21 = vor.u32 %v1315_v14, %v1311_v13  ;;  %v3260_v27 = vld [vmem:[%s4542_s3 + $0x1d4] ss:$8 sps:$4 sm:$0xff]   ;;  %v2470_v34 = vrot.slane %v1311_v13, 1  ;;  %v3264_v41 = vld [vmem:[%s4542_s3 + $0x1e0] ss:$8 sps:$4 sm:$0xff]  }
  0x1a   : > { %v263_v31 = vrot.slane %v256_v29, 7  ;;  %v262_v32 = vcombine.high %v256_v29, %v256_v29  ;;  %v1891_v29 = vrot.slane %v3706_v39, 1  ;;  %v3270_v43 = vld [vmem:[%s4542_s3 + $0x1f0] ss:$8 sps:$4 sm:$0xff]   ;;  %v3279_v44 = vld [vmem:[%s4542_s3 + $0x284] ss:$8 sps:$4 sm:$0xff]  }
  0x1b   : > { %535 = vmatpush1.bf16.msra.mxu1 %v3219_v33  ;;  %v3274_v47 = vld [vmem:[%s4542_s3 + $0x100] ss:$8 sps:$4 sm:$0xff]   ;;  %v3315_v13 = vld [vmem:[%s4542_s3 + $0x2e4] ss:$8 sps:$4 sm:$0xff]  }
  0x1c   : > { %265 = vrot.lane.b32.xlu0 %v263_v31, %s3596_s29  ;;  %v264_v35 = vrot.slane %v262_v32, 7  ;;  %536 = vmatprep.subr.bf16.mxu1 %v3220_v36  ;;  %v3258_v36 = vld [vmem:[%s4542_s3 + $0x1d0] ss:$8 sps:$4 sm:$0xff]   ;;  %v3277_v48 = vld [vmem:[%s4542_s3 + $0x280] ss:$8 sps:$4 sm:$0xff]  }
  0x1d   : > { %410 = vmatpush1.bf16.msra.mxu0 %v3249_v49  ;;  %v3310_v14 = vld [vmem:[%s4542_s3 + $0x160] ss:$8 sps:$4 sm:$0xff]  }
  0x1e   : > { %411 = vmatprep.subr.bf16.mxu0 %v3250_v50  ;;  %v3282_v50 = vld [vmem:[%s4542_s3 + $0x114] ss:$8 sps:$4 sm:$0xff]  }
  0x1f   : > { %537 = vmatpush1.bf16.msra.mxu1 %v3222_v37  ;;  %v3266_v37 = vld [vmem:[%s4542_s3 + $0x1e4] ss:$8 sps:$4 sm:$0xff]  }
  0x20   : > { %267 = vrot.lane.b32.xlu0 %v264_v35, %s3596_s29  ;;  %538 = vmatprep.subr.bf16.mxu1 %v3223_v38  ;;  %v2471_v35 = vrot.slane %v1313_v3, 2  ;;  %v3298_v3 = vld [vmem:[%s4542_s3 + $0x140] ss:$8 sps:$4 sm:$0xff]  }
  0x21   : > { %412 = vmatpush1.bf16.msra.mxu0 %v3255_v51  ;;  %v3285_v51 = vld [vmem:[%s4542_s3 + $0x294] ss:$8 sps:$4 sm:$0xff]  }
  0x22   : > { %413 = vmatprep.subr.bf16.mxu0 %v3256_v52 }
  0x23   : > { %539 = vmatpush1.bf16.msra.mxu1 %v3225_v40  ;;  %v2472_v40 = vor.u32 %v2471_v35, %v2470_v34  ;;  %v3328_v34 = vld [vmem:[%s4542_s3 + $0x210] ss:$8 sps:$4 sm:$0xff]  }
  0x24   : > { %724 = vrot.lane.b32.xlu0 %v3706_v39, %s3596_s29  ;;  %808 = vmatprep.subr.bf16.mxu1 %v3230_v42  ;;  %v3272_v42 = vld [vmem:[%s4542_s3 + $0x1f4] ss:$8 sps:$4 sm:$0xff]   ;;  %v3331_v35 = vld [vmem:[%s4542_s3 + $0x390] ss:$8 sps:$4 sm:$0xff]  }
  0x25   : > { %414 = vmatpush1.bf16.msra.mxu0 %v3261_v53 }
  0x26   : > { %415 = vmatprep.subr.bf16.mxu0 %v3262_v54  ;;  %v3280_v54 = vld [vmem:[%s4542_s3 + $0x110] ss:$8 sps:$4 sm:$0xff]  }
  0x29   : > { %416 = vmatpush1.bf16.msra.mxu0 %v3267_v55  ;;  %v3283_v55 = vld [vmem:[%s4542_s3 + $0x290] ss:$8 sps:$4 sm:$0xff]  }
  0x2a   : > { %417 = vmatprep.subr.bf16.mxu0 %v3268_v56  ;;  %v3288_v56 = vld [vmem:[%s4542_s3 + $0x124] ss:$8 sps:$4 sm:$0xff]  }
  0x2d   : > { %418 = vmatpush1.bf16.msra.mxu0 %v3273_v57  ;;  %v3291_v57 = vld [vmem:[%s4542_s3 + $0x2a4] ss:$8 sps:$4 sm:$0xff]  }
  0x2e   : > { %662 = vmatprep.subr.bf16.mxu0 %v3276_v59  ;;  %v3289_v59 = vld [vmem:[%s4542_s3 + $0x2a0] ss:$8 sps:$4 sm:$0xff]  }
  0x8e   : > { %v266_v58 = vpop.permute.xlu0 %265 }
  0x8f   : > { %274 = vst.msk [vmem:[#allocation2] sm:$0xe] %vm273_vm2, %v266_v58 }
  0x92   : > { %v268_v60 = vpop.permute.xlu0 %267 }
  0x93   : > { %v270_v61 = vsel %vm269_vm3, %v266_v58, %v268_v60  ;;  %v3286_v58 = vld [vmem:[%s4542_s3 + $0x120] ss:$8 sps:$4 sm:$0xff]   ;;  %v3294_v60 = vld [vmem:[%s4542_s3 + $0x134] ss:$8 sps:$4 sm:$0xff]  }
  0x94   : > { %275 = vst [vmem:[#allocation2 + $0x8] sm:$0xe] %v270_v61  ;;  %v3297_v61 = vld [vmem:[%s4542_s3 + $0x2b4] ss:$8 sps:$4 sm:$0xff]  }
  0x96   : > { %v276_v62 = vld [vmem:[#allocation2] sm:$0x1f]  ;;  %v725_v46 = vpop.permute.xlu0 %724 }
  0x97   : > { %v3771_v0 = vpack.c.bf16 %v276_v62, %v276_v62  ;;  %v3292_v62 = vld [vmem:[%s4542_s3 + $0x130] ss:$8 sps:$4 sm:$0xff]  }
  0x99   : > { %316 = vrot.lane.b32.xlu1 %v3771_v0, %s3596_s29  ;;  %557 = vmatmul.mubr.bf16.vlgmr.msra.gmra.mrb[0].mxu1 %v3771_v0  ;;  %v871_v2 = vshll.u32 %v3771_v0, 16  ;;  %v869_v11 = vshrl.u32 %v3771_v0, 16  ;;  %v1461_v24 = vrot.slane %v3771_v0, 1  ;;  %v3483_v0 = vld [vmem:[%s4542_s3 + $0x6a4] ss:$8 sps:$4 sm:$0xff]  }
  0x9a   : > { %809 = vmatpush1.bf16.msra.mxu1 %v3228_v63  ;;  %840 = vmatprep.mubr.bf16.mxu1 %v3595_v26  ;;  %v3295_v63 = vld [vmem:[%s4542_s3 + $0x2b0] ss:$8 sps:$4 sm:$0xff]  }
  0x9b   : > { %v277_v5 = vld [vmem:[#allocation2 + $0x8] sm:$0x1f]  ;;  %810 = vmatprep.subr.bf16.mxu1 %v3236_v1  ;;  %v873_v10 = vrot.slane %v871_v2, 1  ;;  %v2036_v30 = vrot.slane %v869_v11, 1  ;;  %v2037_v31 = vrot.slane %v871_v2, 2 }
  0x9c   : > { %v3788_v7 = vpack.c.bf16 %v277_v5, %v277_v5  ;;  %v3300_v1 = vld [vmem:[%s4542_s3 + $0x144] ss:$8 sps:$4 sm:$0xff]   ;;  %v3306_v5 = vld [vmem:[%s4542_s3 + $0x154] ss:$8 sps:$4 sm:$0xff]  }
  0x9d   : > { %v3801_v17 = vor.u32 %v873_v10, %v869_v11  ;;  %v3839_v38 = vor.u32 %v2037_v31, %v2036_v30  ;;  %v3303_v2 = vld [vmem:[%s4542_s3 + $0x2c4] ss:$8 sps:$4 sm:$0xff]   ;;  %v3304_v10 = vld [vmem:[%s4542_s3 + $0x150] ss:$8 sps:$4 sm:$0xff]   ;;  %v3330_v31 = vld [vmem:[%s4542_s3 + $0x214] ss:$8 sps:$4 sm:$0xff]  }
  0x9e   : > { %318 = vrot.lane.b32.xlu1 %v3788_v7, %s3596_s29  ;;  %v1019_v12 = vshll.u32 %v3788_v7, 16  ;;  %811 = vmatpush1.bf16.msra.mxu1 %v3234_v4  ;;  %v1017_v18 = vshrl.u32 %v3788_v7, 16  ;;  %v1603_v28 = vrot.slane %v3788_v7, 1  ;;  %v3301_v4 = vld [vmem:[%s4542_s3 + $0x2c0] ss:$8 sps:$4 sm:$0xff]  }
  0x9f   : > { %812 = vmatprep.subr.bf16.mxu1 %v3242_v6  ;;  %v3309_v6 = vld [vmem:[%s4542_s3 + $0x2d4] ss:$8 sps:$4 sm:$0xff]   ;;  %v3307_v11 = vld [vmem:[%s4542_s3 + $0x2d0] ss:$8 sps:$4 sm:$0xff]  }
  0xa0   : > { %v1021_v19 = vrot.slane %v1019_v12, 1  ;;  %v2180_v32 = vrot.slane %v1017_v18, 1  ;;  %v2181_v33 = vrot.slane %v1019_v12, 2  ;;  %v3312_v12 = vld [vmem:[%s4542_s3 + $0x164] ss:$8 sps:$4 sm:$0xff]  }
  0xa2   : > { %1023 = vrot.lane.b32.xlu1 %v3801_v17, %s3596_s29  ;;  %v3806_v20 = vor.u32 %v1021_v19, %v1017_v18  ;;  %813 = vmatpush1.bf16.msra.mxu1 %v3240_v15  ;;  %v3843_v39 = vor.u32 %v2181_v33, %v2180_v32  ;;  %v3313_v15 = vld [vmem:[%s4542_s3 + $0x2e0] ss:$8 sps:$4 sm:$0xff]   ;;  %v3321_v18 = vld [vmem:[%s4542_s3 + $0x2f4] ss:$8 sps:$4 sm:$0xff]   ;;  %v3316_v19 = vld [vmem:[%s4542_s3 + $0x170] ss:$8 sps:$4 sm:$0xff]  }
  0xa3   : > { %814 = vmatprep.subr.bf16.mxu1 %v3248_v16  ;;  %v3318_v16 = vld [vmem:[%s4542_s3 + $0x174] ss:$8 sps:$4 sm:$0xff]  }
  0xa4   : > { %1025 = vrot.lane.b32.xlu0 %v3806_v20, %s3596_s29  ;;  %v3333_v32 = vld [vmem:[%s4542_s3 + $0x394] ss:$8 sps:$4 sm:$0xff]  }
  0xa6   : > { %1317 = vrot.lane.b32.xlu1 %v1316_v21, %s3596_s29  ;;  %815 = vmatpush1.bf16.msra.mxu1 %v3246_v22  ;;  %v3319_v21 = vld [vmem:[%s4542_s3 + $0x2f0] ss:$8 sps:$4 sm:$0xff]   ;;  %v3324_v22 = vld [vmem:[%s4542_s3 + $0x204] ss:$8 sps:$4 sm:$0xff]  }
  0xa7   : > { %816 = vmatprep.subr.bf16.mxu1 %v3254_v23  ;;  %v3327_v23 = vld [vmem:[%s4542_s3 + $0x384] ss:$8 sps:$4 sm:$0xff]  }
  0xa8   : > { %1604 = vrot.lane.b32.xlu0 %v1461_v24, %s3596_s29 }
  0xaa   : > { %1606 = vrot.lane.b32.xlu1 %v1603_v28, %s3596_s29  ;;  %817 = vmatpush1.bf16.msra.mxu1 %v3252_v25 }
  0xab   : > { %818 = vmatprep.subr.bf16.mxu1 %v3260_v27  ;;  %v3322_v27 = vld [vmem:[%s4542_s3 + $0x200] ss:$8 sps:$4 sm:$0xff]  }
  0xac   : > { %1892 = vrot.lane.b32.xlu0 %v1891_v29, %s3596_s29  ;;  %v3325_v29 = vld [vmem:[%s4542_s3 + $0x380] ss:$8 sps:$4 sm:$0xff]  }
  0xae   : > { %2183 = vrot.lane.b32.xlu1 %v3839_v38, %s3596_s29  ;;  %819 = vmatpush1.bf16.msra.mxu1 %v3258_v36  ;;  %v3336_v36 = vld [vmem:[%s4542_s3 + $0x224] ss:$8 sps:$4 sm:$0xff]  }
  0xaf   : > { %820 = vmatprep.subr.bf16.mxu1 %v3266_v37  ;;  %v3339_v37 = vld [vmem:[%s4542_s3 + $0x3a4] ss:$8 sps:$4 sm:$0xff]  }
  0xb0   : > { %2185 = vrot.lane.b32.xlu0 %v3843_v39, %s3596_s29 }
  0xb2   : > { %2473 = vrot.lane.b32.xlu1 %v2472_v40, %s3596_s29  ;;  %821 = vmatpush1.bf16.msra.mxu1 %v3264_v41  ;;  %v3334_v40 = vld [vmem:[%s4542_s3 + $0x220] ss:$8 sps:$4 sm:$0xff]  }
  0xb3   : > { %822 = vmatprep.subr.bf16.mxu1 %v3272_v42  ;;  %v3337_v41 = vld [vmem:[%s4542_s3 + $0x3a0] ss:$8 sps:$4 sm:$0xff]   ;;  %v3342_v42 = vld [vmem:[%s4542_s3 + $0x234] ss:$8 sps:$4 sm:$0xff]  }
  0xb6   : > { %823 = vmatpush1.bf16.msra.mxu1 %v3270_v43  ;;  %v3345_v43 = vld [vmem:[%s4542_s3 + $0x3b4] ss:$8 sps:$4 sm:$0xff]  }
  0xb7   : > { %1109 = vmatprep.subr.bf16.mxu1 %v3279_v44  ;;  %v3340_v44 = vld [vmem:[%s4542_s3 + $0x230] ss:$8 sps:$4 sm:$0xff]  }
 0x10b   : > { %v317_v45 = vpop.permute.xlu1 %316 }
 0x110   : > { %v319_v49 = vpop.permute.xlu1 %318 }
 0x111   : > { %v726_v52 = vsel %vm269_vm3, %v319_v49, %v725_v46  ;;  %v321_v53 = vsel %vm269_vm3, %v317_v45, %v319_v49  ;;  %v3343_v45 = vld [vmem:[%s4542_s3 + $0x3b0] ss:$8 sps:$4 sm:$0xff]   ;;  %v3348_v46 = vld [vmem:[%s4542_s3 + $0x244] ss:$8 sps:$4 sm:$0xff]   ;;  %v3349_v49 = vld [vmem:[%s4542_s3 + $0x3c0] ss:$8 sps:$4 sm:$0xff]  }
 0x112   : > { %436 = vmatmul.mubr.bf16.vlgmr.msra.gmra.mrb[0].mxu0 %v321_v53  ;;  %841 = vmatmul.mubr.bf16.vlgmr.msra.gmra.mrb[4].mxu1 %v726_v52  ;;  %v3352_v52 = vld [vmem:[%s4542_s3 + $0x250] ss:$8 sps:$4 sm:$0xff]  }
 0x113   : > { %663 = vmatpush1.bf16.msra.mxu0 %v3274_v47  ;;  %1110 = vmatpush1.bf16.msra.mxu1 %v3277_v48  ;;  %v3351_v47 = vld [vmem:[%s4542_s3 + $0x3c4] ss:$8 sps:$4 sm:$0xff]   ;;  %v3346_v48 = vld [vmem:[%s4542_s3 + $0x240] ss:$8 sps:$4 sm:$0xff]   ;;  %v3355_v53 = vld [vmem:[%s4542_s3 + $0x3d0] ss:$8 sps:$4 sm:$0xff]  }
 0x114   : > { %664 = vmatprep.subr.bf16.mxu0 %v3282_v50  ;;  %1111 = vmatprep.subr.bf16.mxu1 %v3285_v51  ;;  %v1024_v30 = vpop.permute.xlu1 %1023  ;;  %v3354_v50 = vld [vmem:[%s4542_s3 + $0x254] ss:$8 sps:$4 sm:$0xff]  }
 0x115   : > { %694 = vmatprep.mubr.bf16.mxu0 %v3595_v26  ;;  %1141 = vmatprep.mubr.bf16.mxu1 %v3595_v26  ;;  %v3357_v51 = vld [vmem:[%s4542_s3 + $0x3d4] ss:$8 sps:$4 sm:$0xff]  }
 0x116   : > { %v3960_v25 = vpop.permute.xlu0 %1025 }
 0x117   : > { %665 = vmatpush1.bf16.msra.mxu0 %v3280_v54  ;;  %1112 = vmatpush1.bf16.msra.mxu1 %v3283_v55  ;;  %v1027_v33 = vsel %vm269_vm3, %v1024_v30, %v3960_v25  ;;  %v3360_v54 = vld [vmem:[%s4542_s3 + $0x264] ss:$8 sps:$4 sm:$0xff]   ;;  %v3400_v30 = vld [vmem:[%s4542_s3 + $0x350] ss:$8 sps:$4 sm:$0xff]  }
 0x118   : > { %666 = vmatprep.subr.bf16.mxu0 %v3288_v56  ;;  %1113 = vmatprep.subr.bf16.mxu1 %v3291_v57  ;;  %v3363_v55 = vld [vmem:[%s4542_s3 + $0x3e4] ss:$8 sps:$4 sm:$0xff]   ;;  %v3358_v56 = vld [vmem:[%s4542_s3 + $0x260] ss:$8 sps:$4 sm:$0xff]  }
 0x119   : > { %v3361_v57 = vld [vmem:[%s4542_s3 + $0x3e0] ss:$8 sps:$4 sm:$0xff]  }
 0x11b   : > { %667 = vmatpush1.bf16.msra.mxu0 %v3286_v58  ;;  %1114 = vmatpush1.bf16.msra.mxu1 %v3289_v59  ;;  %v3366_v58 = vld [vmem:[%s4542_s3 + $0x274] ss:$8 sps:$4 sm:$0xff]  }
 0x11c   : > { %668 = vmatprep.subr.bf16.mxu0 %v3294_v60  ;;  %1115 = vmatprep.subr.bf16.mxu1 %v3297_v61  ;;  %v3369_v59 = vld [vmem:[%s4542_s3 + $0x3f4] ss:$8 sps:$4 sm:$0xff]   ;;  %v3364_v60 = vld [vmem:[%s4542_s3 + $0x270] ss:$8 sps:$4 sm:$0xff]  }
 0x11d   : > { %v3367_v61 = vld [vmem:[%s4542_s3 + $0x3f0] ss:$8 sps:$4 sm:$0xff]  }
 0x11f   : > { %669 = vmatpush1.bf16.msra.mxu0 %v3292_v62  ;;  %1116 = vmatpush1.bf16.msra.mxu1 %v3295_v63  ;;  %v3372_v62 = vld [vmem:[%s4542_s3 + $0x304] ss:$8 sps:$4 sm:$0xff]  }
 0x120   : > { %670 = vmatprep.subr.bf16.mxu0 %v3300_v1  ;;  %1117 = vmatprep.subr.bf16.mxu1 %v3303_v2  ;;  %v3375_v63 = vld [vmem:[%s4542_s3 + $0x484] ss:$8 sps:$4 sm:$0xff]   ;;  %v1318_v1 = vpop.permute.xlu1 %1317  ;;  %v3370_v2 = vld [vmem:[%s4542_s3 + $0x300] ss:$8 sps:$4 sm:$0xff]  }
 0x123   : > { %671 = vmatpush1.bf16.msra.mxu0 %v3298_v3  ;;  %1118 = vmatpush1.bf16.msra.mxu1 %v3301_v4  ;;  %v3373_v3 = vld [vmem:[%s4542_s3 + $0x480] ss:$8 sps:$4 sm:$0xff]   ;;  %v3378_v4 = vld [vmem:[%s4542_s3 + $0x314] ss:$8 sps:$4 sm:$0xff]  }
 0x124   : > { %672 = vmatprep.subr.bf16.mxu0 %v3306_v5  ;;  %1119 = vmatprep.subr.bf16.mxu1 %v3309_v6  ;;  %v3381_v5 = vld [vmem:[%s4542_s3 + $0x494] ss:$8 sps:$4 sm:$0xff]   ;;  %v1319_v6 = vsel %vm269_vm3, %v3960_v25, %v1318_v1  ;;  %v3397_v25 = vld [vmem:[%s4542_s3 + $0x4c0] ss:$8 sps:$4 sm:$0xff]   ;;  %v3444_v1 = vld [vmem:[%s4542_s3 + $0x444] ss:$8 sps:$4 sm:$0xff]  }
 0x127   : > { %673 = vmatpush1.bf16.msra.mxu0 %v3304_v10  ;;  %1120 = vmatpush1.bf16.msra.mxu1 %v3307_v11  ;;  %v3376_v10 = vld [vmem:[%s4542_s3 + $0x310] ss:$8 sps:$4 sm:$0xff]  }
 0x128   : > { %674 = vmatprep.subr.bf16.mxu0 %v3312_v12  ;;  %1121 = vmatprep.subr.bf16.mxu1 %v3315_v13  ;;  %v3379_v11 = vld [vmem:[%s4542_s3 + $0x490] ss:$8 sps:$4 sm:$0xff]   ;;  %v3384_v12 = vld [vmem:[%s4542_s3 + $0x324] ss:$8 sps:$4 sm:$0xff]   ;;  %v3382_v13 = vld [vmem:[%s4542_s3 + $0x320] ss:$8 sps:$4 sm:$0xff]  }
 0x12b   : > { %675 = vmatpush1.bf16.msra.mxu0 %v3310_v14  ;;  %1122 = vmatpush1.bf16.msra.mxu1 %v3313_v15  ;;  %v3385_v14 = vld [vmem:[%s4542_s3 + $0x4a0] ss:$8 sps:$4 sm:$0xff]   ;;  %v3390_v15 = vld [vmem:[%s4542_s3 + $0x334] ss:$8 sps:$4 sm:$0xff]  }
 0x12c   : > { %676 = vmatprep.subr.bf16.mxu0 %v3318_v16  ;;  %1123 = vmatprep.subr.bf16.mxu1 %v3321_v18  ;;  %v3393_v16 = vld [vmem:[%s4542_s3 + $0x4b4] ss:$8 sps:$4 sm:$0xff]   ;;  %v3388_v18 = vld [vmem:[%s4542_s3 + $0x330] ss:$8 sps:$4 sm:$0xff]  }
 0x12f   : > { %677 = vmatpush1.bf16.msra.mxu0 %v3316_v19  ;;  %1124 = vmatpush1.bf16.msra.mxu1 %v3319_v21  ;;  %v3391_v19 = vld [vmem:[%s4542_s3 + $0x4b0] ss:$8 sps:$4 sm:$0xff]   ;;  %v3396_v21 = vld [vmem:[%s4542_s3 + $0x344] ss:$8 sps:$4 sm:$0xff]  }
 0x130   : > { %956 = vmatprep.subr.bf16.mxu0 %v3324_v22  ;;  %1401 = vmatprep.subr.bf16.mxu1 %v3327_v23  ;;  %v3399_v22 = vld [vmem:[%s4542_s3 + $0x4c4] ss:$8 sps:$4 sm:$0xff]   ;;  %v3394_v23 = vld [vmem:[%s4542_s3 + $0x340] ss:$8 sps:$4 sm:$0xff]  }
 0x132   : > { %695 = vmatmul.mubr.bf16.vlgmr.msra.gmra.mrb[4].mxu0 %v3788_v7  ;;  %1142 = vmatmul.mubr.bf16.vlgmr.msra.gmra.mrb[8].mxu1 %v1027_v33  ;;  %v3411_v33 = vld [vmem:[%s4542_s3 + $0x4e4] ss:$8 sps:$4 sm:$0xff]  }
 0x133   : > { %957 = vmatpush1.bf16.msra.mxu0 %v3322_v27  ;;  %1402 = vmatpush1.bf16.msra.mxu1 %v3325_v29  ;;  %v3402_v27 = vld [vmem:[%s4542_s3 + $0x354] ss:$8 sps:$4 sm:$0xff]   ;;  %v3531_v7 = vld [vmem:[%s4542_s3 + $0x7a4] ss:$8 sps:$4 sm:$0xff]  }
 0x134   : > { %958 = vmatprep.subr.bf16.mxu0 %v3330_v31  ;;  %1403 = vmatprep.subr.bf16.mxu1 %v3333_v32  ;;  %v3405_v29 = vld [vmem:[%s4542_s3 + $0x4d4] ss:$8 sps:$4 sm:$0xff]   ;;  %v3403_v31 = vld [vmem:[%s4542_s3 + $0x4d0] ss:$8 sps:$4 sm:$0xff]   ;;  %v3408_v32 = vld [vmem:[%s4542_s3 + $0x364] ss:$8 sps:$4 sm:$0xff]  }
 0x135   : > { %988 = vmatprep.mubr.bf16.mxu0 %v3595_v26  ;;  %1433 = vmatprep.mubr.bf16.mxu1 %v3595_v26 }
 0x137   : > { %959 = vmatpush1.bf16.msra.mxu0 %v3328_v34  ;;  %1404 = vmatpush1.bf16.msra.mxu1 %v3331_v35  ;;  %v3406_v34 = vld [vmem:[%s4542_s3 + $0x360] ss:$8 sps:$4 sm:$0xff]  }
 0x138   : > { %960 = vmatprep.subr.bf16.mxu0 %v3336_v36  ;;  %1405 = vmatprep.subr.bf16.mxu1 %v3339_v37  ;;  %v3409_v35 = vld [vmem:[%s4542_s3 + $0x4e0] ss:$8 sps:$4 sm:$0xff]   ;;  %v3414_v36 = vld [vmem:[%s4542_s3 + $0x374] ss:$8 sps:$4 sm:$0xff]  }
 0x139   : > { %v3417_v37 = vld [vmem:[%s4542_s3 + $0x4f4] ss:$8 sps:$4 sm:$0xff]  }
 0x13b   : > { %961 = vmatpush1.bf16.msra.mxu0 %v3334_v40  ;;  %1406 = vmatpush1.bf16.msra.mxu1 %v3337_v41  ;;  %v3412_v40 = vld [vmem:[%s4542_s3 + $0x370] ss:$8 sps:$4 sm:$0xff]  }
 0x13c   : > { %962 = vmatprep.subr.bf16.mxu0 %v3342_v42  ;;  %1407 = vmatprep.subr.bf16.mxu1 %v3345_v43  ;;  %v3415_v41 = vld [vmem:[%s4542_s3 + $0x4f0] ss:$8 sps:$4 sm:$0xff]   ;;  %v3420_v43 = vld [vmem:[%s4542_s3 + $0x404] ss:$8 sps:$4 sm:$0xff]  }
 0x13f   : > { %963 = vmatpush1.bf16.msra.mxu0 %v3340_v44  ;;  %1408 = vmatpush1.bf16.msra.mxu1 %v3343_v45  ;;  %v3423_v44 = vld [vmem:[%s4542_s3 + $0x584] ss:$8 sps:$4 sm:$0xff]  }
 0x140   : > { %964 = vmatprep.subr.bf16.mxu0 %v3348_v46  ;;  %1409 = vmatprep.subr.bf16.mxu1 %v3351_v47  ;;  %v4168_v46 = vpop.permute.xlu1 %1606 }
 0x143   : > { %965 = vmatpush1.bf16.msra.mxu0 %v3346_v48  ;;  %1410 = vmatpush1.bf16.msra.mxu1 %v3349_v49  ;;  %v3418_v49 = vld [vmem:[%s4542_s3 + $0x400] ss:$8 sps:$4 sm:$0xff]  }
 0x144   : > { %966 = vmatprep.subr.bf16.mxu0 %v3354_v50  ;;  %1411 = vmatprep.subr.bf16.mxu1 %v3357_v51  ;;  %v3421_v50 = vld [vmem:[%s4542_s3 + $0x580] ss:$8 sps:$4 sm:$0xff]   ;;  %v1605_v51 = vpop.permute.xlu0 %1604 }
 0x147   : > { %967 = vmatpush1.bf16.msra.mxu0 %v3352_v52  ;;  %1412 = vmatpush1.bf16.msra.mxu1 %v3355_v53  ;;  %v3426_v52 = vld [vmem:[%s4542_s3 + $0x414] ss:$8 sps:$4 sm:$0xff]  }
 0x148   : > { %968 = vmatprep.subr.bf16.mxu0 %v3360_v54  ;;  %1413 = vmatprep.subr.bf16.mxu1 %v3363_v55  ;;  %v3429_v53 = vld [vmem:[%s4542_s3 + $0x594] ss:$8 sps:$4 sm:$0xff]   ;;  %v1608_v54 = vsel %vm269_vm3, %v1605_v51, %v4168_v46  ;;  %v3424_v55 = vld [vmem:[%s4542_s3 + $0x410] ss:$8 sps:$4 sm:$0xff]  }
 0x149   : > { %v3499_v51 = vld [vmem:[%s4542_s3 + $0x6d0] ss:$8 sps:$4 sm:$0xff]  }
 0x14b   : > { %969 = vmatpush1.bf16.msra.mxu0 %v3358_v56  ;;  %1414 = vmatpush1.bf16.msra.mxu1 %v3361_v57  ;;  %v3427_v56 = vld [vmem:[%s4542_s3 + $0x590] ss:$8 sps:$4 sm:$0xff]   ;;  %v3432_v57 = vld [vmem:[%s4542_s3 + $0x424] ss:$8 sps:$4 sm:$0xff]  }
 0x14c   : > { %970 = vmatprep.subr.bf16.mxu0 %v3366_v58  ;;  %1415 = vmatprep.subr.bf16.mxu1 %v3369_v59  ;;  %v3430_v58 = vld [vmem:[%s4542_s3 + $0x420] ss:$8 sps:$4 sm:$0xff]  }
 0x14d   : > { %v3433_v59 = vld [vmem:[%s4542_s3 + $0x5a0] ss:$8 sps:$4 sm:$0xff]  }
 0x14f   : > { %971 = vmatpush1.bf16.msra.mxu0 %v3364_v60  ;;  %1416 = vmatpush1.bf16.msra.mxu1 %v3367_v61  ;;  %v3438_v60 = vld [vmem:[%s4542_s3 + $0x434] ss:$8 sps:$4 sm:$0xff]  }
 0x150   : > { %1250 = vmatprep.subr.bf16.mxu0 %v3372_v62  ;;  %1690 = vmatprep.subr.bf16.mxu1 %v3375_v63  ;;  %v3441_v61 = vld [vmem:[%s4542_s3 + $0x5b4] ss:$8 sps:$4 sm:$0xff]   ;;  %v3436_v62 = vld [vmem:[%s4542_s3 + $0x430] ss:$8 sps:$4 sm:$0xff]  }
 0x151   : > { %v3439_v63 = vld [vmem:[%s4542_s3 + $0x5b0] ss:$8 sps:$4 sm:$0xff]  }
 0x152   : > { %989 = vmatmul.mubr.bf16.vlgmr.msra.gmra.mrb[8].mxu0 %v3801_v17  ;;  %1434 = vmatmul.mubr.bf16.vlgmr.msra.gmra.mrb[12].mxu1 %v1319_v6  ;;  %v3387_v17 = vld [vmem:[%s4542_s3 + $0x4a4] ss:$8 sps:$4 sm:$0xff]   ;;  %v3453_v6 = vld [vmem:[%s4542_s3 + $0x5d4] ss:$8 sps:$4 sm:$0xff]  }
 0x153   : > { %1251 = vmatpush1.bf16.msra.mxu0 %v3370_v2  ;;  %1691 = vmatpush1.bf16.msra.mxu1 %v3373_v3  ;;  %v3447_v2 = vld [vmem:[%s4542_s3 + $0x5c4] ss:$8 sps:$4 sm:$0xff]   ;;  %v3442_v3 = vld [vmem:[%s4542_s3 + $0x440] ss:$8 sps:$4 sm:$0xff]  }
 0x154   : > { %1252 = vmatprep.subr.bf16.mxu0 %v3378_v4  ;;  %1692 = vmatprep.subr.bf16.mxu1 %v3381_v5  ;;  %v3445_v4 = vld [vmem:[%s4542_s3 + $0x5c0] ss:$8 sps:$4 sm:$0xff]   ;;  %v3450_v5 = vld [vmem:[%s4542_s3 + $0x454] ss:$8 sps:$4 sm:$0xff]  }
 0x155   : > { %1282 = vmatprep.mubr.bf16.mxu0 %v3595_v26  ;;  %1722 = vmatprep.mubr.bf16.mxu1 %v3595_v26 }
 0x157   : > { %1253 = vmatpush1.bf16.msra.mxu0 %v3376_v10  ;;  %1693 = vmatpush1.bf16.msra.mxu1 %v3379_v11  ;;  %v3448_v10 = vld [vmem:[%s4542_s3 + $0x450] ss:$8 sps:$4 sm:$0xff]  }
 0x158   : > { %1254 = vmatprep.subr.bf16.mxu0 %v3384_v12  ;;  %1694 = vmatprep.subr.bf16.mxu1 %v3387_v17  ;;  %v3451_v11 = vld [vmem:[%s4542_s3 + $0x5d0] ss:$8 sps:$4 sm:$0xff]   ;;  %v3456_v12 = vld [vmem:[%s4542_s3 + $0x464] ss:$8 sps:$4 sm:$0xff]  }
 0x159   : > { %v3459_v17 = vld [vmem:[%s4542_s3 + $0x5e4] ss:$8 sps:$4 sm:$0xff]  }
 0x15b   : > { %1255 = vmatpush1.bf16.msra.mxu0 %v3382_v13  ;;  %1695 = vmatpush1.bf16.msra.mxu1 %v3385_v14  ;;  %v3454_v13 = vld [vmem:[%s4542_s3 + $0x460] ss:$8 sps:$4 sm:$0xff]  }
 0x15c   : > { %1256 = vmatprep.subr.bf16.mxu0 %v3390_v15  ;;  %1696 = vmatprep.subr.bf16.mxu1 %v3393_v16  ;;  %v3457_v14 = vld [vmem:[%s4542_s3 + $0x5e0] ss:$8 sps:$4 sm:$0xff]   ;;  %v3462_v15 = vld [vmem:[%s4542_s3 + $0x474] ss:$8 sps:$4 sm:$0xff]  }
 0x15d   : > { %v3465_v16 = vld [vmem:[%s4542_s3 + $0x5f4] ss:$8 sps:$4 sm:$0xff]  }
 0x15f   : > { %1257 = vmatpush1.bf16.msra.mxu0 %v3388_v18  ;;  %1697 = vmatpush1.bf16.msra.mxu1 %v3391_v19  ;;  %v3460_v18 = vld [vmem:[%s4542_s3 + $0x470] ss:$8 sps:$4 sm:$0xff]  }
 0x160   : > { %1258 = vmatprep.subr.bf16.mxu0 %v3396_v21  ;;  %1698 = vmatprep.subr.bf16.mxu1 %v3399_v22  ;;  %v3463_v19 = vld [vmem:[%s4542_s3 + $0x5f0] ss:$8 sps:$4 sm:$0xff]   ;;  %v3468_v21 = vld [vmem:[%s4542_s3 + $0x504] ss:$8 sps:$4 sm:$0xff]  }
 0x161   : > { %v3471_v22 = vld [vmem:[%s4542_s3 + $0x684] ss:$8 sps:$4 sm:$0xff]  }
 0x163   : > { %1259 = vmatpush1.bf16.msra.mxu0 %v3394_v23  ;;  %1699 = vmatpush1.bf16.msra.mxu1 %v3397_v25  ;;  %v1893_v23 = vpop.permute.xlu0 %1892  ;;  %v3466_v25 = vld [vmem:[%s4542_s3 + $0x500] ss:$8 sps:$4 sm:$0xff]  }
 0x164   : > { %1260 = vmatprep.subr.bf16.mxu0 %v3402_v27  ;;  %1700 = vmatprep.subr.bf16.mxu1 %v3405_v29  ;;  %v3469_v27 = vld [vmem:[%s4542_s3 + $0x680] ss:$8 sps:$4 sm:$0xff]   ;;  %v3474_v29 = vld [vmem:[%s4542_s3 + $0x514] ss:$8 sps:$4 sm:$0xff]  }
 0x167   : > { %1261 = vmatpush1.bf16.msra.mxu0 %v3400_v30  ;;  %1701 = vmatpush1.bf16.msra.mxu1 %v3403_v31  ;;  %v3477_v30 = vld [vmem:[%s4542_s3 + $0x694] ss:$8 sps:$4 sm:$0xff]   ;;  %v1894_v31 = vsel %vm269_vm3, %v4168_v46, %v1893_v23  ;;  %v3490_v46 = vld [vmem:[%s4542_s3 + $0x540] ss:$8 sps:$4 sm:$0xff]   ;;  %v3544_v23 = vld [vmem:[%s4542_s3 + $0x650] ss:$8 sps:$4 sm:$0xff]  }
 0x168   : > { %1262 = vmatprep.subr.bf16.mxu0 %v3408_v32  ;;  %1702 = vmatprep.subr.bf16.mxu1 %v3411_v33  ;;  %v3472_v32 = vld [vmem:[%s4542_s3 + $0x510] ss:$8 sps:$4 sm:$0xff]  }
 0x169   : > { %v3475_v33 = vld [vmem:[%s4542_s3 + $0x690] ss:$8 sps:$4 sm:$0xff]  }
 0x16b   : > { %1263 = vmatpush1.bf16.msra.mxu0 %v3406_v34  ;;  %1703 = vmatpush1.bf16.msra.mxu1 %v3409_v35  ;;  %v3480_v34 = vld [vmem:[%s4542_s3 + $0x524] ss:$8 sps:$4 sm:$0xff]   ;;  %v3481_v35 = vld [vmem:[%s4542_s3 + $0x6a0] ss:$8 sps:$4 sm:$0xff]  }
 0x16c   : > { %v4158_v42 = vpop.f32.mrb[0].mxu1  ;;  %1264 = vmatprep.subr.bf16.mxu0 %v3414_v36  ;;  %1704 = vmatprep.subr.bf16.mxu1 %v3417_v37  ;;  %v3486_v36 = vld [vmem:[%s4542_s3 + $0x534] ss:$8 sps:$4 sm:$0xff]  }
 0x16d   : > { %v4166_v45 = vpop.f32.mrb[1].mxu1  ;;  %v3489_v37 = vld [vmem:[%s4542_s3 + $0x6b4] ss:$8 sps:$4 sm:$0xff]  }
 0x16e   : > { %v562_v47 = vpop.f32.mrb[2].mxu1 }
 0x16f   : > { %1265 = vmatpush1.bf16.msra.mxu0 %v3412_v40  ;;  %1705 = vmatpush1.bf16.msra.mxu1 %v3415_v41  ;;  %v563_v48 = vpop.f32.mrb[3].mxu1  ;;  %v3484_v40 = vld [vmem:[%s4542_s3 + $0x530] ss:$8 sps:$4 sm:$0xff]   ;;  %v3493_v47 = vld [vmem:[%s4542_s3 + $0x6c0] ss:$8 sps:$4 sm:$0xff]  }
 0x170   : > { %1543 = vmatprep.subr.bf16.mxu0 %v3420_v43  ;;  %1976 = vmatprep.subr.bf16.mxu1 %v3423_v44  ;;  %v3487_v41 = vld [vmem:[%s4542_s3 + $0x6b0] ss:$8 sps:$4 sm:$0xff]   ;;  %v3492_v43 = vld [vmem:[%s4542_s3 + $0x544] ss:$8 sps:$4 sm:$0xff]   ;;  %v3498_v48 = vld [vmem:[%s4542_s3 + $0x554] ss:$8 sps:$4 sm:$0xff]  }
 0x171   : > { %v3495_v44 = vld [vmem:[%s4542_s3 + $0x6c4] ss:$8 sps:$4 sm:$0xff]  }
 0x172   : > { %1283 = vmatmul.mubr.bf16.vlgmr.msra.gmra.mrb[12].mxu0 %v3806_v20  ;;  %1723 = vmatmul.mubr.bf16.vlgmr.msra.gmra.mrb[16].mxu1 %v1608_v54  ;;  %v3435_v20 = vld [vmem:[%s4542_s3 + $0x5a4] ss:$8 sps:$4 sm:$0xff]   ;;  %v3502_v54 = vld [vmem:[%s4542_s3 + $0x560] ss:$8 sps:$4 sm:$0xff]  }
 0x173   : > { %1544 = vmatpush1.bf16.msra.mxu0 %v3418_v49  ;;  %1977 = vmatpush1.bf16.msra.mxu1 %v3421_v50  ;;  %v3501_v49 = vld [vmem:[%s4542_s3 + $0x6d4] ss:$8 sps:$4 sm:$0xff]   ;;  %v3496_v50 = vld [vmem:[%s4542_s3 + $0x550] ss:$8 sps:$4 sm:$0xff]  }
 0x174   : > { %1545 = vmatprep.subr.bf16.mxu0 %v3426_v52  ;;  %1978 = vmatprep.subr.bf16.mxu1 %v3429_v53  ;;  %v3504_v52 = vld [vmem:[%s4542_s3 + $0x564] ss:$8 sps:$4 sm:$0xff]  }
 0x175   : > { %1575 = vmatprep.mubr.bf16.mxu0 %v3595_v26  ;;  %2008 = vmatprep.mubr.bf16.mxu1 %v3595_v26  ;;  %v3507_v53 = vld [vmem:[%s4542_s3 + $0x6e4] ss:$8 sps:$4 sm:$0xff]  }
 0x177   : > { %1546 = vmatpush1.bf16.msra.mxu0 %v3424_v55  ;;  %1979 = vmatpush1.bf16.msra.mxu1 %v3427_v56  ;;  %v3505_v55 = vld [vmem:[%s4542_s3 + $0x6e0] ss:$8 sps:$4 sm:$0xff]   ;;  %v3510_v56 = vld [vmem:[%s4542_s3 + $0x574] ss:$8 sps:$4 sm:$0xff]  }
 0x178   : > { %1547 = vmatprep.subr.bf16.mxu0 %v3432_v57  ;;  %1980 = vmatprep.subr.bf16.mxu1 %v3435_v20  ;;  %v3513_v57 = vld [vmem:[%s4542_s3 + $0x6f4] ss:$8 sps:$4 sm:$0xff]   ;;  %v3508_v20 = vld [vmem:[%s4542_s3 + $0x570] ss:$8 sps:$4 sm:$0xff]  }
 0x17b   : > { %1548 = vmatpush1.bf16.msra.mxu0 %v3430_v58  ;;  %1981 = vmatpush1.bf16.msra.mxu1 %v3433_v59  ;;  %v3511_v58 = vld [vmem:[%s4542_s3 + $0x6f0] ss:$8 sps:$4 sm:$0xff]   ;;  %v3516_v59 = vld [vmem:[%s4542_s3 + $0x604] ss:$8 sps:$4 sm:$0xff]  }
 0x17c   : > { %1549 = vmatprep.subr.bf16.mxu0 %v3438_v60  ;;  %1982 = vmatprep.subr.bf16.mxu1 %v3441_v61  ;;  %v3519_v60 = vld [vmem:[%s4542_s3 + $0x784] ss:$8 sps:$4 sm:$0xff]   ;;  %v4373_v61 = vpop.permute.xlu0 %2185 }
 0x17f   : > { %1550 = vmatpush1.bf16.msra.mxu0 %v3436_v62  ;;  %1983 = vmatpush1.bf16.msra.mxu1 %v3439_v63  ;;  %v3514_v62 = vld [vmem:[%s4542_s3 + $0x600] ss:$8 sps:$4 sm:$0xff]  }
 0x180   : > { %1551 = vmatprep.subr.bf16.mxu0 %v3444_v1  ;;  %1984 = vmatprep.subr.bf16.mxu1 %v3447_v2  ;;  %v3517_v63 = vld [vmem:[%s4542_s3 + $0x780] ss:$8 sps:$4 sm:$0xff]   ;;  %v2184_v1 = vpop.permute.xlu1 %2183  ;;  %v3522_v2 = vld [vmem:[%s4542_s3 + $0x614] ss:$8 sps:$4 sm:$0xff]  }
 0x183   : > { %1552 = vmatpush1.bf16.msra.mxu0 %v3442_v3  ;;  %1985 = vmatpush1.bf16.msra.mxu1 %v3445_v4  ;;  %v3525_v3 = vld [vmem:[%s4542_s3 + $0x794] ss:$8 sps:$4 sm:$0xff]   ;;  %v2187_v4 = vsel %vm269_vm3, %v2184_v1, %v4373_v61 }
 0x184   : > { %1553 = vmatprep.subr.bf16.mxu0 %v3450_v5  ;;  %1986 = vmatprep.subr.bf16.mxu1 %v3453_v6  ;;  %v3520_v5 = vld [vmem:[%s4542_s3 + $0x610] ss:$8 sps:$4 sm:$0xff]  }
 0x185   : > { %v3523_v6 = vld [vmem:[%s4542_s3 + $0x790] ss:$8 sps:$4 sm:$0xff]  }
 0x187   : > { %1554 = vmatpush1.bf16.msra.mxu0 %v3448_v10  ;;  %1987 = vmatpush1.bf16.msra.mxu1 %v3451_v11  ;;  %v3528_v10 = vld [vmem:[%s4542_s3 + $0x624] ss:$8 sps:$4 sm:$0xff]   ;;  %v3529_v11 = vld [vmem:[%s4542_s3 + $0x7a0] ss:$8 sps:$4 sm:$0xff]  }
 0x188   : > { %1555 = vmatprep.subr.bf16.mxu0 %v3456_v12  ;;  %1988 = vmatprep.subr.bf16.mxu1 %v3459_v17  ;;  %v3534_v12 = vld [vmem:[%s4542_s3 + $0x634] ss:$8 sps:$4 sm:$0xff]  }
 0x189   : > { %v3537_v17 = vld [vmem:[%s4542_s3 + $0x7b4] ss:$8 sps:$4 sm:$0xff]  }
 0x18b   : > { %1556 = vmatpush1.bf16.msra.mxu0 %v3454_v13  ;;  %1989 = vmatpush1.bf16.msra.mxu1 %v3457_v14  ;;  %v3532_v13 = vld [vmem:[%s4542_s3 + $0x630] ss:$8 sps:$4 sm:$0xff]  }
 0x18c   : > { %1557 = vmatprep.subr.bf16.mxu0 %v3462_v15  ;;  %1990 = vmatprep.subr.bf16.mxu1 %v3465_v16  ;;  %v3535_v14 = vld [vmem:[%s4542_s3 + $0x7b0] ss:$8 sps:$4 sm:$0xff]   ;;  %v3540_v15 = vld [vmem:[%s4542_s3 + $0x644] ss:$8 sps:$4 sm:$0xff]  }
 0x18d   : > { %v3543_v16 = vld [vmem:[%s4542_s3 + $0x7c4] ss:$8 sps:$4 sm:$0xff]  }
 0x18f   : > { %1558 = vmatpush1.bf16.msra.mxu0 %v3460_v18  ;;  %1991 = vmatpush1.bf16.msra.mxu1 %v3463_v19  ;;  %v3538_v18 = vld [vmem:[%s4542_s3 + $0x640] ss:$8 sps:$4 sm:$0xff]  }
 0x190   : > { %1831 = vmatprep.subr.bf16.mxu0 %v3468_v21  ;;  %2269 = vmatprep.subr.bf16.mxu1 %v3471_v22  ;;  %v3541_v19 = vld [vmem:[%s4542_s3 + $0x7c0] ss:$8 sps:$4 sm:$0xff]   ;;  %v3546_v21 = vld [vmem:[%s4542_s3 + $0x654] ss:$8 sps:$4 sm:$0xff]  }
 0x191   : > { %v3549_v22 = vld [vmem:[%s4542_s3 + $0x7d4] ss:$8 sps:$4 sm:$0xff]  }
 0x192   : > { %1576 = vmatmul.mubr.bf16.vlgmr.msra.gmra.mrb[16].mxu0 %v1461_v24  ;;  %2009 = vmatmul.mubr.bf16.vlgmr.msra.gmra.mrb[20].mxu1 %v1894_v31  ;;  %v3478_v24 = vld [vmem:[%s4542_s3 + $0x520] ss:$8 sps:$4 sm:$0xff]  }
 0x193   : > { %1832 = vmatpush1.bf16.msra.mxu0 %v3466_v25  ;;  %2270 = vmatpush1.bf16.msra.mxu1 %v3469_v27  ;;  %v3547_v25 = vld [vmem:[%s4542_s3 + $0x7d0] ss:$8 sps:$4 sm:$0xff]   ;;  %v3552_v27 = vld [vmem:[%s4542_s3 + $0x664] ss:$8 sps:$4 sm:$0xff]   ;;  %v3553_v31 = vld [vmem:[%s4542_s3 + $0x7e0] ss:$8 sps:$4 sm:$0xff]  }
 0x194   : > { %1833 = vmatprep.subr.bf16.mxu0 %v3474_v29  ;;  %2271 = vmatprep.subr.bf16.mxu1 %v3477_v30  ;;  %v3555_v29 = vld [vmem:[%s4542_s3 + $0x7e4] ss:$8 sps:$4 sm:$0xff]   ;;  %v3550_v30 = vld [vmem:[%s4542_s3 + $0x660] ss:$8 sps:$4 sm:$0xff]  }
 0x195   : > { %1863 = vmatprep.mubr.bf16.mxu0 %v3595_v26  ;;  %2301 = vmatprep.mubr.bf16.mxu1 %v3595_v26 }
 0x197   : > { %1834 = vmatpush1.bf16.msra.mxu0 %v3472_v32  ;;  %2272 = vmatpush1.bf16.msra.mxu1 %v3475_v33  ;;  %v3558_v32 = vld [vmem:[%s4542_s3 + $0x674] ss:$8 sps:$4 sm:$0xff]  }
 0x198   : > { %1835 = vmatprep.subr.bf16.mxu0 %v3480_v34  ;;  %2273 = vmatprep.subr.bf16.mxu1 %v3483_v0  ;;  %v3561_v33 = vld [vmem:[%s4542_s3 + $0x7f4] ss:$8 sps:$4 sm:$0xff]   ;;  %v3556_v34 = vld [vmem:[%s4542_s3 + $0x670] ss:$8 sps:$4 sm:$0xff]  }
 0x199   : > { %v3559_v0 = vld [vmem:[%s4542_s3 + $0x7f0] ss:$8 sps:$4 sm:$0xff]  }
 0x19b   : > { %1836 = vmatpush1.bf16.msra.mxu0 %v3478_v24  ;;  %2274 = vmatpush1.bf16.msra.mxu1 %v3481_v35  ;;  %v3564_v24 = vld [vmem:[%s4542_s3 + $0x704] ss:$8 sps:$4 sm:$0xff]   ;;  %v2474_v35 = vpop.permute.xlu1 %2473 }
 0x19c   : > { %1837 = vmatprep.subr.bf16.mxu0 %v3486_v36  ;;  %2275 = vmatprep.subr.bf16.mxu1 %v3489_v37  ;;  %v3562_v36 = vld [vmem:[%s4542_s3 + $0x700] ss:$8 sps:$4 sm:$0xff]   ;;  %v3567_v37 = vld [vmem:[%s4542_s3 + $0x714] ss:$8 sps:$4 sm:$0xff]  }
 0x19f   : > { %1838 = vmatpush1.bf16.msra.mxu0 %v3484_v40  ;;  %2276 = vmatpush1.bf16.msra.mxu1 %v3487_v41  ;;  %v2475_v40 = vsel %vm269_vm3, %v4373_v61, %v2474_v35  ;;  %v3565_v41 = vld [vmem:[%s4542_s3 + $0x710] ss:$8 sps:$4 sm:$0xff]   ;;  %v3585_v61 = vld [vmem:[%s4542_s3 + $0x774] ss:$8 sps:$4 sm:$0xff]  }
 0x1a0   : > { %1839 = vmatprep.subr.bf16.mxu0 %v3492_v43  ;;  %2277 = vmatprep.subr.bf16.mxu1 %v3495_v44  ;;  %v3570_v43 = vld [vmem:[%s4542_s3 + $0x724] ss:$8 sps:$4 sm:$0xff]   ;;  %v3568_v44 = vld [vmem:[%s4542_s3 + $0x720] ss:$8 sps:$4 sm:$0xff]  }
 0x1a3   : > { %1840 = vmatpush1.bf16.msra.mxu0 %v3490_v46  ;;  %2278 = vmatpush1.bf16.msra.mxu1 %v3493_v47  ;;  %v3576_v46 = vld [vmem:[%s4542_s3 + $0x744] ss:$8 sps:$4 sm:$0xff]   ;;  %v3574_v47 = vld [vmem:[%s4542_s3 + $0x740] ss:$8 sps:$4 sm:$0xff]  }
 0x1a4   : > { %1841 = vmatprep.subr.bf16.mxu0 %v3498_v48  ;;  %2279 = vmatprep.subr.bf16.mxu1 %v3501_v49  ;;  %v3579_v48 = vld [vmem:[%s4542_s3 + $0x754] ss:$8 sps:$4 sm:$0xff]   ;;  %v3577_v49 = vld [vmem:[%s4542_s3 + $0x750] ss:$8 sps:$4 sm:$0xff]  }
 0x1a7   : > { %1842 = vmatpush1.bf16.msra.mxu0 %v3496_v50  ;;  %2280 = vmatpush1.bf16.msra.mxu1 %v3499_v51  ;;  %v3582_v50 = vld [vmem:[%s4542_s3 + $0x764] ss:$8 sps:$4 sm:$0xff]  }
 0x1a8   : > { %1843 = vmatprep.subr.bf16.mxu0 %v3504_v52  ;;  %2281 = vmatprep.subr.bf16.mxu1 %v3507_v53 }
 0x1ab   : > { %1844 = vmatpush1.bf16.msra.mxu0 %v3502_v54  ;;  %2282 = vmatpush1.bf16.msra.mxu1 %v3505_v55 }
 0x1ac   : > { %1845 = vmatprep.subr.bf16.mxu0 %v3510_v56  ;;  %2283 = vmatprep.subr.bf16.mxu1 %v3513_v57 }
 0x1af   : > { %1846 = vmatpush1.bf16.msra.mxu0 %v3508_v20  ;;  %2284 = vmatpush1.bf16.msra.mxu1 %v3511_v58  ;;  %v3580_v58 = vld [vmem:[%s4542_s3 + $0x760] ss:$8 sps:$4 sm:$0xff]  }
 0x1b0   : > { %2120 = vmatprep.subr.bf16.mxu0 %v3516_v59  ;;  %2557 = vmatprep.subr.bf16.mxu1 %v3519_v60 }
 0x1b2   : > { %1864 = vmatmul.mubr.bf16.vlgmr.msra.gmra.mrb[20].mxu0 %v1603_v28  ;;  %2302 = vmatmul.mubr.bf16.vlgmr.msra.gmra.mrb[24].mxu1 %v2187_v4  ;;  %v3526_v28 = vld [vmem:[%s4542_s3 + $0x620] ss:$8 sps:$4 sm:$0xff]  }
 0x1b3   : > { %2121 = vmatpush1.bf16.msra.mxu0 %v3514_v62  ;;  %2558 = vmatpush1.bf16.msra.mxu1 %v3517_v63 }
 0x1b4   : > { %2122 = vmatprep.subr.bf16.mxu0 %v3522_v2  ;;  %2559 = vmatprep.subr.bf16.mxu1 %v3525_v3 }
 0x1b5   : > { %2152 = vmatprep.mubr.bf16.mxu0 %v3595_v26  ;;  %2589 = vmatprep.mubr.bf16.mxu1 %v3595_v26 }
 0x1b7   : > { %2123 = vmatpush1.bf16.msra.mxu0 %v3520_v5  ;;  %2560 = vmatpush1.bf16.msra.mxu1 %v3523_v6 }
 0x1b8   : > { %2124 = vmatprep.subr.bf16.mxu0 %v3528_v10  ;;  %2561 = vmatprep.subr.bf16.mxu1 %v3531_v7 }
 0x1bb   : > { %2125 = vmatpush1.bf16.msra.mxu0 %v3526_v28  ;;  %2562 = vmatpush1.bf16.msra.mxu1 %v3529_v11 }
 0x1bc   : > { %2126 = vmatprep.subr.bf16.mxu0 %v3534_v12  ;;  %2563 = vmatprep.subr.bf16.mxu1 %v3537_v17 }
 0x1bf   : > { %2127 = vmatpush1.bf16.msra.mxu0 %v3532_v13  ;;  %2564 = vmatpush1.bf16.msra.mxu1 %v3535_v14 }
 0x1c0   : > { %2128 = vmatprep.subr.bf16.mxu0 %v3540_v15  ;;  %2565 = vmatprep.subr.bf16.mxu1 %v3543_v16 }
 0x1c3   : > { %2129 = vmatpush1.bf16.msra.mxu0 %v3538_v18  ;;  %2566 = vmatpush1.bf16.msra.mxu1 %v3541_v19 }
 0x1c4   : > { %2130 = vmatprep.subr.bf16.mxu0 %v3546_v21  ;;  %2567 = vmatprep.subr.bf16.mxu1 %v3549_v22 }
 0x1c7   : > { %2131 = vmatpush1.bf16.msra.mxu0 %v3544_v23  ;;  %2568 = vmatpush1.bf16.msra.mxu1 %v3547_v25 }
 0x1c8   : > { %2132 = vmatprep.subr.bf16.mxu0 %v3552_v27  ;;  %2569 = vmatprep.subr.bf16.mxu1 %v3555_v29 }
 0x1cb   : > { %2133 = vmatpush1.bf16.msra.mxu0 %v3550_v30  ;;  %2570 = vmatpush1.bf16.msra.mxu1 %v3553_v31 }
 0x1cc   : > { %2134 = vmatprep.subr.bf16.mxu0 %v3558_v32  ;;  %2571 = vmatprep.subr.bf16.mxu1 %v3561_v33 }
 0x1cf   : > { %2135 = vmatpush1.bf16.msra.mxu0 %v3556_v34  ;;  %2572 = vmatpush1.bf16.msra.mxu1 %v3559_v0 }
 0x1d0   : > { %2410 = vmatprep.subr.bf16.mxu0 %v3564_v24 }
 0x1d2   : > { %2153 = vmatmul.mubr.bf16.vlgmr.msra.gmra.mrb[24].mxu0 %v3839_v38  ;;  %2590 = vmatmul.mubr.bf16.vlgmr.msra.gmra.mrb[28].mxu1 %v2475_v40  ;;  %v3573_v38 = vld [vmem:[%s4542_s3 + $0x734] ss:$8 sps:$4 sm:$0xff]  }
 0x1d3   : > { %2411 = vmatpush1.bf16.msra.mxu0 %v3562_v36  ;;  %2442 = vmatprep.mubr.bf16.mxu0 %v3595_v26  ;;  %v3571_v26 = vld [vmem:[%s4542_s3 + $0x730] ss:$8 sps:$4 sm:$0xff]  }
 0x1d4   : > { %2412 = vmatprep.subr.bf16.mxu0 %v3567_v37 }
 0x1d7   : > { %2413 = vmatpush1.bf16.msra.mxu0 %v3565_v41 }
 0x1d8   : > { %2414 = vmatprep.subr.bf16.mxu0 %v3570_v43 }
 0x1db   : > { %2415 = vmatpush1.bf16.msra.mxu0 %v3568_v44 }
 0x1dc   : > { %2416 = vmatprep.subr.bf16.mxu0 %v3573_v38 }
 0x1df   : > { %2417 = vmatpush1.bf16.msra.mxu0 %v3571_v26 }
 0x1e0   : > { %2418 = vmatprep.subr.bf16.mxu0 %v3576_v46 }
 0x1e3   : > { %2419 = vmatpush1.bf16.msra.mxu0 %v3574_v47 }
 0x1e4   : > { %2420 = vmatprep.subr.bf16.mxu0 %v3579_v48 }
 0x1e5   : > { %v437_v51 = vpop.f32.mrb[0].mxu0  ;;  %v842_v52 = vpop.f32.mrb[4].mxu1 }
 0x1e6   : > { %v559_v53 = vadd.f32 %v4158_v42, %v437_v51  ;;  %v439_v54 = vpop.f32.mrb[1].mxu0  ;;  %v844_v55 = vpop.f32.mrb[5].mxu1  ;;  %v3583_v42 = vld [vmem:[%s4542_s3 + $0x770] ss:$8 sps:$4 sm:$0xff]  }
 0x1e7   : > { %v561_v56 = vadd.f32 %v4166_v45, %v439_v54  ;;  %2421 = vmatpush1.bf16.msra.mxu0 %v3577_v49  ;;  %v441_v57 = vpop.f32.mrb[2].mxu0  ;;  %v846_v20 = vpop.f32.mrb[6].mxu1 }
 0x1e8   : > { %v442_v59 = vpop.f32.mrb[3].mxu0  ;;  %v847_v60 = vpop.f32.mrb[7].mxu1  ;;  %2422 = vmatprep.subr.bf16.mxu0 %v3582_v50 }
 0x1eb   : > { %2423 = vmatpush1.bf16.msra.mxu0 %v3580_v58 }
 0x1ec   : > { %2424 = vmatprep.subr.bf16.mxu0 %v3585_v61 }
 0x1ef   : > { %2425 = vmatpush1.bf16.msra.mxu0 %v3583_v42 }
 0x1f2   : > { %2443 = vmatmul.mubr.bf16.vlgmr.msra.gmra.mrb[28].mxu0 %v3843_v39 }
 0x205   : > { %v696_v45 = vpop.f32.mrb[4].mxu0  ;;  %v1143_v62 = vpop.f32.mrb[8].mxu1 }
 0x206   : > { %v703_v63 = vadd.f32 %v696_v45, %v559_v53  ;;  %v698_v1 = vpop.f32.mrb[5].mxu0  ;;  %v1145_v2 = vpop.f32.mrb[9].mxu1 }
 0x207   : > { %v704_v3 = vadd.f32 %v698_v1, %v561_v56  ;;  %v700_v4 = vpop.f32.mrb[6].mxu0  ;;  %v1147_v5 = vpop.f32.mrb[10].mxu1 }
 0x208   : > { %v701_v6 = vpop.f32.mrb[7].mxu0  ;;  %v1148_v10 = vpop.f32.mrb[11].mxu1  ;;  %v849_v7 = vadd.f32 %v842_v52, %v703_v63 }
 0x209   : > { %v850_v28 = vadd.f32 %v844_v55, %v704_v3 }
 0x225   : > { %v990_v11 = vpop.f32.mrb[8].mxu0  ;;  %v1435_v12 = vpop.f32.mrb[12].mxu1 }
 0x226   : > { %v997_v17 = vadd.f32 %v990_v11, %v849_v7  ;;  %v992_v13 = vpop.f32.mrb[9].mxu0  ;;  %v1437_v14 = vpop.f32.mrb[13].mxu1  ;;  %v2600_v7 = vld [vmem:[%s4543_s4] sm:$0x3] }
 0x227   : > { %v998_v15 = vadd.f32 %v992_v13, %v850_v28  ;;  %v994_v16 = vpop.f32.mrb[10].mxu0  ;;  %v1439_v39 = vpop.f32.mrb[14].mxu1 }
 0x228   : > { %v995_v18 = vpop.f32.mrb[11].mxu0  ;;  %v1440_v19 = vpop.f32.mrb[15].mxu1  ;;  %v1150_v21 = vadd.f32 %v1143_v62, %v997_v17 }
 0x229   : > { %v1151_v22 = vadd.f32 %v1145_v2, %v998_v15 }
 0x245   : > { %v1284_v23 = vpop.f32.mrb[12].mxu0  ;;  %v1724_v25 = vpop.f32.mrb[16].mxu1 }
 0x246   : > { %v1291_v27 = vadd.f32 %v1284_v23, %v1150_v21  ;;  %v1286_v29 = vpop.f32.mrb[13].mxu0  ;;  %v1726_v30 = vpop.f32.mrb[17].mxu1 }
 0x247   : > { %v1292_v31 = vadd.f32 %v1286_v29, %v1151_v22  ;;  %v1288_v32 = vpop.f32.mrb[14].mxu0  ;;  %v1728_v33 = vpop.f32.mrb[18].mxu1 }
 0x248   : > { %v1289_v34 = vpop.f32.mrb[15].mxu0  ;;  %v1729_v0 = vpop.f32.mrb[19].mxu1  ;;  %v1442_v24 = vadd.f32 %v1435_v12, %v1291_v27  ;;  %v2605_v12 = vrot.slane %v2600_v7, %v3653_v8 }
 0x249   : > { %v1443_v35 = vadd.f32 %v1437_v14, %v1292_v31  ;;  %v2609_v14 = vrot.slane %v2600_v7, %v3655_v9 }
 0x265   : > { %v1577_v36 = vpop.f32.mrb[16].mxu0  ;;  %v2010_v37 = vpop.f32.mrb[20].mxu1 }
 0x266   : > { %v1584_v40 = vadd.f32 %v1577_v36, %v1442_v24  ;;  %v1579_v41 = vpop.f32.mrb[17].mxu0  ;;  %v2012_v43 = vpop.f32.mrb[21].mxu1 }
 0x267   : > { %v1585_v44 = vadd.f32 %v1579_v41, %v1443_v35  ;;  %v1581_v38 = vpop.f32.mrb[18].mxu0  ;;  %v2014_v26 = vpop.f32.mrb[22].mxu1 }
 0x268   : > { %v1582_v46 = vpop.f32.mrb[19].mxu0  ;;  %v2015_v47 = vpop.f32.mrb[23].mxu1  ;;  %v1731_v48 = vadd.f32 %v1724_v25, %v1584_v40 }
 0x269   : > { %v1732_v49 = vadd.f32 %v1726_v30, %v1585_v44 }
 0x285   : > { %v1865_v50 = vpop.f32.mrb[20].mxu0  ;;  %v2303_v51 = vpop.f32.mrb[24].mxu1 }
 0x286   : > { %v1872_v52 = vadd.f32 %v1865_v50, %v1731_v48  ;;  %v1867_v53 = vpop.f32.mrb[21].mxu0  ;;  %v2305_v54 = vpop.f32.mrb[25].mxu1 }
 0x287   : > { %v1873_v55 = vadd.f32 %v1867_v53, %v1732_v49  ;;  %v1869_v56 = vpop.f32.mrb[22].mxu0  ;;  %v2307_v57 = vpop.f32.mrb[26].mxu1 }
 0x288   : > { %v1870_v20 = vpop.f32.mrb[23].mxu0  ;;  %v2308_v58 = vpop.f32.mrb[27].mxu1  ;;  %v2017_v59 = vadd.f32 %v2010_v37, %v1872_v52 }
 0x289   : > { %v2018_v60 = vadd.f32 %v2012_v43, %v1873_v55 }
 0x2a5   : > { %v2154_v61 = vpop.f32.mrb[24].mxu0  ;;  %v2591_v42 = vpop.f32.mrb[28].mxu1 }
 0x2a6   : > { %v2161_v45 = vadd.f32 %v2154_v61, %v2017_v59  ;;  %v2156_v62 = vpop.f32.mrb[25].mxu0  ;;  %v2593_v63 = vpop.f32.mrb[29].mxu1 }
 0x2a7   : > { %v2162_v1 = vadd.f32 %v2156_v62, %v2018_v60  ;;  %v2158_v2 = vpop.f32.mrb[26].mxu0  ;;  %v2595_v3 = vpop.f32.mrb[30].mxu1 }
 0x2a8   : > { %v2159_v4 = vpop.f32.mrb[27].mxu0  ;;  %v2596_v5 = vpop.f32.mrb[31].mxu1  ;;  %v2310_v6 = vadd.f32 %v2303_v51, %v2161_v45 }
 0x2a9   : > { %v2311_v10 = vadd.f32 %v2305_v54, %v2162_v1 }
 0x2c5   : > { %v2444_v28 = vpop.f32.mrb[28].mxu0 }
 0x2c6   : > { %v2451_v11 = vadd.f32 %v2444_v28, %v2310_v6  ;;  %v2446_v17 = vpop.f32.mrb[29].mxu0 }
 0x2c7   : > { %v2452_v13 = vadd.f32 %v2446_v17, %v2311_v10  ;;  %v2448_v15 = vpop.f32.mrb[30].mxu0 }
 0x2c8   : > { %v2598_v16 = vadd.f32 %v2591_v42, %v2451_v11  ;;  %v2449_v39 = vpop.f32.mrb[31].mxu0 }
 0x2c9   : > { %v2599_v18 = vadd.f32 %v2593_v63, %v2452_v13 }
 0x2ca   : > { %v2612_v19 = vadd.f32 %v2605_v12, %v2598_v16 }
 0x2cb   : > { %v2613_v21 = vadd.f32 %v2609_v14, %v2599_v18 }
 0x2cd   : > { %v2616_v22 = vcombine.low %v2612_v19, %v2613_v21 }
 0x2cf   : > { %3186 = vst.sshfl [vmem:[%s224_s17] sm:$0x33 pattern:$0x76325410] %v2616_v22 }
 0x2d0 PF: > { %s15_s18 = sadd.s32 1, %s3592_s18  }
 0x2d1   : > { %p12_p4 = scmp.ge.s32.totalorder %s15_s18, 4  }
 0x2d3   :  { %14 = sbr.rel (!%p12_p4) target bundleno = 1 (0x1), region = 85 }

</bundles_post_ra>
